<compile_context>
chip_gen: v5e
topology: v5e:2x2
jax: 0.10.0
libtpu: 0.0.40
codegen_flags: <defaults>
</compile_context>

<pallas_src>
import functools

import jax
import jax.numpy as jnp
import numpy as np
from jax.experimental import pallas as pl
from jax.experimental.pallas import tpu as pltpu


# ------------------------------- helpers ------------------------------------
def _round_up(x, m):
    return ((x + m - 1) // m) * m


def _cdiv(a, b):
    return (a + b - 1) // b


def _pick_unroll(n, cap=8):
    """Largest unroll factor in {cap,4,2,1} dividing n (keeps LLO visibility
    without exploding instruction count / vreg live ranges at large T)."""
    for u in (cap, 4, 2):
        if u <= n and n % u == 0:
            return u
    return 1


def _pad_gates_cols(w, H, H_pad):
    """w: (rows, 3H) with PyTorch gate order [r|z|n] -> (rows, 3*H_pad); each gate
    block is zero-padded to H_pad so every gate slice is 128-lane aligned."""
    parts = []
    for g in range(3):
        blk = w[:, g * H:(g + 1) * H]
        parts.append(jnp.pad(blk, ((0, 0), (0, H_pad - H))))
    return jnp.concatenate(parts, axis=1)


# --------------------------- fused forward kernel ----------------------------
def _make_fused_gru_kernel(T, T_chunk, B_tile, H_pad, num_layers):
    n_chunks = _cdiv(T, T_chunk)
    n_buf = 2 if n_chunks > 1 else 1
    multi = num_layers > 1

    def kernel(x_ref, wih_ref, whh_ref, bih_ref, bhhn_ref, fcw_ref, fcb_ref,
               o_ref, gi_buf, *seq_scratch):
        seq_sc = seq_scratch[0] if multi else None
        layer = pl.program_id(1)

        wih = wih_ref[0]            # (D_max, 3*H_pad)
        whh = whh_ref[0]            # (H_pad, 3*H_pad)
        bih = bih_ref[0]            # (1, 3*H_pad)  (b_hh r/z slices already folded in)
        bhh_n = bhhn_ref[0]         # (1, H_pad)    (n-gate recurrent bias)
        cdt = whh.dtype

        # ---- hoisted input projection, computed per time chunk ------------------
        def compute_gi(c):
            slot = c % n_buf
            t0 = c * T_chunk
            tc = min(T_chunk, T - t0)

            def from_x():
                xin = x_ref[pl.ds(t0, tc)]                       # (tc, B_tile, D_max)
                xin = xin.reshape(tc * B_tile, xin.shape[-1]).astype(cdt)
                gi = jnp.dot(xin, wih, preferred_element_type=jnp.float32) + bih
                gi_buf[slot, pl.ds(0, tc)] = (
                    gi.reshape(tc, B_tile, 3 * H_pad).astype(gi_buf.dtype))

            if multi:
                def from_seq():
                    sin = seq_sc[pl.ds(t0, tc)]                  # (tc, B_tile, H_pad)
                    sin = sin.reshape(tc * B_tile, H_pad).astype(cdt)
                    gi = jnp.dot(sin, wih[:H_pad, :],
                                 preferred_element_type=jnp.float32) + bih
                    gi_buf[slot, pl.ds(0, tc)] = (
                        gi.reshape(tc, B_tile, 3 * H_pad).astype(gi_buf.dtype))

                pl.when(layer == 0)(from_x)
                pl.when(layer > 0)(from_seq)
            else:
                from_x()

        # ---- serial recurrence ---------------------------------------------------
        def make_step(chunk_base, slot):
            def step(tl, h):
                gi = gi_buf[slot, tl].astype(jnp.float32)        # (B_tile, 3*H_pad)
                gh = jnp.dot(h.astype(cdt), whh,
                             preferred_element_type=jnp.float32) # (B_tile, 3*H_pad)
                # PyTorch gate order r, z, n (each slice 128-lane aligned)
                r = jax.nn.sigmoid(gi[:, :H_pad] + gh[:, :H_pad])
                z = jax.nn.sigmoid(gi[:, H_pad:2 * H_pad] + gh[:, H_pad:2 * H_pad])
                n = jnp.tanh(gi[:, 2 * H_pad:] + r * (gh[:, 2 * H_pad:] + bhh_n))
                h_new = n + z * (h - n)                          # == (1-z)*n + z*h
                if multi:
                    seq_sc[chunk_base + tl] = h_new.astype(seq_sc.dtype)
                return h_new
            return step

        # Padded hidden lanes stay exactly zero because h0 == 0 (as in the PyTorch
        # module) and padded weight rows/cols/biases are zero.
        h = jnp.zeros((B_tile, H_pad), jnp.float32)
        compute_gi(0)
        for c in range(n_chunks):            # static, small (T / T_chunk)
            if c + 1 < n_chunks:
                compute_gi(c + 1)            # MXU work for next chunk, overlappable
            t0 = c * T_chunk
            tc = min(T_chunk, T - t0)
            h = jax.lax.fori_loop(0, tc, make_step(t0, c % n_buf), h,
                                  unroll=_pick_unroll(tc))

        # ---- FC + softmax on the final layer's final hidden state ---------------
        # Padded class columns have bias = -1e30 (kept in f32) -> exp() == 0.
        @pl.when(layer == num_layers - 1)
        def _():
            logits = (jnp.dot(h, fcw_ref[...], preferred_element_type=jnp.float32)
                      + fcb_ref[...])
            m = jnp.max(logits, axis=1, keepdims=True)
            e = jnp.exp(logits - m)
            o_ref[...] = (e / jnp.sum(e, axis=1, keepdims=True)).astype(o_ref.dtype)

    return kernel


def _vmem_budget_bytes(T, T_chunk, n_buf, B_tile, D_max, H_pad, C_pad,
                       num_layers, w_dtype):
    """Tight scoped-VMEM budget: real footprint + headroom (never blindly 64 MiB)."""
    ws = jnp.dtype(w_dtype).itemsize
    f32 = 4
    n = 0
    n += 2 * T * B_tile * D_max * ws          # x tile (double-buffered by Pallas)
    n += 2 * D_max * 3 * H_pad * ws           # w_ih (one layer, double-buffered)
    n += 2 * H_pad * 3 * H_pad * ws           # w_hh
    n += 2 * 8 * 3 * H_pad * f32              # b_ih (sublane-padded)
    n += 2 * 8 * H_pad * f32                  # b_hh (n gate)
    n += 2 * H_pad * C_pad * f32              # fc_w
    n += 2 * 8 * C_pad * f32                  # fc_b
    n += 2 * B_tile * C_pad * f32             # output tile
    n += n_buf * T_chunk * B_tile * 3 * H_pad * ws   # GI chunk scratch
    if num_layers > 1:
        n += T * B_tile * H_pad * ws          # inter-layer sequence scratch
    return min(max(int(n * 1.25) + (1 << 20), 4 << 20), 128 << 20)


def gru_model_forward(x, padded, *, num_classes):
    """x: (B, T, input_size) batch-first, like PyTorch. Returns (B, num_classes)."""
    B, T, Din = x.shape
    w_ih, w_hh = padded["w_ih"], padded["w_hh"]        # (L, D_max, 3H_pad) / (L, H_pad, 3H_pad)
    b_ih, b_hh_n = padded["b_ih"], padded["b_hh_n"]    # (L, 1, 3H_pad) / (L, 1, H_pad)
    fc_w, fc_b = padded["fc_w_t"], padded["fc_b"]      # (H_pad, C_pad) / (1, C_pad)

    num_layers, D_max, _ = w_ih.shape
    H_pad = w_hh.shape[1]
    C_pad = fc_w.shape[1]
    w_dtype = w_ih.dtype

    # Batch tiling: at most 2 tiles so v7x's two TensorCores each take one
    # (no-op on single-core v5e/v6e).
    B_pad8 = _round_up(B, 8)
    if B_pad8 >= 16:
        n_bt = 2
        B_tile = _round_up(_cdiv(B_pad8, 2), 8)
    else:
        n_bt = 1
        B_tile = B_pad8
    B_pad = n_bt * B_tile

    # Chunk the hoisted GI so its scratch is O(T_chunk), not O(T).
    T_chunk = min(T, 64)
    n_chunks = _cdiv(T, T_chunk)
    n_buf = 2 if n_chunks > 1 else 1

    # batch-first -> time-major; pad batch to B_pad and features to D_max.
    x_tm = jnp.transpose(x, (1, 0, 2)).astype(w_dtype)
    x_tm = jnp.pad(x_tm, ((0, 0), (0, B_pad - B), (0, D_max - Din)))

    in_specs = [
        # x stays resident across layers (only read at layer 0); cheap at these sizes.
        pl.BlockSpec((T, B_tile, D_max), lambda bt, l: (0, bt, 0)),
        pl.BlockSpec((1, D_max, 3 * H_pad), lambda bt, l: (l, 0, 0)),
        pl.BlockSpec((1, H_pad, 3 * H_pad), lambda bt, l: (l, 0, 0)),
        pl.BlockSpec((1, 1, 3 * H_pad), lambda bt, l: (l, 0, 0)),
        pl.BlockSpec((1, 1, H_pad), lambda bt, l: (l, 0, 0)),
        pl.BlockSpec((H_pad, C_pad), lambda bt, l: (0, 0)),
        pl.BlockSpec((1, C_pad), lambda bt, l: (0, 0)),
    ]
    out_spec = pl.BlockSpec((B_tile, C_pad), lambda bt, l: (bt, 0))

    scratch_shapes = [pltpu.VMEM((n_buf, T_chunk, B_tile, 3 * H_pad), w_dtype)]
    if num_layers > 1:
        scratch_shapes.append(pltpu.VMEM((T, B_tile, H_pad), w_dtype))

    vmem_bytes = _vmem_budget_bytes(T, T_chunk, n_buf, B_tile, D_max, H_pad, C_pad,
                                    num_layers, w_dtype)

    kernel = _make_fused_gru_kernel(T, T_chunk, B_tile, H_pad, num_layers)

    out_pad = pl.pallas_call(
        kernel,
        out_shape=jax.ShapeDtypeStruct((B_pad, C_pad), jnp.float32),
        grid=(n_bt, num_layers),
        in_specs=in_specs,
        out_specs=out_spec,
        scratch_shapes=scratch_shapes,
        compiler_params=pltpu.CompilerParams(
            dimension_semantics=("parallel", "arbitrary"),
            vmem_limit_bytes=vmem_bytes),
    )(x_tm, w_ih, w_hh, b_ih, b_hh_n, fc_w, fc_b)

    return out_pad[:B, :num_classes]


# ----------------------------- params / padding ------------------------------
def init_params(key, input_size, hidden_size, num_layers, num_classes):
    """PyTorch-layout params: w_ih (3H, Din), w_hh (3H, H), gate order r,z,n."""
    k = 1.0 / float(np.sqrt(hidden_size))
    layers = []
    for l in range(num_layers):
        din = input_size if l == 0 else hidden_size
        key, k1, k2, k3, k4 = jax.random.split(key, 5)
        layers.append({
            "w_ih": jax.random.uniform(k1, (3 * hidden_size, din), jnp.float32, -k, k),
            "w_hh": jax.random.uniform(k2, (3 * hidden_size, hidden_size), jnp.float32, -k, k),
            "b_ih": jax.random.uniform(k3, (3 * hidden_size,), jnp.float32, -k, k),
            "b_hh": jax.random.uniform(k4, (3 * hidden_size,), jnp.float32, -k, k),
        })
    key, k5, k6 = jax.random.split(key, 3)
    fc_w = jax.random.uniform(k5, (num_classes, hidden_size), jnp.float32, -k, k)
    fc_b = jax.random.uniform(k6, (num_classes,), jnp.float32, -k, k)
    return {"gru": layers, "fc_w": fc_w, "fc_b": fc_b}


def prepare_padded_params(params, input_size, hidden_size, num_classes,
                          weight_dtype=jnp.float32):
    """Transpose, zero-pad and stack weights so every matmul / gate slice is
    lane-aligned and per-layer blocks can be streamed via the layer grid axis.
    weight_dtype=jnp.bfloat16 halves weight/scratch footprint on v6e/v7x."""
    H = hidden_size
    H_pad = _round_up(H, 128)
    Din_pad = _round_up(input_size, 128)
    C_pad = _round_up(num_classes, 128)
    D_max = max(Din_pad, H_pad)

    w_ih_l, w_hh_l, b_ih_l, b_hh_n_l = [], [], [], []
    for l, layer in enumerate(params["gru"]):
        din = input_size if l == 0 else H
        w_ih_t = _pad_gates_cols(layer["w_ih"].T, H, H_pad)          # (din, 3*H_pad)
        w_ih_t = jnp.pad(w_ih_t, ((0, D_max - din), (0, 0)))
        w_hh_t = _pad_gates_cols(layer["w_hh"].T, H, H_pad)          # (H, 3*H_pad)
        w_hh_t = jnp.pad(w_hh_t, ((0, H_pad - H), (0, 0)))
        b_ih = _pad_gates_cols(layer["b_ih"].reshape(1, 3 * H), H, H_pad)
        b_hh = _pad_gates_cols(layer["b_hh"].reshape(1, 3 * H), H, H_pad)
        # Fold b_hh's r/z slices into b_ih (they always appear as b_ih + b_hh);
        # only the n-gate bias must stay inside r * (W_hn h + b_hn).
        b_ih_folded = b_ih.at[:, :2 * H_pad].add(b_hh[:, :2 * H_pad])
        b_hh_n = b_hh[:, 2 * H_pad:]
        w_ih_l.append(w_ih_t)
        w_hh_l.append(w_hh_t)
        b_ih_l.append(b_ih_folded)
        b_hh_n_l.append(b_hh_n)

    fc_w_t = jnp.pad(params["fc_w"].T, ((0, H_pad - H), (0, C_pad - num_classes)))
    fc_b = jnp.pad(params["fc_b"].reshape(1, -1),
                   ((0, 0), (0, C_pad - num_classes)),
                   constant_values=-1e30)                             # mask padded classes

    return {
        "w_ih": jnp.stack(w_ih_l).astype(weight_dtype),      # (L, D_max, 3*H_pad)
        "w_hh": jnp.stack(w_hh_l).astype(weight_dtype),      # (L, H_pad, 3*H_pad)
        "b_ih": jnp.stack(b_ih_l).astype(jnp.float32),       # (L, 1, 3*H_pad)
        "b_hh_n": jnp.stack(b_hh_n_l).astype(jnp.float32),   # (L, 1, H_pad)
        "fc_w_t": fc_w_t.astype(jnp.float32),                # (H_pad, C_pad)
        "fc_b": fc_b.astype(jnp.float32),                    # (1, C_pad)
    }


# ---------------------------- pure-JAX reference ------------------------------
def gru_model_ref(x, params):
    x_tm = jnp.transpose(x, (1, 0, 2))
    for layer in params["gru"]:
        H = layer["w_hh"].shape[1]
        w_ih_t, w_hh_t = layer["w_ih"].T, layer["w_hh"].T
        b_ih, b_hh = layer["b_ih"], layer["b_hh"]

        def step(h, x_t, w_ih_t=w_ih_t, w_hh_t=w_hh_t, b_ih=b_ih, b_hh=b_hh, H=H):
            gi = x_t @ w_ih_t + b_ih
            gh = h @ w_hh_t + b_hh
            r = jax.nn.sigmoid(gi[:, 0:H] + gh[:, 0:H])
            z = jax.nn.sigmoid(gi[:, H:2 * H] + gh[:, H:2 * H])
            n = jnp.tanh(gi[:, 2 * H:3 * H] + r * gh[:, 2 * H:3 * H])
            h_new = (1.0 - z) * n + z * h
            return h_new, h_new

        h0 = jnp.zeros((x_tm.shape[1], H), jnp.float32)
        _, x_tm = jax.lax.scan(step, h0, x_tm)
    logits = x_tm[-1] @ params["fc_w"].T + params["fc_b"]
    return jax.nn.softmax(logits, axis=1)


if __name__ == "__main__":
    B, T = 2, 8
    input_size, hidden_size, num_layers, num_classes = 16, 32, 2, 10

    key = jax.random.PRNGKey(0)
    key, pkey, xkey = jax.random.split(key, 3)
    params = init_params(pkey, input_size, hidden_size, num_layers, num_classes)
    # weight_dtype=jnp.bfloat16 is the v6e/v7x-friendly option; f32 keeps 1e-5 parity.
    padded = prepare_padded_params(params, input_size, hidden_size, num_classes,
                                   weight_dtype=jnp.float32)
    x = jax.random.normal(xkey, (B, T, input_size), jnp.float32)

    fwd = jax.jit(functools.partial(gru_model_forward, num_classes=num_classes))
    out = jax.block_until_ready(fwd(x, padded))

    ref = jax.block_until_ready(gru_model_ref(x, params))
    np.testing.assert_allclose(np.asarray(out), np.asarray(ref), rtol=1e-5, atol=1e-5)
    assert out.shape == (B, num_classes)
    np.testing.assert_allclose(np.asarray(out).sum(axis=1), np.ones(B), rtol=1e-5)

    print("KERNEL_OK")
</pallas_src>

<mosaic_0001>
module attributes {stable_mosaic.version = 11 : i64} {
  func.func @kernel(%arg0: i32, %arg1: i32, %arg2: memref<8x8x128xf32, #tpu.memory_space<vmem>>, %arg3: memref<1x128x384xf32, #tpu.memory_space<vmem>>, %arg4: memref<1x128x384xf32, #tpu.memory_space<vmem>>, %arg5: memref<1x1x384xf32, #tpu.memory_space<vmem>>, %arg6: memref<1x1x128xf32, #tpu.memory_space<vmem>>, %arg7: memref<128x128xf32, #tpu.memory_space<vmem>>, %arg8: memref<1x128xf32, #tpu.memory_space<vmem>>, %arg9: memref<8x128xf32, #tpu.memory_space<vmem>>, %arg10: memref<1x8x8x384xf32, #tpu.memory_space<vmem>>, %arg11: memref<8x8x128xf32, #tpu.memory_space<vmem>>) attributes {dimension_semantics = [#tpu.dimension_semantics<parallel>, #tpu.dimension_semantics<arbitrary>], iteration_bounds = array<i64: 1, 2>, scalar_prefetch = 0 : i64, scratch_operands = 2 : i64, tpu.core_type = #tpu.core_type<tc>, window_params = [{transform_indices = @transform_0, window_bounds = array<i64: 8, 8, 128>}, {transform_indices = @transform_1, window_bounds = array<i64: 1, 128, 384>}, {transform_indices = @transform_2, window_bounds = array<i64: 1, 128, 384>}, {transform_indices = @transform_3, window_bounds = array<i64: 1, 1, 384>}, {transform_indices = @transform_4, window_bounds = array<i64: 1, 1, 128>}, {pipeline_mode = #tpu.pipeline_mode<synchronous>, transform_indices = @transform_5, window_bounds = array<i64: 128, 128>}, {pipeline_mode = #tpu.pipeline_mode<synchronous>, transform_indices = @transform_6, window_bounds = array<i64: 1, 128>}, {transform_indices = @transform_7, window_bounds = array<i64: 8, 128>}]} {
    %c0 = arith.constant 0 : index
    %c0_0 = arith.constant 0 : index
    %c0_1 = arith.constant 0 : index
    %0 = vector.load %arg3[%c0, %c0_0, %c0_1] : memref<1x128x384xf32, #tpu.memory_space<vmem>>, vector<1x128x384xf32>
    %1 = vector.shape_cast %0 : vector<1x128x384xf32> to vector<128x384xf32>
    %c0_2 = arith.constant 0 : index
    %c0_3 = arith.constant 0 : index
    %c0_4 = arith.constant 0 : index
    %2 = vector.load %arg4[%c0_2, %c0_3, %c0_4] : memref<1x128x384xf32, #tpu.memory_space<vmem>>, vector<1x128x384xf32>
    %3 = vector.shape_cast %2 : vector<1x128x384xf32> to vector<128x384xf32>
    %c0_5 = arith.constant 0 : index
    %c0_6 = arith.constant 0 : index
    %c0_7 = arith.constant 0 : index
    %4 = vector.load %arg5[%c0_5, %c0_6, %c0_7] : memref<1x1x384xf32, #tpu.memory_space<vmem>>, vector<1x1x384xf32>
    %5 = vector.shape_cast %4 : vector<1x1x384xf32> to vector<1x384xf32>
    %c0_8 = arith.constant 0 : index
    %c0_9 = arith.constant 0 : index
    %c0_10 = arith.constant 0 : index
    %6 = vector.load %arg6[%c0_8, %c0_9, %c0_10] : memref<1x1x128xf32, #tpu.memory_space<vmem>>, vector<1x1x128xf32>
    %7 = vector.shape_cast %6 : vector<1x1x128xf32> to vector<1x128xf32>
    %cst = arith.constant 0.000000e+00 : f32
    %8 = vector.broadcast %cst : f32 to vector<8x128xf32>
    %c0_i32 = arith.constant 0 : i32
    %9 = arith.cmpi eq, %arg1, %c0_i32 : i32
    %10 = arith.extui %9 : i1 to i32
    %c0_i32_11 = arith.constant 0 : i32
    %11 = arith.cmpi ne, %10, %c0_i32_11 : i32
    scf.if %11 {
      %c0_89 = arith.constant 0 : index
      %c0_90 = arith.constant 0 : index
      %c0_91 = arith.constant 0 : index
      %298 = vector.load %arg2[%c0_89, %c0_90, %c0_91] : memref<8x8x128xf32, #tpu.memory_space<vmem>>, vector<8x8x128xf32>
      %299 = vector.shape_cast %298 : vector<8x8x128xf32> to vector<64x128xf32>
      %cst_92 = arith.constant dense<0.000000e+00> : vector<64x384xf32>
      %300 = tpu.matmul %299, %1, %cst_92 {dimension_numbers = #tpu.dot_dimension_numbers<[1], [0], [0], [1], [0, 0, 1, 1], [], []>} : vector<64x128xf32>, vector<128x384xf32>, vector<64x384xf32> -> vector<64x384xf32>
      %301 = vector.broadcast %5 : vector<1x384xf32> to vector<64x384xf32>
      %302 = arith.addf %300, %301 : vector<64x384xf32>
      %303 = vector.shape_cast %302 : vector<64x384xf32> to vector<8x8x384xf32>
      %c0_93 = arith.constant 0 : index
      %c0_94 = arith.constant 0 : index
      %c0_95 = arith.constant 0 : index
      %c0_96 = arith.constant 0 : index
      %304 = vector.load %arg10[%c0_93, %c0_94, %c0_95, %c0_96] : memref<1x8x8x384xf32, #tpu.memory_space<vmem>>, vector<1x8x8x384xf32>
      %305 = vector.shape_cast %304 : vector<1x8x8x384xf32> to vector<8x8x384xf32>
      %306 = vector.shape_cast %303 : vector<8x8x384xf32> to vector<1x8x8x384xf32>
      tpu.vector_store %arg10[%c0_93, %c0_94, %c0_95, %c0_96], %306 {strides = array<i32>} : memref<1x8x8x384xf32, #tpu.memory_space<vmem>>, vector<1x8x8x384xf32>,
    } else {
    }
    %c0_i32_12 = arith.constant 0 : i32
    %12 = arith.cmpi sgt, %arg1, %c0_i32_12 : i32
    %13 = arith.extui %12 : i1 to i32
    %c0_i32_13 = arith.constant 0 : i32
    %14 = arith.cmpi ne, %13, %c0_i32_13 : i32
    scf.if %14 {
      %c0_89 = arith.constant 0 : index
      %c0_90 = arith.constant 0 : index
      %c0_91 = arith.constant 0 : index
      %298 = vector.load %arg11[%c0_89, %c0_90, %c0_91] : memref<8x8x128xf32, #tpu.memory_space<vmem>>, vector<8x8x128xf32>
      %299 = vector.shape_cast %298 : vector<8x8x128xf32> to vector<64x128xf32>
      %cst_92 = arith.constant dense<0.000000e+00> : vector<64x384xf32>
      %300 = tpu.matmul %299, %1, %cst_92 {dimension_numbers = #tpu.dot_dimension_numbers<[1], [0], [0], [1], [0, 0, 1, 1], [], []>} : vector<64x128xf32>, vector<128x384xf32>, vector<64x384xf32> -> vector<64x384xf32>
      %301 = vector.broadcast %5 : vector<1x384xf32> to vector<64x384xf32>
      %302 = arith.addf %300, %301 : vector<64x384xf32>
      %303 = vector.shape_cast %302 : vector<64x384xf32> to vector<8x8x384xf32>
      %c0_93 = arith.constant 0 : index
      %c0_94 = arith.constant 0 : index
      %c0_95 = arith.constant 0 : index
      %c0_96 = arith.constant 0 : index
      %304 = vector.load %arg10[%c0_93, %c0_94, %c0_95, %c0_96] : memref<1x8x8x384xf32, #tpu.memory_space<vmem>>, vector<1x8x8x384xf32>
      %305 = vector.shape_cast %304 : vector<1x8x8x384xf32> to vector<8x8x384xf32>
      %306 = vector.shape_cast %303 : vector<8x8x384xf32> to vector<1x8x8x384xf32>
      tpu.vector_store %arg10[%c0_93, %c0_94, %c0_95, %c0_96], %306 {strides = array<i32>} : memref<1x8x8x384xf32, #tpu.memory_space<vmem>>, vector<1x8x8x384xf32>,
    } else {
    }
    %c0_i32_14 = arith.constant 0 : i32
    %c0_15 = arith.constant 0 : index
    %15 = arith.index_cast %c0_i32_14 : i32 to index
    %c0_16 = arith.constant 0 : index
    %c0_17 = arith.constant 0 : index
    %16 = vector.load %arg10[%c0_15, %15, %c0_16, %c0_17] : memref<1x8x8x384xf32, #tpu.memory_space<vmem>>, vector<1x1x8x384xf32>
    %17 = vector.shape_cast %16 : vector<1x1x8x384xf32> to vector<8x384xf32>
    %cst_18 = arith.constant dense<0.000000e+00> : vector<8x384xf32>
    %18 = tpu.matmul %8, %3, %cst_18 {dimension_numbers = #tpu.dot_dimension_numbers<[1], [0], [0], [1], [0, 0, 1, 1], [], []>} : vector<8x128xf32>, vector<128x384xf32>, vector<8x384xf32> -> vector<8x384xf32>
    %19 = vector.extract_strided_slice %17 {offsets = [0, 0], sizes = [8, 128], strides = [1, 1]} : vector<8x384xf32> to vector<8x128xf32>
    %20 = vector.extract_strided_slice %18 {offsets = [0, 0], sizes = [8, 128], strides = [1, 1]} : vector<8x384xf32> to vector<8x128xf32>
    %21 = arith.addf %19, %20 : vector<8x128xf32>
    %22 = arith.negf %21 : vector<8x128xf32>
    %23 = math.exp %22 : vector<8x128xf32>
    %cst_19 = arith.constant 1.000000e+00 : f32
    %24 = vector.broadcast %cst_19 : f32 to vector<8x128xf32>
    %25 = arith.addf %24, %23 : vector<8x128xf32>
    %26 = arith.divf %24, %25 : vector<8x128xf32>
    %27 = vector.extract_strided_slice %17 {offsets = [0, 128], sizes = [8, 128], strides = [1, 1]} : vector<8x384xf32> to vector<8x128xf32>
    %28 = vector.extract_strided_slice %18 {offsets = [0, 128], sizes = [8, 128], strides = [1, 1]} : vector<8x384xf32> to vector<8x128xf32>
    %29 = arith.addf %27, %28 : vector<8x128xf32>
    %30 = arith.negf %29 : vector<8x128xf32>
    %31 = math.exp %30 : vector<8x128xf32>
    %cst_20 = arith.constant 1.000000e+00 : f32
    %32 = vector.broadcast %cst_20 : f32 to vector<8x128xf32>
    %33 = arith.addf %32, %31 : vector<8x128xf32>
    %34 = arith.divf %32, %33 : vector<8x128xf32>
    %35 = vector.extract_strided_slice %17 {offsets = [0, 256], sizes = [8, 128], strides = [1, 1]} : vector<8x384xf32> to vector<8x128xf32>
    %36 = vector.extract_strided_slice %18 {offsets = [0, 256], sizes = [8, 128], strides = [1, 1]} : vector<8x384xf32> to vector<8x128xf32>
    %37 = vector.broadcast %7 : vector<1x128xf32> to vector<8x128xf32>
    %38 = arith.addf %36, %37 : vector<8x128xf32>
    %39 = arith.mulf %26, %38 : vector<8x128xf32>
    %40 = arith.addf %35, %39 : vector<8x128xf32>
    %41 = math.tanh %40 : vector<8x128xf32>
    %42 = arith.subf %8, %41 : vector<8x128xf32>
    %43 = arith.mulf %34, %42 : vector<8x128xf32>
    %44 = arith.addf %41, %43 : vector<8x128xf32>
    %c0_i32_21 = arith.constant 0 : i32
    %45 = arith.addi %c0_i32_21, %c0_i32_14 : i32
    %46 = arith.index_cast %45 : i32 to index
    %c0_22 = arith.constant 0 : index
    %c0_23 = arith.constant 0 : index
    %47 = vector.load %arg11[%46, %c0_22, %c0_23] : memref<8x8x128xf32, #tpu.memory_space<vmem>>, vector<1x8x128xf32>
    %48 = vector.shape_cast %47 : vector<1x8x128xf32> to vector<8x128xf32>
    %49 = vector.shape_cast %44 : vector<8x128xf32> to vector<1x8x128xf32>
    tpu.vector_store %arg11[%46, %c0_22, %c0_23], %49 {strides = array<i32>} : memref<8x8x128xf32, #tpu.memory_space<vmem>>, vector<1x8x128xf32>,
    %c1_i32 = arith.constant 1 : i32
    %c0_24 = arith.constant 0 : index
    %50 = arith.index_cast %c1_i32 : i32 to index
    %c0_25 = arith.constant 0 : index
    %c0_26 = arith.constant 0 : index
    %51 = vector.load %arg10[%c0_24, %50, %c0_25, %c0_26] : memref<1x8x8x384xf32, #tpu.memory_space<vmem>>, vector<1x1x8x384xf32>
    %52 = vector.shape_cast %51 : vector<1x1x8x384xf32> to vector<8x384xf32>
    %cst_27 = arith.constant dense<0.000000e+00> : vector<8x384xf32>
    %53 = tpu.matmul %44, %3, %cst_27 {dimension_numbers = #tpu.dot_dimension_numbers<[1], [0], [0], [1], [0, 0, 1, 1], [], []>} : vector<8x128xf32>, vector<128x384xf32>, vector<8x384xf32> -> vector<8x384xf32>
    %54 = vector.extract_strided_slice %52 {offsets = [0, 0], sizes = [8, 128], strides = [1, 1]} : vector<8x384xf32> to vector<8x128xf32>
    %55 = vector.extract_strided_slice %53 {offsets = [0, 0], sizes = [8, 128], strides = [1, 1]} : vector<8x384xf32> to vector<8x128xf32>
    %56 = arith.addf %54, %55 : vector<8x128xf32>
    %57 = arith.negf %56 : vector<8x128xf32>
    %58 = math.exp %57 : vector<8x128xf32>
    %cst_28 = arith.constant 1.000000e+00 : f32
    %59 = vector.broadcast %cst_28 : f32 to vector<8x128xf32>
    %60 = arith.addf %59, %58 : vector<8x128xf32>
    %61 = arith.divf %59, %60 : vector<8x128xf32>
    %62 = vector.extract_strided_slice %52 {offsets = [0, 128], sizes = [8, 128], strides = [1, 1]} : vector<8x384xf32> to vector<8x128xf32>
    %63 = vector.extract_strided_slice %53 {offsets = [0, 128], sizes = [8, 128], strides = [1, 1]} : vector<8x384xf32> to vector<8x128xf32>
    %64 = arith.addf %62, %63 : vector<8x128xf32>
    %65 = arith.negf %64 : vector<8x128xf32>
    %66 = math.exp %65 : vector<8x128xf32>
    %cst_29 = arith.constant 1.000000e+00 : f32
    %67 = vector.broadcast %cst_29 : f32 to vector<8x128xf32>
    %68 = arith.addf %67, %66 : vector<8x128xf32>
    %69 = arith.divf %67, %68 : vector<8x128xf32>
    %70 = vector.extract_strided_slice %52 {offsets = [0, 256], sizes = [8, 128], strides = [1, 1]} : vector<8x384xf32> to vector<8x128xf32>
    %71 = vector.extract_strided_slice %53 {offsets = [0, 256], sizes = [8, 128], strides = [1, 1]} : vector<8x384xf32> to vector<8x128xf32>
    %72 = vector.broadcast %7 : vector<1x128xf32> to vector<8x128xf32>
    %73 = arith.addf %71, %72 : vector<8x128xf32>
    %74 = arith.mulf %61, %73 : vector<8x128xf32>
    %75 = arith.addf %70, %74 : vector<8x128xf32>
    %76 = math.tanh %75 : vector<8x128xf32>
    %77 = arith.subf %44, %76 : vector<8x128xf32>
    %78 = arith.mulf %69, %77 : vector<8x128xf32>
    %79 = arith.addf %76, %78 : vector<8x128xf32>
    %c0_i32_30 = arith.constant 0 : i32
    %80 = arith.addi %c0_i32_30, %c1_i32 : i32
    %81 = arith.index_cast %80 : i32 to index
    %c0_31 = arith.constant 0 : index
    %c0_32 = arith.constant 0 : index
    %82 = vector.load %arg11[%81, %c0_31, %c0_32] : memref<8x8x128xf32, #tpu.memory_space<vmem>>, vector<1x8x128xf32>
    %83 = vector.shape_cast %82 : vector<1x8x128xf32> to vector<8x128xf32>
    %84 = vector.shape_cast %79 : vector<8x128xf32> to vector<1x8x128xf32>
    tpu.vector_store %arg11[%81, %c0_31, %c0_32], %84 {strides = array<i32>} : memref<8x8x128xf32, #tpu.memory_space<vmem>>, vector<1x8x128xf32>,
    %c2_i32 = arith.constant 2 : i32
    %c0_33 = arith.constant 0 : index
    %85 = arith.index_cast %c2_i32 : i32 to index
    %c0_34 = arith.constant 0 : index
    %c0_35 = arith.constant 0 : index
    %86 = vector.load %arg10[%c0_33, %85, %c0_34, %c0_35] : memref<1x8x8x384xf32, #tpu.memory_space<vmem>>, vector<1x1x8x384xf32>
    %87 = vector.shape_cast %86 : vector<1x1x8x384xf32> to vector<8x384xf32>
    %cst_36 = arith.constant dense<0.000000e+00> : vector<8x384xf32>
    %88 = tpu.matmul %79, %3, %cst_36 {dimension_numbers = #tpu.dot_dimension_numbers<[1], [0], [0], [1], [0, 0, 1, 1], [], []>} : vector<8x128xf32>, vector<128x384xf32>, vector<8x384xf32> -> vector<8x384xf32>
    %89 = vector.extract_strided_slice %87 {offsets = [0, 0], sizes = [8, 128], strides = [1, 1]} : vector<8x384xf32> to vector<8x128xf32>
    %90 = vector.extract_strided_slice %88 {offsets = [0, 0], sizes = [8, 128], strides = [1, 1]} : vector<8x384xf32> to vector<8x128xf32>
    %91 = arith.addf %89, %90 : vector<8x128xf32>
    %92 = arith.negf %91 : vector<8x128xf32>
    %93 = math.exp %92 : vector<8x128xf32>
    %cst_37 = arith.constant 1.000000e+00 : f32
    %94 = vector.broadcast %cst_37 : f32 to vector<8x128xf32>
    %95 = arith.addf %94, %93 : vector<8x128xf32>
    %96 = arith.divf %94, %95 : vector<8x128xf32>
    %97 = vector.extract_strided_slice %87 {offsets = [0, 128], sizes = [8, 128], strides = [1, 1]} : vector<8x384xf32> to vector<8x128xf32>
    %98 = vector.extract_strided_slice %88 {offsets = [0, 128], sizes = [8, 128], strides = [1, 1]} : vector<8x384xf32> to vector<8x128xf32>
    %99 = arith.addf %97, %98 : vector<8x128xf32>
    %100 = arith.negf %99 : vector<8x128xf32>
    %101 = math.exp %100 : vector<8x128xf32>
    %cst_38 = arith.constant 1.000000e+00 : f32
    %102 = vector.broadcast %cst_38 : f32 to vector<8x128xf32>
    %103 = arith.addf %102, %101 : vector<8x128xf32>
    %104 = arith.divf %102, %103 : vector<8x128xf32>
    %105 = vector.extract_strided_slice %87 {offsets = [0, 256], sizes = [8, 128], strides = [1, 1]} : vector<8x384xf32> to vector<8x128xf32>
    %106 = vector.extract_strided_slice %88 {offsets = [0, 256], sizes = [8, 128], strides = [1, 1]} : vector<8x384xf32> to vector<8x128xf32>
    %107 = vector.broadcast %7 : vector<1x128xf32> to vector<8x128xf32>
    %108 = arith.addf %106, %107 : vector<8x128xf32>
    %109 = arith.mulf %96, %108 : vector<8x128xf32>
    %110 = arith.addf %105, %109 : vector<8x128xf32>
    %111 = math.tanh %110 : vector<8x128xf32>
    %112 = arith.subf %79, %111 : vector<8x128xf32>
    %113 = arith.mulf %104, %112 : vector<8x128xf32>
    %114 = arith.addf %111, %113 : vector<8x128xf32>
    %c0_i32_39 = arith.constant 0 : i32
    %115 = arith.addi %c0_i32_39, %c2_i32 : i32
    %116 = arith.index_cast %115 : i32 to index
    %c0_40 = arith.constant 0 : index
    %c0_41 = arith.constant 0 : index
    %117 = vector.load %arg11[%116, %c0_40, %c0_41] : memref<8x8x128xf32, #tpu.memory_space<vmem>>, vector<1x8x128xf32>
    %118 = vector.shape_cast %117 : vector<1x8x128xf32> to vector<8x128xf32>
    %119 = vector.shape_cast %114 : vector<8x128xf32> to vector<1x8x128xf32>
    tpu.vector_store %arg11[%116, %c0_40, %c0_41], %119 {strides = array<i32>} : memref<8x8x128xf32, #tpu.memory_space<vmem>>, vector<1x8x128xf32>,
    %c3_i32 = arith.constant 3 : i32
    %c0_42 = arith.constant 0 : index
    %120 = arith.index_cast %c3_i32 : i32 to index
    %c0_43 = arith.constant 0 : index
    %c0_44 = arith.constant 0 : index
    %121 = vector.load %arg10[%c0_42, %120, %c0_43, %c0_44] : memref<1x8x8x384xf32, #tpu.memory_space<vmem>>, vector<1x1x8x384xf32>
    %122 = vector.shape_cast %121 : vector<1x1x8x384xf32> to vector<8x384xf32>
    %cst_45 = arith.constant dense<0.000000e+00> : vector<8x384xf32>
    %123 = tpu.matmul %114, %3, %cst_45 {dimension_numbers = #tpu.dot_dimension_numbers<[1], [0], [0], [1], [0, 0, 1, 1], [], []>} : vector<8x128xf32>, vector<128x384xf32>, vector<8x384xf32> -> vector<8x384xf32>
    %124 = vector.extract_strided_slice %122 {offsets = [0, 0], sizes = [8, 128], strides = [1, 1]} : vector<8x384xf32> to vector<8x128xf32>
    %125 = vector.extract_strided_slice %123 {offsets = [0, 0], sizes = [8, 128], strides = [1, 1]} : vector<8x384xf32> to vector<8x128xf32>
    %126 = arith.addf %124, %125 : vector<8x128xf32>
    %127 = arith.negf %126 : vector<8x128xf32>
    %128 = math.exp %127 : vector<8x128xf32>
    %cst_46 = arith.constant 1.000000e+00 : f32
    %129 = vector.broadcast %cst_46 : f32 to vector<8x128xf32>
    %130 = arith.addf %129, %128 : vector<8x128xf32>
    %131 = arith.divf %129, %130 : vector<8x128xf32>
    %132 = vector.extract_strided_slice %122 {offsets = [0, 128], sizes = [8, 128], strides = [1, 1]} : vector<8x384xf32> to vector<8x128xf32>
    %133 = vector.extract_strided_slice %123 {offsets = [0, 128], sizes = [8, 128], strides = [1, 1]} : vector<8x384xf32> to vector<8x128xf32>
    %134 = arith.addf %132, %133 : vector<8x128xf32>
    %135 = arith.negf %134 : vector<8x128xf32>
    %136 = math.exp %135 : vector<8x128xf32>
    %cst_47 = arith.constant 1.000000e+00 : f32
    %137 = vector.broadcast %cst_47 : f32 to vector<8x128xf32>
    %138 = arith.addf %137, %136 : vector<8x128xf32>
    %139 = arith.divf %137, %138 : vector<8x128xf32>
    %140 = vector.extract_strided_slice %122 {offsets = [0, 256], sizes = [8, 128], strides = [1, 1]} : vector<8x384xf32> to vector<8x128xf32>
    %141 = vector.extract_strided_slice %123 {offsets = [0, 256], sizes = [8, 128], strides = [1, 1]} : vector<8x384xf32> to vector<8x128xf32>
    %142 = vector.broadcast %7 : vector<1x128xf32> to vector<8x128xf32>
    %143 = arith.addf %141, %142 : vector<8x128xf32>
    %144 = arith.mulf %131, %143 : vector<8x128xf32>
    %145 = arith.addf %140, %144 : vector<8x128xf32>
    %146 = math.tanh %145 : vector<8x128xf32>
    %147 = arith.subf %114, %146 : vector<8x128xf32>
    %148 = arith.mulf %139, %147 : vector<8x128xf32>
    %149 = arith.addf %146, %148 : vector<8x128xf32>
    %c0_i32_48 = arith.constant 0 : i32
    %150 = arith.addi %c0_i32_48, %c3_i32 : i32
    %151 = arith.index_cast %150 : i32 to index
    %c0_49 = arith.constant 0 : index
    %c0_50 = arith.constant 0 : index
    %152 = vector.load %arg11[%151, %c0_49, %c0_50] : memref<8x8x128xf32, #tpu.memory_space<vmem>>, vector<1x8x128xf32>
    %153 = vector.shape_cast %152 : vector<1x8x128xf32> to vector<8x128xf32>
    %154 = vector.shape_cast %149 : vector<8x128xf32> to vector<1x8x128xf32>
    tpu.vector_store %arg11[%151, %c0_49, %c0_50], %154 {strides = array<i32>} : memref<8x8x128xf32, #tpu.memory_space<vmem>>, vector<1x8x128xf32>,
    %c4_i32 = arith.constant 4 : i32
    %c0_51 = arith.constant 0 : index
    %155 = arith.index_cast %c4_i32 : i32 to index
    %c0_52 = arith.constant 0 : index
    %c0_53 = arith.constant 0 : index
    %156 = vector.load %arg10[%c0_51, %155, %c0_52, %c0_53] : memref<1x8x8x384xf32, #tpu.memory_space<vmem>>, vector<1x1x8x384xf32>
    %157 = vector.shape_cast %156 : vector<1x1x8x384xf32> to vector<8x384xf32>
    %cst_54 = arith.constant dense<0.000000e+00> : vector<8x384xf32>
    %158 = tpu.matmul %149, %3, %cst_54 {dimension_numbers = #tpu.dot_dimension_numbers<[1], [0], [0], [1], [0, 0, 1, 1], [], []>} : vector<8x128xf32>, vector<128x384xf32>, vector<8x384xf32> -> vector<8x384xf32>
    %159 = vector.extract_strided_slice %157 {offsets = [0, 0], sizes = [8, 128], strides = [1, 1]} : vector<8x384xf32> to vector<8x128xf32>
    %160 = vector.extract_strided_slice %158 {offsets = [0, 0], sizes = [8, 128], strides = [1, 1]} : vector<8x384xf32> to vector<8x128xf32>
    %161 = arith.addf %159, %160 : vector<8x128xf32>
    %162 = arith.negf %161 : vector<8x128xf32>
    %163 = math.exp %162 : vector<8x128xf32>
    %cst_55 = arith.constant 1.000000e+00 : f32
    %164 = vector.broadcast %cst_55 : f32 to vector<8x128xf32>
    %165 = arith.addf %164, %163 : vector<8x128xf32>
    %166 = arith.divf %164, %165 : vector<8x128xf32>
    %167 = vector.extract_strided_slice %157 {offsets = [0, 128], sizes = [8, 128], strides = [1, 1]} : vector<8x384xf32> to vector<8x128xf32>
    %168 = vector.extract_strided_slice %158 {offsets = [0, 128], sizes = [8, 128], strides = [1, 1]} : vector<8x384xf32> to vector<8x128xf32>
    %169 = arith.addf %167, %168 : vector<8x128xf32>
    %170 = arith.negf %169 : vector<8x128xf32>
    %171 = math.exp %170 : vector<8x128xf32>
    %cst_56 = arith.constant 1.000000e+00 : f32
    %172 = vector.broadcast %cst_56 : f32 to vector<8x128xf32>
    %173 = arith.addf %172, %171 : vector<8x128xf32>
    %174 = arith.divf %172, %173 : vector<8x128xf32>
    %175 = vector.extract_strided_slice %157 {offsets = [0, 256], sizes = [8, 128], strides = [1, 1]} : vector<8x384xf32> to vector<8x128xf32>
    %176 = vector.extract_strided_slice %158 {offsets = [0, 256], sizes = [8, 128], strides = [1, 1]} : vector<8x384xf32> to vector<8x128xf32>
    %177 = vector.broadcast %7 : vector<1x128xf32> to vector<8x128xf32>
    %178 = arith.addf %176, %177 : vector<8x128xf32>
    %179 = arith.mulf %166, %178 : vector<8x128xf32>
    %180 = arith.addf %175, %179 : vector<8x128xf32>
    %181 = math.tanh %180 : vector<8x128xf32>
    %182 = arith.subf %149, %181 : vector<8x128xf32>
    %183 = arith.mulf %174, %182 : vector<8x128xf32>
    %184 = arith.addf %181, %183 : vector<8x128xf32>
    %c0_i32_57 = arith.constant 0 : i32
    %185 = arith.addi %c0_i32_57, %c4_i32 : i32
    %186 = arith.index_cast %185 : i32 to index
    %c0_58 = arith.constant 0 : index
    %c0_59 = arith.constant 0 : index
    %187 = vector.load %arg11[%186, %c0_58, %c0_59] : memref<8x8x128xf32, #tpu.memory_space<vmem>>, vector<1x8x128xf32>
    %188 = vector.shape_cast %187 : vector<1x8x128xf32> to vector<8x128xf32>
    %189 = vector.shape_cast %184 : vector<8x128xf32> to vector<1x8x128xf32>
    tpu.vector_store %arg11[%186, %c0_58, %c0_59], %189 {strides = array<i32>} : memref<8x8x128xf32, #tpu.memory_space<vmem>>, vector<1x8x128xf32>,
    %c5_i32 = arith.constant 5 : i32
    %c0_60 = arith.constant 0 : index
    %190 = arith.index_cast %c5_i32 : i32 to index
    %c0_61 = arith.constant 0 : index
    %c0_62 = arith.constant 0 : index
    %191 = vector.load %arg10[%c0_60, %190, %c0_61, %c0_62] : memref<1x8x8x384xf32, #tpu.memory_space<vmem>>, vector<1x1x8x384xf32>
    %192 = vector.shape_cast %191 : vector<1x1x8x384xf32> to vector<8x384xf32>
    %cst_63 = arith.constant dense<0.000000e+00> : vector<8x384xf32>
    %193 = tpu.matmul %184, %3, %cst_63 {dimension_numbers = #tpu.dot_dimension_numbers<[1], [0], [0], [1], [0, 0, 1, 1], [], []>} : vector<8x128xf32>, vector<128x384xf32>, vector<8x384xf32> -> vector<8x384xf32>
    %194 = vector.extract_strided_slice %192 {offsets = [0, 0], sizes = [8, 128], strides = [1, 1]} : vector<8x384xf32> to vector<8x128xf32>
    %195 = vector.extract_strided_slice %193 {offsets = [0, 0], sizes = [8, 128], strides = [1, 1]} : vector<8x384xf32> to vector<8x128xf32>
    %196 = arith.addf %194, %195 : vector<8x128xf32>
    %197 = arith.negf %196 : vector<8x128xf32>
    %198 = math.exp %197 : vector<8x128xf32>
    %cst_64 = arith.constant 1.000000e+00 : f32
    %199 = vector.broadcast %cst_64 : f32 to vector<8x128xf32>
    %200 = arith.addf %199, %198 : vector<8x128xf32>
    %201 = arith.divf %199, %200 : vector<8x128xf32>
    %202 = vector.extract_strided_slice %192 {offsets = [0, 128], sizes = [8, 128], strides = [1, 1]} : vector<8x384xf32> to vector<8x128xf32>
    %203 = vector.extract_strided_slice %193 {offsets = [0, 128], sizes = [8, 128], strides = [1, 1]} : vector<8x384xf32> to vector<8x128xf32>
    %204 = arith.addf %202, %203 : vector<8x128xf32>
    %205 = arith.negf %204 : vector<8x128xf32>
    %206 = math.exp %205 : vector<8x128xf32>
    %cst_65 = arith.constant 1.000000e+00 : f32
    %207 = vector.broadcast %cst_65 : f32 to vector<8x128xf32>
    %208 = arith.addf %207, %206 : vector<8x128xf32>
    %209 = arith.divf %207, %208 : vector<8x128xf32>
    %210 = vector.extract_strided_slice %192 {offsets = [0, 256], sizes = [8, 128], strides = [1, 1]} : vector<8x384xf32> to vector<8x128xf32>
    %211 = vector.extract_strided_slice %193 {offsets = [0, 256], sizes = [8, 128], strides = [1, 1]} : vector<8x384xf32> to vector<8x128xf32>
    %212 = vector.broadcast %7 : vector<1x128xf32> to vector<8x128xf32>
    %213 = arith.addf %211, %212 : vector<8x128xf32>
    %214 = arith.mulf %201, %213 : vector<8x128xf32>
    %215 = arith.addf %210, %214 : vector<8x128xf32>
    %216 = math.tanh %215 : vector<8x128xf32>
    %217 = arith.subf %184, %216 : vector<8x128xf32>
    %218 = arith.mulf %209, %217 : vector<8x128xf32>
    %219 = arith.addf %216, %218 : vector<8x128xf32>
    %c0_i32_66 = arith.constant 0 : i32
    %220 = arith.addi %c0_i32_66, %c5_i32 : i32
    %221 = arith.index_cast %220 : i32 to index
    %c0_67 = arith.constant 0 : index
    %c0_68 = arith.constant 0 : index
    %222 = vector.load %arg11[%221, %c0_67, %c0_68] : memref<8x8x128xf32, #tpu.memory_space<vmem>>, vector<1x8x128xf32>
    %223 = vector.shape_cast %222 : vector<1x8x128xf32> to vector<8x128xf32>
    %224 = vector.shape_cast %219 : vector<8x128xf32> to vector<1x8x128xf32>
    tpu.vector_store %arg11[%221, %c0_67, %c0_68], %224 {strides = array<i32>} : memref<8x8x128xf32, #tpu.memory_space<vmem>>, vector<1x8x128xf32>,
    %c6_i32 = arith.constant 6 : i32
    %c0_69 = arith.constant 0 : index
    %225 = arith.index_cast %c6_i32 : i32 to index
    %c0_70 = arith.constant 0 : index
    %c0_71 = arith.constant 0 : index
    %226 = vector.load %arg10[%c0_69, %225, %c0_70, %c0_71] : memref<1x8x8x384xf32, #tpu.memory_space<vmem>>, vector<1x1x8x384xf32>
    %227 = vector.shape_cast %226 : vector<1x1x8x384xf32> to vector<8x384xf32>
    %cst_72 = arith.constant dense<0.000000e+00> : vector<8x384xf32>
    %228 = tpu.matmul %219, %3, %cst_72 {dimension_numbers = #tpu.dot_dimension_numbers<[1], [0], [0], [1], [0, 0, 1, 1], [], []>} : vector<8x128xf32>, vector<128x384xf32>, vector<8x384xf32> -> vector<8x384xf32>
    %229 = vector.extract_strided_slice %227 {offsets = [0, 0], sizes = [8, 128], strides = [1, 1]} : vector<8x384xf32> to vector<8x128xf32>
    %230 = vector.extract_strided_slice %228 {offsets = [0, 0], sizes = [8, 128], strides = [1, 1]} : vector<8x384xf32> to vector<8x128xf32>
    %231 = arith.addf %229, %230 : vector<8x128xf32>
    %232 = arith.negf %231 : vector<8x128xf32>
    %233 = math.exp %232 : vector<8x128xf32>
    %cst_73 = arith.constant 1.000000e+00 : f32
    %234 = vector.broadcast %cst_73 : f32 to vector<8x128xf32>
    %235 = arith.addf %234, %233 : vector<8x128xf32>
    %236 = arith.divf %234, %235 : vector<8x128xf32>
    %237 = vector.extract_strided_slice %227 {offsets = [0, 128], sizes = [8, 128], strides = [1, 1]} : vector<8x384xf32> to vector<8x128xf32>
    %238 = vector.extract_strided_slice %228 {offsets = [0, 128], sizes = [8, 128], strides = [1, 1]} : vector<8x384xf32> to vector<8x128xf32>
    %239 = arith.addf %237, %238 : vector<8x128xf32>
    %240 = arith.negf %239 : vector<8x128xf32>
    %241 = math.exp %240 : vector<8x128xf32>
    %cst_74 = arith.constant 1.000000e+00 : f32
    %242 = vector.broadcast %cst_74 : f32 to vector<8x128xf32>
    %243 = arith.addf %242, %241 : vector<8x128xf32>
    %244 = arith.divf %242, %243 : vector<8x128xf32>
    %245 = vector.extract_strided_slice %227 {offsets = [0, 256], sizes = [8, 128], strides = [1, 1]} : vector<8x384xf32> to vector<8x128xf32>
    %246 = vector.extract_strided_slice %228 {offsets = [0, 256], sizes = [8, 128], strides = [1, 1]} : vector<8x384xf32> to vector<8x128xf32>
    %247 = vector.broadcast %7 : vector<1x128xf32> to vector<8x128xf32>
    %248 = arith.addf %246, %247 : vector<8x128xf32>
    %249 = arith.mulf %236, %248 : vector<8x128xf32>
    %250 = arith.addf %245, %249 : vector<8x128xf32>
    %251 = math.tanh %250 : vector<8x128xf32>
    %252 = arith.subf %219, %251 : vector<8x128xf32>
    %253 = arith.mulf %244, %252 : vector<8x128xf32>
    %254 = arith.addf %251, %253 : vector<8x128xf32>
    %c0_i32_75 = arith.constant 0 : i32
    %255 = arith.addi %c0_i32_75, %c6_i32 : i32
    %256 = arith.index_cast %255 : i32 to index
    %c0_76 = arith.constant 0 : index
    %c0_77 = arith.constant 0 : index
    %257 = vector.load %arg11[%256, %c0_76, %c0_77] : memref<8x8x128xf32, #tpu.memory_space<vmem>>, vector<1x8x128xf32>
    %258 = vector.shape_cast %257 : vector<1x8x128xf32> to vector<8x128xf32>
    %259 = vector.shape_cast %254 : vector<8x128xf32> to vector<1x8x128xf32>
    tpu.vector_store %arg11[%256, %c0_76, %c0_77], %259 {strides = array<i32>} : memref<8x8x128xf32, #tpu.memory_space<vmem>>, vector<1x8x128xf32>,
    %c7_i32 = arith.constant 7 : i32
    %c0_78 = arith.constant 0 : index
    %260 = arith.index_cast %c7_i32 : i32 to index
    %c0_79 = arith.constant 0 : index
    %c0_80 = arith.constant 0 : index
    %261 = vector.load %arg10[%c0_78, %260, %c0_79, %c0_80] : memref<1x8x8x384xf32, #tpu.memory_space<vmem>>, vector<1x1x8x384xf32>
    %262 = vector.shape_cast %261 : vector<1x1x8x384xf32> to vector<8x384xf32>
    %cst_81 = arith.constant dense<0.000000e+00> : vector<8x384xf32>
    %263 = tpu.matmul %254, %3, %cst_81 {dimension_numbers = #tpu.dot_dimension_numbers<[1], [0], [0], [1], [0, 0, 1, 1], [], []>} : vector<8x128xf32>, vector<128x384xf32>, vector<8x384xf32> -> vector<8x384xf32>
    %264 = vector.extract_strided_slice %262 {offsets = [0, 0], sizes = [8, 128], strides = [1, 1]} : vector<8x384xf32> to vector<8x128xf32>
    %265 = vector.extract_strided_slice %263 {offsets = [0, 0], sizes = [8, 128], strides = [1, 1]} : vector<8x384xf32> to vector<8x128xf32>
    %266 = arith.addf %264, %265 : vector<8x128xf32>
    %267 = arith.negf %266 : vector<8x128xf32>
    %268 = math.exp %267 : vector<8x128xf32>
    %cst_82 = arith.constant 1.000000e+00 : f32
    %269 = vector.broadcast %cst_82 : f32 to vector<8x128xf32>
    %270 = arith.addf %269, %268 : vector<8x128xf32>
    %271 = arith.divf %269, %270 : vector<8x128xf32>
    %272 = vector.extract_strided_slice %262 {offsets = [0, 128], sizes = [8, 128], strides = [1, 1]} : vector<8x384xf32> to vector<8x128xf32>
    %273 = vector.extract_strided_slice %263 {offsets = [0, 128], sizes = [8, 128], strides = [1, 1]} : vector<8x384xf32> to vector<8x128xf32>
    %274 = arith.addf %272, %273 : vector<8x128xf32>
    %275 = arith.negf %274 : vector<8x128xf32>
    %276 = math.exp %275 : vector<8x128xf32>
    %cst_83 = arith.constant 1.000000e+00 : f32
    %277 = vector.broadcast %cst_83 : f32 to vector<8x128xf32>
    %278 = arith.addf %277, %276 : vector<8x128xf32>
    %279 = arith.divf %277, %278 : vector<8x128xf32>
    %280 = vector.extract_strided_slice %262 {offsets = [0, 256], sizes = [8, 128], strides = [1, 1]} : vector<8x384xf32> to vector<8x128xf32>
    %281 = vector.extract_strided_slice %263 {offsets = [0, 256], sizes = [8, 128], strides = [1, 1]} : vector<8x384xf32> to vector<8x128xf32>
    %282 = vector.broadcast %7 : vector<1x128xf32> to vector<8x128xf32>
    %283 = arith.addf %281, %282 : vector<8x128xf32>
    %284 = arith.mulf %271, %283 : vector<8x128xf32>
    %285 = arith.addf %280, %284 : vector<8x128xf32>
    %286 = math.tanh %285 : vector<8x128xf32>
    %287 = arith.subf %254, %286 : vector<8x128xf32>
    %288 = arith.mulf %279, %287 : vector<8x128xf32>
    %289 = arith.addf %286, %288 : vector<8x128xf32>
    %c0_i32_84 = arith.constant 0 : i32
    %290 = arith.addi %c0_i32_84, %c7_i32 : i32
    %291 = arith.index_cast %290 : i32 to index
    %c0_85 = arith.constant 0 : index
    %c0_86 = arith.constant 0 : index
    %292 = vector.load %arg11[%291, %c0_85, %c0_86] : memref<8x8x128xf32, #tpu.memory_space<vmem>>, vector<1x8x128xf32>
    %293 = vector.shape_cast %292 : vector<1x8x128xf32> to vector<8x128xf32>
    %294 = vector.shape_cast %289 : vector<8x128xf32> to vector<1x8x128xf32>
    tpu.vector_store %arg11[%291, %c0_85, %c0_86], %294 {strides = array<i32>} : memref<8x8x128xf32, #tpu.memory_space<vmem>>, vector<1x8x128xf32>,
    %c8_i32 = arith.constant 8 : i32
    %c1_i32_87 = arith.constant 1 : i32
    %295 = arith.cmpi eq, %arg1, %c1_i32_87 : i32
    %296 = arith.extui %295 : i1 to i32
    %c0_i32_88 = arith.constant 0 : i32
    %297 = arith.cmpi ne, %296, %c0_i32_88 : i32
    scf.if %297 {
      %c0_89 = arith.constant 0 : index
      %c0_90 = arith.constant 0 : index
      %298 = vector.load %arg7[%c0_89, %c0_90] : memref<128x128xf32, #tpu.memory_space<vmem>>, vector<128x128xf32>
      %cst_91 = arith.constant dense<0.000000e+00> : vector<8x128xf32>
      %299 = tpu.matmul %289, %298, %cst_91 {dimension_numbers = #tpu.dot_dimension_numbers<[1], [0], [0], [1], [0, 0, 1, 1], [], []>} : vector<8x128xf32>, vector<128x128xf32>, vector<8x128xf32> -> vector<8x128xf32>
      %c0_92 = arith.constant 0 : index
      %c0_93 = arith.constant 0 : index
      %300 = vector.load %arg8[%c0_92, %c0_93] : memref<1x128xf32, #tpu.memory_space<vmem>>, vector<1x128xf32>
      %301 = vector.broadcast %300 : vector<1x128xf32> to vector<8x128xf32>
      %302 = arith.addf %299, %301 : vector<8x128xf32>
      %cst_94 = arith.constant dense<0xFF800000> : vector<8xf32>
      %303 = vector.multi_reduction <maximumf>, %302, %cst_94 [1] : vector<8x128xf32> to vector<8xf32>
      %304 = vector.shape_cast %303 : vector<8xf32> to vector<8x1xf32>
      %305 = vector.broadcast %304 : vector<8x1xf32> to vector<8x128xf32>
      %306 = arith.subf %302, %305 : vector<8x128xf32>
      %307 = math.exp %306 : vector<8x128xf32>
      %cst_95 = arith.constant dense<0.000000e+00> : vector<8xf32>
      %308 = vector.multi_reduction <add>, %307, %cst_95 [1] : vector<8x128xf32> to vector<8xf32>
      %309 = vector.shape_cast %308 : vector<8xf32> to vector<8x1xf32>
      %310 = vector.broadcast %309 : vector<8x1xf32> to vector<8x128xf32>
      %311 = arith.divf %307, %310 : vector<8x128xf32>
      %c0_96 = arith.constant 0 : index
      %c0_97 = arith.constant 0 : index
      %312 = vector.load %arg9[%c0_96, %c0_97] : memref<8x128xf32, #tpu.memory_space<vmem>>, vector<8x128xf32>
      tpu.vector_store %arg9[%c0_96, %c0_97], %311 {strides = array<i32>} : memref<8x128xf32, #tpu.memory_space<vmem>>, vector<8x128xf32>,
    } else {
    }
    return
  }
  func.func @transform_0(%arg0: i32, %arg1: i32) -> (i32, i32, i32) {
    %c0_i32 = arith.constant 0 : i32
    %c0_i32_0 = arith.constant 0 : i32
    %c0_i32_1 = arith.constant 0 : i32
    return %c0_i32, %arg0, %c0_i32_0 : i32, i32, i32
  }
  func.func @transform_1(%arg0: i32, %arg1: i32) -> (i32, i32, i32) {
    %c0_i32 = arith.constant 0 : i32
    %c0_i32_0 = arith.constant 0 : i32
    %c0_i32_1 = arith.constant 0 : i32
    return %arg1, %c0_i32, %c0_i32_0 : i32, i32, i32
  }
  func.func @transform_2(%arg0: i32, %arg1: i32) -> (i32, i32, i32) {
    %c0_i32 = arith.constant 0 : i32
    %c0_i32_0 = arith.constant 0 : i32
    %c0_i32_1 = arith.constant 0 : i32
    return %arg1, %c0_i32, %c0_i32_0 : i32, i32, i32
  }
  func.func @transform_3(%arg0: i32, %arg1: i32) -> (i32, i32, i32) {
    %c0_i32 = arith.constant 0 : i32
    %c0_i32_0 = arith.constant 0 : i32
    %c0_i32_1 = arith.constant 0 : i32
    return %arg1, %c0_i32, %c0_i32_0 : i32, i32, i32
  }
  func.func @transform_4(%arg0: i32, %arg1: i32) -> (i32, i32, i32) {
    %c0_i32 = arith.constant 0 : i32
    %c0_i32_0 = arith.constant 0 : i32
    %c0_i32_1 = arith.constant 0 : i32
    return %arg1, %c0_i32, %c0_i32_0 : i32, i32, i32
  }
  func.func @transform_5(%arg0: i32, %arg1: i32) -> (i32, i32) {
    %c0_i32 = arith.constant 0 : i32
    %c0_i32_0 = arith.constant 0 : i32
    %c0_i32_1 = arith.constant 0 : i32
    return %c0_i32, %c0_i32_0 : i32, i32
  }
  func.func @transform_6(%arg0: i32, %arg1: i32) -> (i32, i32) {
    %c0_i32 = arith.constant 0 : i32
    %c0_i32_0 = arith.constant 0 : i32
    %c0_i32_1 = arith.constant 0 : i32
    return %c0_i32, %c0_i32_0 : i32, i32
  }
  func.func @transform_7(%arg0: i32, %arg1: i32) -> (i32, i32) {
    %c0_i32 = arith.constant 0 : i32
    %c0_i32_0 = arith.constant 0 : i32
    return %arg0, %c0_i32 : i32, i32
  }
}

</mosaic_0001>

<bundles_post_ra>
// kernel: gru_model_forward.1
= control target key start
LH: loop header
LB: loop body
LE: loop exit
PB: predicated region body
PF: predicated region fallthrough
CT: control target
= control target key end

     0   :  { %s3512_s0 = inlined_call_operand.vmem [shape: f32[8,8,128], index: 0, kind: input, shape index: {}]   ;;  %s3513_s1 = inlined_call_operand.hbm [shape: f32[2,128,384], index: 1, kind: input, shape index: {}]   ;;  %s3514_s2 = inlined_call_operand.hbm [shape: f32[2,128,384], index: 2, kind: input, shape index: {}]   ;;  %s3515_s3 = inlined_call_operand.vmem [shape: f32[2,1,384], index: 3, kind: input, shape index: {}]   ;;  %s3516_s4 = inlined_call_operand.vmem [shape: f32[2,1,128], index: 4, kind: input, shape index: {}]   ;;  %s3517_s5 = inlined_call_operand.hbm [shape: f32[128,128], index: 5, kind: input, shape index: {}]   ;;  %s3518_s6 = inlined_call_operand.vmem [shape: f32[1,128], index: 6, kind: input, shape index: {}]   ;;  %s3519_s7 = inlined_call_operand.vmem [shape: f32[8,128], index: 7, kind: output, shape index: {}]  }
   0x1   :  { %3584 = sst [smem:[#allocation67_spill]] %s3517_s5 }
   0x2   :  { %3585 = sst [smem:[#allocation68_spill]] %s3519_s7 }
   0x3   :  { %12 = vsyncpa [#allocation5], 0 }
   0x4   :  { %14 = vsyncpa [#allocation5 + $0x1], 0 }
   0x5   :  { %15 = vsyncpa [#allocation7], 0 }
   0x6   :  { %17 = vsyncpa [#allocation7 + $0x1], 0  ;;  %s2415_s24 = smov 0   ;;  %s2417_s25 = smov 0  }
   0x7   :  { %s2419_s26 = smov 0   ;;  %s2421_s27 = smov 0  }
   0x8   :  { %s2423_s28 = smov 0   ;;  %s2425_s29 = smov 0  }
   0x9 LB: > { %3586 = sst [smem:[#allocation12_spill]] %s2355_s26  ;;  %s3520_s30 = sadd.s32 4294967295, %s2367_s29   ;;  %s2367_s29 = sphi %s2425_s29, %s23_s29   ;;  %s2363_s28 = sphi %s2423_s28, %s3733_s28   ;;  %s2359_s27 = sphi %s2421_s27, %s3732_s27   ;;  %s2355_s26 = sphi %s2419_s26, %s3731_s26   ;;  %s2351_s25 = sphi %s2417_s25, %s3735_s25   ;;  %s2347_s24 = sphi %s2415_s24, %s3734_s24  }
   0xa   : > { %3587 = sst [smem:[#allocation13_spill]] %s2363_s28  ;;  %p81_p0 = scmp.ne.s32.totalorder %s2351_s25, %s2347_s24 }
   0xb   : > { %p2447_p1 = scmp.eq.s32.totalorder %s3520_s30, 0  ;;  %p1958_p2 = scmp.ge.s32.totalorder %s2367_s29, 1 }
   0xc   : > { %p238_p3 = scmp.lt.s32.totalorder %s2367_s29, 3  ;;  %s3590_s5 = sld [smem:[#allocation67_spill]] }
   0xd   : > { %p2455_p4 = por %p2447_p1, %p81_p0  ;;  %s2369_s14 = smov [#allocation8]  }
   0xe   : > { %p2462_p5 = pnand %p1958_p2, %p238_p3  ;;  %s258_s15 = sshll.u32 %s2369_s14, 4  ;;  %s259_s15 = int_to_ptr.vmem [resolvable:$true] %s258_s15 }
   0xf   : > { %s2370_s16 = smov 128   ;;  %s2371_s17 = smov 8  }
  0x10   : > { %p2066_p6 = pneg %p2462_p5  ;;  %s32_s18 = sadd.s32 1, %s2363_s28 }
  0x11   : > { %p33_p8 = scmp.ge.s32.totalorder %s32_s18, 2  ;;  %s68_s19 = sadd.s32 1, %s2355_s26 }
  0x12   : > { %s256_s12 = sshll.u32 %s3590_s5, 4  ;;  %p2067_p7 = pnand %p2066_p6, %p2447_p1  ;;  %s257_s12 = int_to_ptr.hbm [resolvable:$true] %s256_s12 }
  0x13   : > { %p75_p9 = scmp.ne.s32.totalorder %s2355_s26, %s2351_s25  ;;  %p76_p10 = scmp.eq.s32.totalorder %s2367_s29, 0 }
  0x14   : > { %2069 = dma.hbm_to_vmem [thread:$0]  (!%p2067_p7), %s257_s12, 2048, %s259_s15, [#allocation7], %s2370_s16, %s2370_s16, %s2371_s17  }
  0x15   : > { %s3737_s18 = smov (%p33_p8, %s32_s18), 0  ;;  %p77_p11 = por %p76_p10, %p75_p9 }
  0x16   : > { %3592 = sst [smem:[#allocation14_spill]] %s3737_s18  ;;  %p2078_p12 = scmp.lt.s32.totalorder %s2367_s29, 2 }
  0x17   : > { %s65_s20 = ssub.s32 %s2363_s28, %s3737_s18  ;;  %s275_s21 = sand.u32 1, %s2355_s26  }
  0x18   : > { %p66_p13 = scmp.eq.s32.totalorder %s65_s20, 0  ;;  %s2052_s22 = smul.u32 384, %s275_s21 }
  0x19   : > { %p2481_p0 = pnand %p2078_p12, %p77_p11  ;;  %s2053_s10 = smul.u32 384, %s2363_s28 }
  0x1a   : > { %s2486_s24 = scalar_select %p66_p13, %s2355_s26, %s68_s19  }
  0x1b   : > { %s279_s11 = scalar_lea.vmem [#allocation4], %s2052_s22  ;;  %s284_s16 = scalar_lea.hbm %s3513_s1, %s2053_s10 }
  0x1c   : > { %3594 = sst [smem:[#allocation15_spill]] %s2486_s24  ;;  %s287_s12 = sshll.u32 %s279_s11, 4  ;;  %s288_s12 = int_to_ptr.vmem [resolvable:$true] %s287_s12 }
  0x1d   : > { %s285_s17 = sshll.u32 %s284_s16, 4  ;;  %s276_s20 = scalar_lea.sflag [#allocation5], %s275_s21  ;;  %s286_s17 = int_to_ptr.hbm [resolvable:$true] %s285_s17 }
  0x1e   : > { %s2372_s30 = smov 384   ;;  %s2373_s5 = smov 24  }
  0x1f   : > { %2073 = dma.hbm_to_vmem [thread:$0]  (!%p2481_p0), %s286_s17, 6144, %s288_s12, %s276_s20, %s2372_s30, %s2372_s30, %s2373_s5  }
  0x20   : > { %s297_s18 = sand.u32 1, %s2367_s29   ;;  %s306_s28 = scalar_lea.hbm %s3514_s2, %s2053_s10 }
  0x21   : > { %s307_s24 = sshll.u32 %s306_s28, 4  ;;  %s301_s11 = scalar_lea.vmem [#allocation6], %s2052_s22  ;;  %s308_s24 = int_to_ptr.hbm [resolvable:$true] %s307_s24 }
  0x22   : > { %s309_s26 = sshll.u32 %s301_s11, 4  ;;  %s298_s14 = scalar_lea.sflag [#allocation7], %s297_s18  ;;  %s310_s26 = int_to_ptr.vmem [resolvable:$true] %s309_s26 }
  0x23   : > { %2076 = dma.hbm_to_vmem [thread:$0]  (!%p2481_p0), %s308_s24, 6144, %s310_s26, %s298_s14, %s2372_s30, %s2372_s30, %s2373_s5  }
  0x24   : > { %334 = sbr.rel (%p2462_p5) target bundleno = 2434 (0x982), region = 48 }
  0x29   : > { %s336_s21 = sand.u32 1, %s2351_s25  }
  0x2a   : > { %s2056_s12 = smul.u32 384, %s336_s21  ;;  %s337_s15 = scalar_lea.sflag [#allocation5], %s336_s21 }
  0x2c   : > { %s2503_s16 = scalar_lea.vmem [#allocation4], %s2056_s12 }
  0x2d   : > { %2334 = dma.done.wait (%p2455_p4), %s337_s15, 6144  }
  0x2e   : > { %2336 = vsyncadd (%p2455_p4), %s337_s15, 4294961152  ;;  %s3595_s7 = sadd.s32 4294967295, %s2367_s29   ;;  %s2511_s26 = scalar_lea.vmem [#allocation6], %s2056_s12 }
  0x2f   : > { %s346_s28 = sand.u32 1, %s3595_s7  }
  0x30   : > { %s347_s5 = scalar_lea.sflag [#allocation7], %s346_s28 }
  0x31   : > { %2338 = dma.done.wait (%p2455_p4), %s347_s5, 6144  }
  0x32   : > { %2340 = vsyncadd (%p2455_p4), %s347_s5, 4294961152 }
  0x33   : > { %2342 = dma.done.wait (%p2447_p1), [#allocation7], 2048  }
  0x34   : > { %2344 = vsyncadd (%p2447_p1), [#allocation7], 4294965248  ;;  %v2522_v0 = vld [vmem:[%s2503_s16] sm:$0xff]  ;;  %v2525_v1 = vld [vmem:[%s2503_s16 + $0x8] sm:$0xff]  ;;  %p406_p1 = scmp.lt.s32.totalorder %s2359_s27, 1  ;;  %p1966_p2 = scmp.ne.s32.totalorder %s2359_s27, 0 }
  0x35   : > { %3596 = vst [vmem:[#allocation16_spill] sm:$0xff] %v2522_v0  ;;  %v2528_v2 = vld [vmem:[%s2503_s16 + $0x10] sm:$0xff]  ;;  %v2531_v3 = vld [vmem:[%s2503_s16 + $0x18] sm:$0xff]  ;;  %v2534_v4 = vld [vmem:[%s2503_s16 + $0x20] sm:$0xff] }
  0x36   : > { %v2537_v5 = vld [vmem:[%s2503_s16 + $0x28] sm:$0xff]  ;;  %v2540_v6 = vld [vmem:[%s2503_s16 + $0x30] sm:$0xff]  ;;  %v2543_v7 = vld [vmem:[%s2503_s16 + $0x38] sm:$0xff]  ;;  %s2712_s30 = scalar_select %p406_p1, %s2359_s27, 1 }
  0x37   : > { %v2546_v8 = vld [vmem:[%s2503_s16 + $0x40] sm:$0xff]  ;;  %v2549_v9 = vld [vmem:[%s2503_s16 + $0x48] sm:$0xff]  ;;  %v2552_v10 = vld [vmem:[%s2503_s16 + $0x50] sm:$0xff] }
  0x38   : > { %v2555_v11 = vld [vmem:[%s2503_s16 + $0x58] sm:$0xff]  ;;  %v2558_v12 = vld [vmem:[%s2503_s16 + $0x60] sm:$0xff]  ;;  %v2561_v13 = vld [vmem:[%s2503_s16 + $0x68] sm:$0xff]  ;;  %s2057_s8 = smul.u32 3, %s2712_s30  ;;  %s412_s24 = scalar_lea.vmem %s3516_s4, %s2712_s30 }
  0x39   : > { %v2564_v14 = vld [vmem:[%s2503_s16 + $0x70] sm:$0xff]  ;;  %v2567_v15 = vld [vmem:[%s2503_s16 + $0x78] sm:$0xff]  ;;  %v2570_v16 = vld [vmem:[%s2503_s16 + $0x80] sm:$0xff] }
  0x3a   : > { %v2573_v17 = vld [vmem:[%s2503_s16 + $0x88] sm:$0xff]  ;;  %v2576_v18 = vld [vmem:[%s2503_s16 + $0x90] sm:$0xff]  ;;  %v2579_v19 = vld [vmem:[%s2503_s16 + $0x98] sm:$0xff]  ;;  %s409_s18 = scalar_lea.vmem %s3515_s3, %s2057_s8 }
  0x3b   : > { %v2582_v20 = vld [vmem:[%s2503_s16 + $0xa0] sm:$0xff]  ;;  %v2585_v21 = vld [vmem:[%s2503_s16 + $0xa8] sm:$0xff]  ;;  %v2588_v22 = vld [vmem:[%s2503_s16 + $0xb0] sm:$0xff] }
  0x3c   : > { %v2591_v23 = vld [vmem:[%s2503_s16 + $0xb8] sm:$0xff]  ;;  %v2594_v24 = vld [vmem:[%s2503_s16 + $0xc0] sm:$0xff]  ;;  %v2597_v25 = vld [vmem:[%s2503_s16 + $0xc8] sm:$0xff] }
  0x3d   : > { %v2600_v26 = vld [vmem:[%s2503_s16 + $0xd0] sm:$0xff]  ;;  %v2603_v27 = vld [vmem:[%s2503_s16 + $0xd8] sm:$0xff]  ;;  %v2606_v28 = vld [vmem:[%s2503_s16 + $0xe0] sm:$0xff] }
  0x3e   : > { %v2609_v29 = vld [vmem:[%s2503_s16 + $0xe8] sm:$0xff]  ;;  %v2612_v30 = vld [vmem:[%s2503_s16 + $0xf0] sm:$0xff]  ;;  %v2615_v31 = vld [vmem:[%s2503_s16 + $0xf8] sm:$0xff] }
  0x3f   : > { %v2618_v32 = vld [vmem:[%s2503_s16 + $0x100] sm:$0xff]  ;;  %v2621_v33 = vld [vmem:[%s2503_s16 + $0x108] sm:$0xff]  ;;  %v2624_v34 = vld [vmem:[%s2503_s16 + $0x110] sm:$0xff] }
  0x40   : > { %v2627_v35 = vld [vmem:[%s2503_s16 + $0x118] sm:$0xff]  ;;  %v2630_v36 = vld [vmem:[%s2503_s16 + $0x120] sm:$0xff]  ;;  %v2633_v37 = vld [vmem:[%s2503_s16 + $0x128] sm:$0xff] }
  0x41   : > { %v2636_v38 = vld [vmem:[%s2503_s16 + $0x130] sm:$0xff]  ;;  %v2639_v39 = vld [vmem:[%s2503_s16 + $0x138] sm:$0xff]  ;;  %v2642_v40 = vld [vmem:[%s2503_s16 + $0x140] sm:$0xff] }
  0x42   : > { %v2645_v41 = vld [vmem:[%s2503_s16 + $0x148] sm:$0xff]  ;;  %v2648_v42 = vld [vmem:[%s2503_s16 + $0x150] sm:$0xff]  ;;  %v2651_v43 = vld [vmem:[%s2503_s16 + $0x158] sm:$0xff] }
  0x43   : > { %v2654_v44 = vld [vmem:[%s2503_s16 + $0x160] sm:$0xff]  ;;  %v2657_v45 = vld [vmem:[%s2503_s16 + $0x168] sm:$0xff]  ;;  %v2660_v46 = vld [vmem:[%s2503_s16 + $0x170] sm:$0xff] }
  0x44   : > { %v2663_v47 = vld [vmem:[%s2503_s16 + $0x178] sm:$0xff]  ;;  %v2666_v48 = vld [vmem:[%s2511_s26] sm:$0xff]  ;;  %v2669_v49 = vld [vmem:[%s2511_s26 + $0x8] sm:$0xff] }
  0x45   : > { %3597 = vst [vmem:[#allocation17_spill] sm:$0xff] %v2666_v48  ;;  %v2672_v50 = vld [vmem:[%s2511_s26 + $0x10] sm:$0xff]  ;;  %v2676_v51 = vld [vmem:[%s2511_s26 + $0x18] sm:$0xff]  ;;  %v2679_v52 = vld [vmem:[%s2511_s26 + $0x20] sm:$0xff] }
  0x46   : > { %3598 = vst [vmem:[#allocation18_spill] sm:$0xff] %v2669_v49  ;;  %v2682_v53 = vld [vmem:[%s2511_s26 + $0x28] sm:$0xff]  ;;  %v2685_v54 = vld [vmem:[%s2511_s26 + $0x30] sm:$0xff]  ;;  %v2688_v55 = vld [vmem:[%s2511_s26 + $0x38] sm:$0xff] }
  0x47   : > { %3599 = vst [vmem:[#allocation19_spill] sm:$0xff] %v2672_v50  ;;  %v2691_v56 = vld [vmem:[%s2511_s26 + $0x40] sm:$0xff]  ;;  %v2694_v57 = vld [vmem:[%s2511_s26 + $0x48] sm:$0xff]  ;;  %v2697_v58 = vld [vmem:[%s2511_s26 + $0x50] sm:$0xff] }
  0x48   : > { %3600 = vst [vmem:[#allocation20_spill] sm:$0xff] %v2676_v51  ;;  %v2700_v59 = vld [vmem:[%s2511_s26 + $0x58] sm:$0xff]  ;;  %v2703_v60 = vld [vmem:[%s2511_s26 + $0x60] sm:$0xff]  ;;  %v2706_v61 = vld [vmem:[%s2511_s26 + $0x68] sm:$0xff] }
  0x49   : > { %3601 = vst [vmem:[#allocation21_spill] sm:$0xff] %v2679_v52  ;;  %v2709_v62 = vld [vmem:[%s2511_s26 + $0x70] sm:$0xff]  ;;  %v2715_v63 = vld [vmem:[%s2511_s26 + $0x78] sm:$0xff]  ;;  %v2718_v50 = vld [vmem:[%s2511_s26 + $0x80] sm:$0xff] }
  0x4a   : > { %3602 = vst [vmem:[#allocation22_spill] sm:$0xff] %v2682_v53  ;;  %v2721_v49 = vld [vmem:[%s2511_s26 + $0x88] sm:$0xff]  ;;  %v2724_v48 = vld [vmem:[%s2511_s26 + $0x90] sm:$0xff]  ;;  %v2727_v53 = vld [vmem:[%s2511_s26 + $0x98] sm:$0xff] }
  0x4b   : > { %3603 = vst [vmem:[#allocation23_spill] sm:$0xff] %v2685_v54  ;;  %v2730_v52 = vld [vmem:[%s2511_s26 + $0xa0] sm:$0xff]  ;;  %v2733_v51 = vld [vmem:[%s2511_s26 + $0xa8] sm:$0xff] }
  0x4c   : > { %3604 = vst [vmem:[#allocation24_spill] sm:$0xff] %v2688_v55  ;;  %v2739_v55 = vld [vmem:[%s2511_s26 + $0xb8] sm:$0xff]  ;;  %v2742_v54 = vld [vmem:[%s2511_s26 + $0xc0] sm:$0xff] }
  0x4d   : > { %3605 = vst [vmem:[#allocation25_spill] sm:$0xff] %v2691_v56  ;;  %v2736_v56 = vld [vmem:[%s2511_s26 + $0xb0] sm:$0xff] }
  0x4e   : > { %3606 = vst [vmem:[#allocation26_spill] sm:$0xff] %v2694_v57  ;;  %v2752_v57 = vld [vmem:[%s2511_s26 + $0xd8] sm:$0xff] }
  0x4f   : > { %3607 = vst [vmem:[#allocation27_spill] sm:$0xff] %v2697_v58  ;;  %v2748_v58 = vld [vmem:[%s2511_s26 + $0xd0] sm:$0xff] }
  0x50   : > { %3608 = vst [vmem:[#allocation28_spill] sm:$0xff] %v2700_v59  ;;  %v2745_v59 = vld [vmem:[%s2511_s26 + $0xc8] sm:$0xff] }
  0x51   : > { %3609 = vst [vmem:[#allocation29_spill] sm:$0xff] %v2703_v60  ;;  %v2761_v60 = vld [vmem:[%s2511_s26 + $0xf0] sm:$0xff] }
  0x52   : > { %3610 = vst [vmem:[#allocation30_spill] sm:$0xff] %v2706_v61  ;;  %v2758_v61 = vld [vmem:[%s2511_s26 + $0xe8] sm:$0xff] }
  0x53   : > { %3611 = vst [vmem:[#allocation31_spill] sm:$0xff] %v2709_v62  ;;  %v2755_v62 = vld [vmem:[%s2511_s26 + $0xe0] sm:$0xff] }
  0x54   : > { %3612 = vst [vmem:[#allocation32_spill] sm:$0xff] %v2715_v63  ;;  %v2770_v63 = vld [vmem:[%s2511_s26 + $0x108] sm:$0xff] }
  0x55   : > { %3613 = vst [vmem:[#allocation33_spill] sm:$0xff] %v2718_v50  ;;  %v2767_v50 = vld [vmem:[%s2511_s26 + $0x100] sm:$0xff] }
  0x56   : > { %3614 = vst [vmem:[#allocation34_spill] sm:$0xff] %v2721_v49  ;;  %v2764_v49 = vld [vmem:[%s2511_s26 + $0xf8] sm:$0xff] }
  0x57   : > { %3615 = vst [vmem:[#allocation35_spill] sm:$0xff] %v2724_v48  ;;  %v2779_v48 = vld [vmem:[%s2511_s26 + $0x120] sm:$0xff] }
  0x58   : > { %3616 = vst [vmem:[#allocation36_spill] sm:$0xff] %v2727_v53  ;;  %v2776_v53 = vld [vmem:[%s2511_s26 + $0x118] sm:$0xff] }
  0x59   : > { %3617 = vst [vmem:[#allocation37_spill] sm:$0xff] %v2730_v52  ;;  %v2773_v52 = vld [vmem:[%s2511_s26 + $0x110] sm:$0xff] }
  0x5a   : > { %3618 = vst [vmem:[#allocation38_spill] sm:$0xff] %v2733_v51  ;;  %v2795_v51 = vld [vmem:[%s2511_s26 + $0x138] sm:$0xff] }
  0x5b   : > { %3619 = vst [vmem:[#allocation39_spill] sm:$0xff] %v2736_v56  ;;  %v2785_v56 = vld [vmem:[%s2511_s26 + $0x130] sm:$0xff] }
  0x5c   : > { %3620 = vst [vmem:[#allocation40_spill] sm:$0xff] %v2739_v55  ;;  %v2782_v55 = vld [vmem:[%s2511_s26 + $0x128] sm:$0xff] }
  0x5d   : > { %3621 = vst [vmem:[#allocation41_spill] sm:$0xff] %v2742_v54  ;;  %v2804_v54 = vld [vmem:[%s2511_s26 + $0x150] sm:$0xff] }
  0x5e   : > { %3622 = vst [vmem:[#allocation42_spill] sm:$0xff] %v2745_v59  ;;  %v2801_v59 = vld [vmem:[%s2511_s26 + $0x148] sm:$0xff] }
  0x5f   : > { %3623 = vst [vmem:[#allocation43_spill] sm:$0xff] %v2748_v58  ;;  %v2798_v58 = vld [vmem:[%s2511_s26 + $0x140] sm:$0xff] }
  0x60   : > { %3624 = vst [vmem:[#allocation44_spill] sm:$0xff] %v2752_v57  ;;  %v2813_v57 = vld [vmem:[%s2511_s26 + $0x168] sm:$0xff] }
  0x61   : > { %3625 = vst [vmem:[#allocation45_spill] sm:$0xff] %v2755_v62  ;;  %v2810_v62 = vld [vmem:[%s2511_s26 + $0x160] sm:$0xff] }
  0x62   : > { %3626 = vst [vmem:[#allocation46_spill] sm:$0xff] %v2758_v61  ;;  %v2807_v61 = vld [vmem:[%s2511_s26 + $0x158] sm:$0xff] }
  0x63   : > { %3627 = vst [vmem:[#allocation47_spill] sm:$0xff] %v2761_v60  ;;  %v2821_v60 = vld [vmem:[%s409_s18] sm:$0x7] }
  0x64   : > { %3628 = vst [vmem:[#allocation48_spill] sm:$0xff] %v2764_v49  ;;  %v2819_v49 = vld [vmem:[%s2511_s26 + $0x178] sm:$0xff] }
  0x65   : > { %3629 = vst [vmem:[#allocation49_spill] sm:$0xff] %v2767_v50  ;;  %v2816_v50 = vld [vmem:[%s2511_s26 + $0x170] sm:$0xff] }
  0x66   : > { %3630 = vst [vmem:[#allocation50_spill] sm:$0xff] %v2770_v63 }
  0x67   : > { %3631 = vst [vmem:[#allocation51_spill] sm:$0xff] %v2773_v52 }
  0x68   : > { %3632 = vst [vmem:[#allocation52_spill] sm:$0xff] %v2776_v53  ;;  %v2823_v53 = vld [vmem:[%s412_s24] sm:$0x1] }
  0x69   : > { %3633 = vst [vmem:[#allocation53_spill] sm:$0xff] %v2779_v48 }
  0x6a   : > { %3634 = vst [vmem:[#allocation54_spill] sm:$0xff] %v2782_v55 }
  0x6b   : > { %3635 = vst [vmem:[#allocation55_spill] sm:$0xff] %v2785_v56 }
  0x6c   : > { %3636 = vst [vmem:[#allocation56_spill] sm:$0xff] %v2795_v51 }
  0x6d   : > { %3637 = vst [vmem:[#allocation57_spill] sm:$0xff] %v2798_v58 }
  0x6e   : > { %3638 = vst [vmem:[#allocation58_spill] sm:$0xff] %v2801_v59 }
  0x6f   : > { %3639 = vst [vmem:[#allocation59_spill] sm:$0xff] %v2804_v54 }
  0x70   : > { %3640 = vst [vmem:[#allocation60_spill] sm:$0xff] %v2807_v61 }
  0x71   : > { %3641 = vst [vmem:[#allocation61_spill] sm:$0xff] %v2810_v62 }
  0x72   : > { %3642 = vst [vmem:[#allocation62_spill] sm:$0xff] %v2813_v57  ;;  %518 = sbr.rel (%p1966_p2) target bundleno = 341 (0x155), region = 64 }
  0x73   : > { %3643 = vst [vmem:[#allocation63_spill] sm:$0xff] %v2816_v50 }
  0x74   : > { %3644 = vst [vmem:[#allocation64_spill] sm:$0xff] %v2819_v49 }
  0x75   : > { %3645 = vst [vmem:[#allocation65_spill] sm:$0xff] %v2821_v60 }
  0x76   : > { %3646 = vst [vmem:[#allocation66_spill] sm:$0xff] %v2823_v53 }
  0x77   : > { %616 = vmatpush.msra.mxu2 %v2663_v47  ;;  %575 = vmatpush.msra.mxu1 %v2660_v46  ;;  %v519_v53 = vld [vmem:[%s3512_s0] sm:$0xff]  ;;  %v525_v52 = vld [vmem:[%s3512_s0 + $0x30] sm:$0xff]  ;;  %v520_v63 = vld [vmem:[%s3512_s0 + $0x8] sm:$0xff]  ;;  %v2931_v55 = vperm.slane %v2821_v60, 1  ;;  %v528_v48 = vperm.slane %v2821_v60, 0  ;;  %v2936_v51 = vperm.slane %v2821_v60, 2 }
  0x78   : > { %534 = vmatpush.msra.mxu0 %v2657_v45  ;;  %1988 = vmatpush.msra.mxu3 %v2657_v45  ;;  %v526_v56 = vld [vmem:[%s3512_s0 + $0x38] sm:$0xff] }
  0x79   : > { %617 = vmatpush.msra.mxu2 %v2654_v44  ;;  %576 = vmatpush.msra.mxu1 %v2651_v43 }
  0x7a   : > { %535 = vmatpush.msra.mxu0 %v2648_v42  ;;  %1989 = vmatpush.msra.mxu3 %v2648_v42 }
  0x7b   : > { %618 = vmatpush.msra.mxu2 %v2645_v41  ;;  %577 = vmatpush.msra.mxu1 %v2642_v40 }
  0x7c   : > { %536 = vmatpush.msra.mxu0 %v2639_v39  ;;  %1990 = vmatpush.msra.mxu3 %v2639_v39 }
  0x7d   : > { %619 = vmatpush.msra.mxu2 %v2636_v38  ;;  %578 = vmatpush.msra.mxu1 %v2633_v37 }
  0x7e   : > { %537 = vmatpush.msra.mxu0 %v2630_v36  ;;  %1991 = vmatpush.msra.mxu3 %v2630_v36 }
  0x7f   : > { %620 = vmatpush.msra.mxu2 %v2627_v35  ;;  %579 = vmatpush.msra.mxu1 %v2624_v34 }
  0x80   : > { %538 = vmatpush.msra.mxu0 %v2621_v33  ;;  %1992 = vmatpush.msra.mxu3 %v2621_v33 }
  0x81   : > { %621 = vmatpush.msra.mxu2 %v2618_v32  ;;  %580 = vmatpush.msra.mxu1 %v2615_v31 }
  0x82   : > { %539 = vmatpush.msra.mxu0 %v2612_v30  ;;  %1993 = vmatpush.msra.mxu3 %v2612_v30 }
  0x83   : > { %622 = vmatpush.msra.mxu2 %v2609_v29  ;;  %581 = vmatpush.msra.mxu1 %v2606_v28 }
  0x84   : > { %540 = vmatpush.msra.mxu0 %v2603_v27  ;;  %1994 = vmatpush.msra.mxu3 %v2603_v27 }
  0x85   : > { %623 = vmatpush.msra.mxu2 %v2600_v26  ;;  %582 = vmatpush.msra.mxu1 %v2597_v25 }
  0x86   : > { %541 = vmatpush.msra.mxu0 %v2594_v24  ;;  %1995 = vmatpush.msra.mxu3 %v2594_v24 }
  0x87   : > { %624 = vmatpush.msra.mxu2 %v2591_v23  ;;  %583 = vmatpush.msra.mxu1 %v2588_v22 }
  0x88   : > { %542 = vmatpush.msra.mxu0 %v2585_v21  ;;  %1996 = vmatpush.msra.mxu3 %v2585_v21 }
  0x89   : > { %625 = vmatpush.msra.mxu2 %v2582_v20  ;;  %584 = vmatpush.msra.mxu1 %v2579_v19 }
  0x8a   : > { %543 = vmatpush.msra.mxu0 %v2576_v18  ;;  %1997 = vmatpush.msra.mxu3 %v2576_v18 }
  0x8b   : > { %626 = vmatpush.msra.mxu2 %v2573_v17  ;;  %585 = vmatpush.msra.mxu1 %v2570_v16 }
  0x8c   : > { %544 = vmatpush.msra.mxu0 %v2567_v15  ;;  %1998 = vmatpush.msra.mxu3 %v2567_v15 }
  0x8d   : > { %627 = vmatpush.msra.mxu2 %v2564_v14  ;;  %586 = vmatpush.msra.mxu1 %v2561_v13 }
  0x8e   : > { %545 = vmatpush.msra.mxu0 %v2558_v12  ;;  %1999 = vmatpush.msra.mxu3 %v2558_v12 }
  0x8f   : > { %628 = vmatpush.msra.mxu2 %v2555_v11  ;;  %587 = vmatpush.msra.mxu1 %v2552_v10 }
  0x90   : > { %546 = vmatpush.msra.mxu0 %v2549_v9  ;;  %2000 = vmatpush.msra.mxu3 %v2549_v9 }
  0x91   : > { %629 = vmatpush.msra.mxu2 %v2546_v8  ;;  %588 = vmatpush.msra.mxu1 %v2543_v7 }
  0x92   : > { %547 = vmatpush.msra.mxu0 %v2540_v6  ;;  %2001 = vmatpush.msra.mxu3 %v2540_v6 }
  0x93   : > { %630 = vmatpush.msra.mxu2 %v2537_v5  ;;  %589 = vmatpush.msra.mxu1 %v2534_v4 }
  0x94   : > { %548 = vmatpush.msra.mxu0 %v2531_v3  ;;  %2002 = vmatpush.msra.mxu3 %v2531_v3 }
  0x95   : > { %631 = vmatpush.msra.mxu2 %v2528_v2  ;;  %590 = vmatpush.msra.mxu1 %v2525_v1 }
  0x96   : > { %632 = vmatmul.f32.vlgmr.msra.gmra.mxu2 %v519_v53  ;;  %591 = vmatmul.f32.vlgmr.msra.gmra.mxu1 %v519_v53 }
  0x97   : > { %549 = vmatpush.msra.mxu0 %v2522_v0  ;;  %2003 = vmatpush.msra.mxu3 %v2522_v0 }
  0x98   : > { %550 = vmatmul.f32.vlgmr.msra.gmra.mxu0 %v519_v53  ;;  %568 = vmatmul.f32.vlgmr.msra.gmra.mxu3 %v525_v52  ;;  %v521_v53 = vld [vmem:[%s3512_s0 + $0x10] sm:$0xff] }
  0x99   : > { %2004 = vmatpush.msrb.mxu3 %v2660_v46 }
  0x9b   : > { %2005 = vmatpush.msrb.mxu3 %v2651_v43 }
  0x9d   : > { %2006 = vmatpush.msrb.mxu3 %v2642_v40 }
  0x9e   : > { %635 = vmatmul.f32.gmra.mxu2 %v520_v63  ;;  %594 = vmatmul.f32.gmra.mxu1 %v520_v63 }
  0x9f   : > { %2007 = vmatpush.msrb.mxu3 %v2633_v37 }
  0xa0   : > { %553 = vmatmul.f32.gmra.mxu0 %v520_v63  ;;  %571 = vmatmul.f32.gmra.mxu3 %v526_v56  ;;  %v522_v63 = vld [vmem:[%s3512_s0 + $0x18] sm:$0xff] }
  0xa1   : > { %2008 = vmatpush.msrb.mxu3 %v2624_v34 }
  0xa3   : > { %2009 = vmatpush.msrb.mxu3 %v2615_v31 }
  0xa5   : > { %2010 = vmatpush.msrb.mxu3 %v2606_v28 }
  0xa6   : > { %638 = vmatmul.f32.gmra.mxu2 %v521_v53  ;;  %597 = vmatmul.f32.gmra.mxu1 %v521_v53 }
  0xa7   : > { %2011 = vmatpush.msrb.mxu3 %v2597_v25 }
  0xa8   : > { %556 = vmatmul.f32.gmra.mxu0 %v521_v53  ;;  %v523_v53 = vld [vmem:[%s3512_s0 + $0x20] sm:$0xff] }
  0xa9   : > { %2012 = vmatpush.msrb.mxu3 %v2588_v22 }
  0xab   : > { %2013 = vmatpush.msrb.mxu3 %v2579_v19 }
  0xad   : > { %2014 = vmatpush.msrb.mxu3 %v2570_v16 }
  0xae   : > { %641 = vmatmul.f32.gmra.mxu2 %v522_v63  ;;  %600 = vmatmul.f32.gmra.mxu1 %v522_v63 }
  0xaf   : > { %2015 = vmatpush.msrb.mxu3 %v2561_v13 }
  0xb0   : > { %559 = vmatmul.f32.gmra.mxu0 %v522_v63  ;;  %v524_v63 = vld [vmem:[%s3512_s0 + $0x28] sm:$0xff] }
  0xb1   : > { %2016 = vmatpush.msrb.mxu3 %v2552_v10 }
  0xb3   : > { %2017 = vmatpush.msrb.mxu3 %v2543_v7 }
  0xb5   : > { %2018 = vmatpush.msrb.mxu3 %v2534_v4 }
  0xb6   : > { %644 = vmatmul.f32.gmra.mxu2 %v523_v53  ;;  %603 = vmatmul.f32.gmra.mxu1 %v523_v53 }
  0xb7   : > { %2019 = vmatpush.msrb.mxu3 %v2525_v1 }
  0xb8   : > { %562 = vmatmul.f32.gmra.mxu0 %v523_v53  ;;  %612 = vmatmul.f32.vlgmr.msrb.gmra.mxu3 %v526_v56 }
  0xbe   : > { %647 = vmatmul.f32.gmra.mxu2 %v524_v63  ;;  %606 = vmatmul.f32.gmra.mxu1 %v524_v63 }
  0xc0   : > { %565 = vmatmul.f32.gmra.mxu0 %v524_v63 }
  0xc6   : > { %650 = vmatmul.f32.gmra.mxu2 %v525_v52  ;;  %609 = vmatmul.f32.gmra.mxu1 %v525_v52 }
  0xce   : > { %653 = vmatmul.f32.gmra.mxu2 %v526_v56 }
 0x113   : > { %v592_v59 = vpop.f32.mrf.mxu1 }
 0x114   : > { %v593_v58 = vadd.f32 %v592_v59, %v2931_v55 }
 0x115   : > { %v551_v53 = vpop.f32.mrf.mxu0 }
 0x116   : > { %658 = vst [vmem:[#allocation2] sm:$0xff] %v593_v58  ;;  %v552_v62 = vadd.f32 %v551_v53, %v528_v48 }
 0x118   : > { %657 = vst [vmem:[#allocation2 + $0xb0] sm:$0xff] %v552_v62 }
 0x119   : > { %v633_v61 = vpop.f32.mrf.mxu2 }
 0x11a   : > { %v634_v63 = vadd.f32 %v633_v61, %v2936_v51 }
 0x11b   : > { %v595_v52 = vpop.f32.mrf.mxu1  ;;  %v569_v54 = vpop.f32.mrf.mxu3 }
 0x11c   : > { %659 = vst [vmem:[#allocation2 + $0x10] sm:$0xff] %v634_v63  ;;  %v596_v56 = vadd.f32 %v595_v52, %v2931_v55  ;;  %v570_v50 = vadd.f32 %v569_v54, %v528_v48 }
 0x11d   : > { %v554_v49 = vpop.f32.mrf.mxu0 }
 0x11e   : > { %661 = vst [vmem:[#allocation2 + $0x60] sm:$0xff] %v596_v56  ;;  %v555_v57 = vadd.f32 %v554_v49, %v528_v48 }
 0x11f   : > { %675 = vst [vmem:[#allocation2 + $0x30] sm:$0xff] %v570_v50 }
 0x120   : > { %660 = vst [vmem:[#allocation2 + $0x48] sm:$0xff] %v555_v57 }
 0x121   : > { %v636_v59 = vpop.f32.mrf.mxu2 }
 0x122   : > { %v637_v60 = vadd.f32 %v636_v59, %v2936_v51 }
 0x123   : > { %v598_v58 = vpop.f32.mrf.mxu1  ;;  %v572_v61 = vpop.f32.mrf.mxu3 }
 0x124   : > { %662 = vst [vmem:[#allocation2 + $0x28] sm:$0xff] %v637_v60  ;;  %v599_v62 = vadd.f32 %v598_v58, %v2931_v55  ;;  %v573_v0 = vadd.f32 %v572_v61, %v528_v48 }
 0x125   : > { %v557_v53 = vpop.f32.mrf.mxu0 }
 0x126   : > { %664 = vst [vmem:[#allocation2 + $0x78] sm:$0xff] %v599_v62  ;;  %v558_v63 = vadd.f32 %v557_v53, %v528_v48 }
 0x127   : > { %678 = vst [vmem:[#allocation2 + $0xb8] sm:$0xff] %v573_v0 }
 0x128   : > { %663 = vst [vmem:[#allocation2 + $0x40] sm:$0xff] %v558_v63 }
 0x129   : > { %v639_v52 = vpop.f32.mrf.mxu2 }
 0x12a   : > { %v640_v54 = vadd.f32 %v639_v52, %v2936_v51 }
 0x12b   : > { %v601_v49 = vpop.f32.mrf.mxu1 }
 0x12c   : > { %665 = vst [vmem:[#allocation2 + $0x88] sm:$0xff] %v640_v54  ;;  %v602_v50 = vadd.f32 %v601_v49, %v2931_v55 }
 0x12d   : > { %v560_v57 = vpop.f32.mrf.mxu0 }
 0x12e   : > { %667 = vst [vmem:[#allocation2 + $0x18] sm:$0xff] %v602_v50  ;;  %v561_v56 = vadd.f32 %v560_v57, %v528_v48 }
 0x130   : > { %666 = vst [vmem:[#allocation2 + $0x90] sm:$0xff] %v561_v56 }
 0x131   : > { %v642_v60 = vpop.f32.mrf.mxu2 }
 0x132   : > { %v643_v59 = vadd.f32 %v642_v60, %v2936_v51 }
 0x133   : > { %v604_v58 = vpop.f32.mrf.mxu1 }
 0x134   : > { %668 = vst [vmem:[#allocation2 + $0x98] sm:$0xff] %v643_v59  ;;  %v605_v62 = vadd.f32 %v604_v58, %v2931_v55 }
 0x135   : > { %v563_v53 = vpop.f32.mrf.mxu0 }
 0x136   : > { %670 = vst [vmem:[#allocation2 + $0x50] sm:$0xff] %v605_v62  ;;  %v564_v0 = vadd.f32 %v563_v53, %v528_v48 }
 0x138   : > { %669 = vst [vmem:[#allocation2 + $0x38] sm:$0xff] %v564_v0 }
 0x139   : > { %v645_v61 = vpop.f32.mrf.mxu2 }
 0x13a   : > { %v646_v63 = vadd.f32 %v645_v61, %v2936_v51 }
 0x13b   : > { %v607_v52 = vpop.f32.mrf.mxu1  ;;  %v613_v54 = vpop.f32.mrf.mxu3 }
 0x13c   : > { %671 = vst [vmem:[#allocation2 + $0x70] sm:$0xff] %v646_v63  ;;  %v608_v49 = vadd.f32 %v607_v52, %v2931_v55  ;;  %v614_v50 = vadd.f32 %v613_v54, %v2931_v55 }
 0x13d   : > { %v566_v57 = vpop.f32.mrf.mxu0 }
 0x13e   : > { %673 = vst [vmem:[#allocation2 + $0xa8] sm:$0xff] %v608_v49  ;;  %v567_v56 = vadd.f32 %v566_v57, %v528_v48 }
 0x13f   : > { %679 = vst [vmem:[#allocation2 + $0x20] sm:$0xff] %v614_v50 }
 0x140   : > { %672 = vst [vmem:[#allocation2 + $0xa0] sm:$0xff] %v567_v56 }
 0x141   : > { %v648_v60 = vpop.f32.mrf.mxu2 }
 0x142   : > { %v649_v59 = vadd.f32 %v648_v60, %v2936_v51 }
 0x143   : > { %v610_v58 = vpop.f32.mrf.mxu1 }
 0x144   : > { %674 = vst [vmem:[#allocation2 + $0x68] sm:$0xff] %v649_v59  ;;  %v611_v62 = vadd.f32 %v610_v58, %v2931_v55 }
 0x146   : > { %676 = vst [vmem:[#allocation2 + $0x58] sm:$0xff] %v611_v62 }
 0x149   : > { %v651_v53 = vpop.f32.mrf.mxu2 }
 0x14a   : > { %v652_v0 = vadd.f32 %v651_v53, %v2936_v51 }
 0x14c   : > { %677 = vst [vmem:[#allocation2 + $0x80] sm:$0xff] %v652_v0 }
 0x151   : > { %v654_v61 = vpop.f32.mrf.mxu2 }
 0x152   : > { %v655_v63 = vadd.f32 %v654_v61, %v2936_v51 }
 0x154   : > { %680 = vst [vmem:[#allocation2 + $0x8] sm:$0xff] %v655_v63 }
 0x155 PF: > { %p1967_p3 = scmp.le.s32.totalorder %s2359_s27, 0 }
 0x157   : > { %684 = sbr.rel (%p1967_p3) target bundleno = 570 (0x23a), region = 68 }
 0x15c   : > { %782 = vmatpush.msra.mxu2 %v2663_v47  ;;  %741 = vmatpush.msra.mxu1 %v2660_v46 }
 0x15d   : > { %700 = vmatpush.msra.mxu0 %v2657_v45  ;;  %2020 = vmatpush.msra.mxu3 %v2657_v45 }
 0x15e   : > { %783 = vmatpush.msra.mxu2 %v2654_v44  ;;  %742 = vmatpush.msra.mxu1 %v2651_v43 }
 0x15f   : > { %701 = vmatpush.msra.mxu0 %v2648_v42  ;;  %2021 = vmatpush.msra.mxu3 %v2648_v42 }
 0x160   : > { %784 = vmatpush.msra.mxu2 %v2645_v41  ;;  %743 = vmatpush.msra.mxu1 %v2642_v40 }
 0x161   : > { %702 = vmatpush.msra.mxu0 %v2639_v39  ;;  %2022 = vmatpush.msra.mxu3 %v2639_v39 }
 0x162   : > { %785 = vmatpush.msra.mxu2 %v2636_v38  ;;  %744 = vmatpush.msra.mxu1 %v2633_v37 }
 0x163   : > { %703 = vmatpush.msra.mxu0 %v2630_v36  ;;  %2023 = vmatpush.msra.mxu3 %v2630_v36 }
 0x164   : > { %786 = vmatpush.msra.mxu2 %v2627_v35  ;;  %745 = vmatpush.msra.mxu1 %v2624_v34 }
 0x165   : > { %704 = vmatpush.msra.mxu0 %v2621_v33  ;;  %2024 = vmatpush.msra.mxu3 %v2621_v33 }
 0x166   : > { %787 = vmatpush.msra.mxu2 %v2618_v32  ;;  %746 = vmatpush.msra.mxu1 %v2615_v31 }
 0x167   : > { %705 = vmatpush.msra.mxu0 %v2612_v30  ;;  %2025 = vmatpush.msra.mxu3 %v2612_v30 }
 0x168   : > { %788 = vmatpush.msra.mxu2 %v2609_v29  ;;  %747 = vmatpush.msra.mxu1 %v2606_v28 }
 0x169   : > { %706 = vmatpush.msra.mxu0 %v2603_v27  ;;  %2026 = vmatpush.msra.mxu3 %v2603_v27 }
 0x16a   : > { %789 = vmatpush.msra.mxu2 %v2600_v26  ;;  %748 = vmatpush.msra.mxu1 %v2597_v25 }
 0x16b   : > { %707 = vmatpush.msra.mxu0 %v2594_v24  ;;  %2027 = vmatpush.msra.mxu3 %v2594_v24 }
 0x16c   : > { %790 = vmatpush.msra.mxu2 %v2591_v23  ;;  %749 = vmatpush.msra.mxu1 %v2588_v22 }
 0x16d   : > { %708 = vmatpush.msra.mxu0 %v2585_v21  ;;  %2028 = vmatpush.msra.mxu3 %v2585_v21 }
 0x16e   : > { %791 = vmatpush.msra.mxu2 %v2582_v20  ;;  %750 = vmatpush.msra.mxu1 %v2579_v19 }
 0x16f   : > { %709 = vmatpush.msra.mxu0 %v2576_v18  ;;  %2029 = vmatpush.msra.mxu3 %v2576_v18 }
 0x170   : > { %792 = vmatpush.msra.mxu2 %v2573_v17  ;;  %751 = vmatpush.msra.mxu1 %v2570_v16 }
 0x171   : > { %710 = vmatpush.msra.mxu0 %v2567_v15  ;;  %2030 = vmatpush.msra.mxu3 %v2567_v15 }
 0x172   : > { %793 = vmatpush.msra.mxu2 %v2564_v14  ;;  %752 = vmatpush.msra.mxu1 %v2561_v13  ;;  %v685_v14 = vld [vmem:[#allocation3 + $0x30] sm:$0xff] }
 0x173   : > { %711 = vmatpush.msra.mxu0 %v2558_v12  ;;  %2031 = vmatpush.msra.mxu3 %v2558_v12  ;;  %v690_v12 = vld [vmem:[#allocation3 + $0x38] sm:$0xff] }
 0x174   : > { %794 = vmatpush.msra.mxu2 %v2555_v11  ;;  %753 = vmatpush.msra.mxu1 %v2552_v10  ;;  %v689_v11 = vld [vmem:[#allocation3 + $0x10] sm:$0xff] }
 0x175   : > { %712 = vmatpush.msra.mxu0 %v2549_v9  ;;  %2032 = vmatpush.msra.mxu3 %v2549_v9  ;;  %v3647_v9 = vld [vmem:[#allocation16_spill] sm:$0xff] }
 0x176   : > { %795 = vmatpush.msra.mxu2 %v2546_v8  ;;  %754 = vmatpush.msra.mxu1 %v2543_v7  ;;  %v691_v8 = vld [vmem:[#allocation3 + $0x28] sm:$0xff] }
 0x177   : > { %713 = vmatpush.msra.mxu0 %v2540_v6  ;;  %2033 = vmatpush.msra.mxu3 %v2540_v6  ;;  %v688_v6 = vld [vmem:[#allocation3] sm:$0xff] }
 0x178   : > { %796 = vmatpush.msra.mxu2 %v2537_v5  ;;  %755 = vmatpush.msra.mxu1 %v2534_v4  ;;  %v686_v5 = vld [vmem:[#allocation3 + $0x8] sm:$0xff] }
 0x179   : > { %714 = vmatpush.msra.mxu0 %v2531_v3  ;;  %2034 = vmatpush.msra.mxu3 %v2531_v3  ;;  %v687_v3 = vld [vmem:[#allocation3 + $0x20] sm:$0xff] }
 0x17a   : > { %797 = vmatpush.msra.mxu2 %v2528_v2  ;;  %756 = vmatpush.msra.mxu1 %v2525_v1  ;;  %v692_v2 = vld [vmem:[#allocation3 + $0x18] sm:$0xff] }
 0x17b   : > { %798 = vmatmul.f32.vlgmr.msra.gmra.mxu2 %v685_v14  ;;  %757 = vmatmul.f32.vlgmr.msra.gmra.mxu1 %v685_v14 }
 0x17c   : > { %715 = vmatpush.msra.mxu0 %v3647_v9  ;;  %2035 = vmatpush.msra.mxu3 %v3647_v9 }
 0x17d   : > { %716 = vmatmul.f32.vlgmr.msra.gmra.mxu0 %v685_v14  ;;  %734 = vmatmul.f32.vlgmr.msra.gmra.mxu3 %v691_v8 }
 0x17e   : > { %2036 = vmatpush.msrb.mxu3 %v2660_v46 }
 0x180   : > { %2037 = vmatpush.msrb.mxu3 %v2651_v43 }
 0x182   : > { %2038 = vmatpush.msrb.mxu3 %v2642_v40 }
 0x183   : > { %801 = vmatmul.f32.gmra.mxu2 %v686_v5  ;;  %760 = vmatmul.f32.gmra.mxu1 %v686_v5 }
 0x184   : > { %2039 = vmatpush.msrb.mxu3 %v2633_v37 }
 0x185   : > { %719 = vmatmul.f32.gmra.mxu0 %v686_v5  ;;  %737 = vmatmul.f32.gmra.mxu3 %v692_v2 }
 0x186   : > { %2040 = vmatpush.msrb.mxu3 %v2624_v34 }
 0x188   : > { %2041 = vmatpush.msrb.mxu3 %v2615_v31 }
 0x18a   : > { %2042 = vmatpush.msrb.mxu3 %v2606_v28 }
 0x18b   : > { %804 = vmatmul.f32.gmra.mxu2 %v687_v3  ;;  %763 = vmatmul.f32.gmra.mxu1 %v687_v3 }
 0x18c   : > { %2043 = vmatpush.msrb.mxu3 %v2597_v25 }
 0x18d   : > { %722 = vmatmul.f32.gmra.mxu0 %v687_v3 }
 0x18e   : > { %2044 = vmatpush.msrb.mxu3 %v2588_v22 }
 0x190   : > { %2045 = vmatpush.msrb.mxu3 %v2579_v19 }
 0x192   : > { %2046 = vmatpush.msrb.mxu3 %v2570_v16 }
 0x193   : > { %807 = vmatmul.f32.gmra.mxu2 %v688_v6  ;;  %766 = vmatmul.f32.gmra.mxu1 %v688_v6 }
 0x194   : > { %2047 = vmatpush.msrb.mxu3 %v2561_v13  ;;  %v3648_v13 = vld [vmem:[#allocation65_spill] sm:$0xff] }
 0x195   : > { %725 = vmatmul.f32.gmra.mxu0 %v688_v6 }
 0x196   : > { %2048 = vmatpush.msrb.mxu3 %v2552_v10  ;;  %v3035_v10 = vperm.slane %v3648_v13, 1 }
 0x198   : > { %2049 = vmatpush.msrb.mxu3 %v2543_v7  ;;  %v694_v7 = vperm.slane %v3648_v13, 0 }
 0x19a   : > { %2050 = vmatpush.msrb.mxu3 %v2534_v4 }
 0x19b   : > { %810 = vmatmul.f32.gmra.mxu2 %v689_v11  ;;  %769 = vmatmul.f32.gmra.mxu1 %v689_v11 }
 0x19c   : > { %2051 = vmatpush.msrb.mxu3 %v2525_v1  ;;  %v3040_v1 = vperm.slane %v3648_v13, 2 }
 0x19d   : > { %728 = vmatmul.f32.gmra.mxu0 %v689_v11  ;;  %778 = vmatmul.f32.vlgmr.msrb.gmra.mxu3 %v692_v2 }
 0x1a3   : > { %813 = vmatmul.f32.gmra.mxu2 %v690_v12  ;;  %772 = vmatmul.f32.gmra.mxu1 %v690_v12 }
 0x1a5   : > { %731 = vmatmul.f32.gmra.mxu0 %v690_v12 }
 0x1ab   : > { %816 = vmatmul.f32.gmra.mxu2 %v691_v8  ;;  %775 = vmatmul.f32.gmra.mxu1 %v691_v8 }
 0x1b3   : > { %819 = vmatmul.f32.gmra.mxu2 %v692_v2 }
 0x1f8   : > { %v758_v15 = vpop.f32.mrf.mxu1 }
 0x1f9   : > { %v759_v4 = vadd.f32 %v758_v15, %v3035_v10 }
 0x1fa   : > { %v717_v16 = vpop.f32.mrf.mxu0 }
 0x1fb   : > { %824 = vst [vmem:[#allocation2] sm:$0xff] %v759_v4  ;;  %v718_v17 = vadd.f32 %v717_v16, %v694_v7 }
 0x1fd   : > { %823 = vst [vmem:[#allocation2 + $0xb0] sm:$0xff] %v718_v17 }
 0x1fe   : > { %v799_v18 = vpop.f32.mrf.mxu2 }
 0x1ff   : > { %v800_v19 = vadd.f32 %v799_v18, %v3040_v1 }
 0x200   : > { %v761_v20 = vpop.f32.mrf.mxu1  ;;  %v735_v22 = vpop.f32.mrf.mxu3 }
 0x201   : > { %825 = vst [vmem:[#allocation2 + $0x10] sm:$0xff] %v800_v19  ;;  %v762_v21 = vadd.f32 %v761_v20, %v3035_v10  ;;  %v736_v24 = vadd.f32 %v735_v22, %v694_v7 }
 0x202   : > { %v720_v23 = vpop.f32.mrf.mxu0 }
 0x203   : > { %827 = vst [vmem:[#allocation2 + $0x60] sm:$0xff] %v762_v21  ;;  %v721_v25 = vadd.f32 %v720_v23, %v694_v7 }
 0x204   : > { %841 = vst [vmem:[#allocation2 + $0x30] sm:$0xff] %v736_v24 }
 0x205   : > { %826 = vst [vmem:[#allocation2 + $0x48] sm:$0xff] %v721_v25 }
 0x206   : > { %v802_v26 = vpop.f32.mrf.mxu2 }
 0x207   : > { %v803_v27 = vadd.f32 %v802_v26, %v3040_v1 }
 0x208   : > { %v764_v28 = vpop.f32.mrf.mxu1  ;;  %v738_v31 = vpop.f32.mrf.mxu3 }
 0x209   : > { %828 = vst [vmem:[#allocation2 + $0x28] sm:$0xff] %v803_v27  ;;  %v765_v29 = vadd.f32 %v764_v28, %v3035_v10  ;;  %v739_v33 = vadd.f32 %v738_v31, %v694_v7 }
 0x20a   : > { %v723_v30 = vpop.f32.mrf.mxu0 }
 0x20b   : > { %830 = vst [vmem:[#allocation2 + $0x78] sm:$0xff] %v765_v29  ;;  %v724_v32 = vadd.f32 %v723_v30, %v694_v7 }
 0x20c   : > { %844 = vst [vmem:[#allocation2 + $0xb8] sm:$0xff] %v739_v33 }
 0x20d   : > { %829 = vst [vmem:[#allocation2 + $0x40] sm:$0xff] %v724_v32 }
 0x20e   : > { %v805_v34 = vpop.f32.mrf.mxu2 }
 0x20f   : > { %v806_v35 = vadd.f32 %v805_v34, %v3040_v1 }
 0x210   : > { %v767_v36 = vpop.f32.mrf.mxu1 }
 0x211   : > { %831 = vst [vmem:[#allocation2 + $0x88] sm:$0xff] %v806_v35  ;;  %v768_v37 = vadd.f32 %v767_v36, %v3035_v10 }
 0x212   : > { %v726_v38 = vpop.f32.mrf.mxu0 }
 0x213   : > { %833 = vst [vmem:[#allocation2 + $0x18] sm:$0xff] %v768_v37  ;;  %v727_v39 = vadd.f32 %v726_v38, %v694_v7 }
 0x215   : > { %832 = vst [vmem:[#allocation2 + $0x90] sm:$0xff] %v727_v39 }
 0x216   : > { %v808_v40 = vpop.f32.mrf.mxu2 }
 0x217   : > { %v809_v41 = vadd.f32 %v808_v40, %v3040_v1 }
 0x218   : > { %v770_v42 = vpop.f32.mrf.mxu1 }
 0x219   : > { %834 = vst [vmem:[#allocation2 + $0x98] sm:$0xff] %v809_v41  ;;  %v771_v43 = vadd.f32 %v770_v42, %v3035_v10 }
 0x21a   : > { %v729_v44 = vpop.f32.mrf.mxu0 }
 0x21b   : > { %836 = vst [vmem:[#allocation2 + $0x50] sm:$0xff] %v771_v43  ;;  %v730_v45 = vadd.f32 %v729_v44, %v694_v7 }
 0x21d   : > { %835 = vst [vmem:[#allocation2 + $0x38] sm:$0xff] %v730_v45 }
 0x21e   : > { %v811_v46 = vpop.f32.mrf.mxu2 }
 0x21f   : > { %v812_v47 = vadd.f32 %v811_v46, %v3040_v1 }
 0x220   : > { %v773_v48 = vpop.f32.mrf.mxu1  ;;  %v779_v51 = vpop.f32.mrf.mxu3 }
 0x221   : > { %837 = vst [vmem:[#allocation2 + $0x70] sm:$0xff] %v812_v47  ;;  %v774_v55 = vadd.f32 %v773_v48, %v3035_v10  ;;  %v780_v52 = vadd.f32 %v779_v51, %v3035_v10 }
 0x222   : > { %v732_v54 = vpop.f32.mrf.mxu0 }
 0x223   : > { %839 = vst [vmem:[#allocation2 + $0xa8] sm:$0xff] %v774_v55  ;;  %v733_v49 = vadd.f32 %v732_v54, %v694_v7 }
 0x224   : > { %845 = vst [vmem:[#allocation2 + $0x20] sm:$0xff] %v780_v52 }
 0x225   : > { %838 = vst [vmem:[#allocation2 + $0xa0] sm:$0xff] %v733_v49 }
 0x226   : > { %v814_v50 = vpop.f32.mrf.mxu2 }
 0x227   : > { %v815_v57 = vadd.f32 %v814_v50, %v3040_v1 }
 0x228   : > { %v776_v56 = vpop.f32.mrf.mxu1 }
 0x229   : > { %840 = vst [vmem:[#allocation2 + $0x68] sm:$0xff] %v815_v57  ;;  %v777_v60 = vadd.f32 %v776_v56, %v3035_v10 }
 0x22b   : > { %842 = vst [vmem:[#allocation2 + $0x58] sm:$0xff] %v777_v60 }
 0x22e   : > { %v817_v59 = vpop.f32.mrf.mxu2 }
 0x22f   : > { %v818_v58 = vadd.f32 %v817_v59, %v3040_v1 }
 0x231   : > { %843 = vst [vmem:[#allocation2 + $0x80] sm:$0xff] %v818_v58 }
 0x236   : > { %v820_v62 = vpop.f32.mrf.mxu2 }
 0x237   : > { %v821_v53 = vadd.f32 %v820_v62, %v3040_v1 }
 0x239   : > { %846 = vst [vmem:[#allocation2 + $0x8] sm:$0xff] %v821_v53 }
 0x23a PF: > { %v3649_v0 = vld [vmem:[#allocation62_spill] sm:$0xff]  ;;  %v3650_v61 = vld [vmem:[#allocation63_spill] sm:$0xff]  ;;  %v3651_v63 = vld [vmem:[#allocation64_spill] sm:$0xff]  ;;  %v2374_v45 = vmov 0.0   ;;  %p1984_p4 = scmp.ne.s32.totalorder %s2359_s27, 1 }
 0x23b   : > { %850 = vmatpush.msra.mxu0 %v3649_v0  ;;  %870 = vmatpush.msra.mxu1 %v3650_v61  ;;  %v3652_v14 = vld [vmem:[#allocation59_spill] sm:$0xff]  ;;  %v3653_v8 = vld [vmem:[#allocation60_spill] sm:$0xff]  ;;  %v3654_v9 = vld [vmem:[#allocation61_spill] sm:$0xff]  ;;  %s3729_s22 = sld [smem:[#allocation68_spill]] (!%p1984_p4) }
 0x23c   : > { %890 = vmatpush.msra.mxu2 %v3651_v63  ;;  %965 = vmatpush.msra.mxu3 %v3649_v0  ;;  %v3655_v5 = vld [vmem:[#allocation56_spill] sm:$0xff]  ;;  %v3656_v2 = vld [vmem:[#allocation57_spill] sm:$0xff]  ;;  %v3657_v3 = vld [vmem:[#allocation58_spill] sm:$0xff] }
 0x23d   : > { %851 = vmatpush.msra.mxu0 %v3652_v14  ;;  %871 = vmatpush.msra.mxu1 %v3653_v8  ;;  %v3658_v6 = vld [vmem:[#allocation53_spill] sm:$0xff]  ;;  %v3659_v11 = vld [vmem:[#allocation54_spill] sm:$0xff]  ;;  %v3660_v12 = vld [vmem:[#allocation55_spill] sm:$0xff] }
 0x23e   : > { %891 = vmatpush.msra.mxu2 %v3654_v9  ;;  %966 = vmatpush.msra.mxu3 %v3652_v14  ;;  %v3661_v13 = vld [vmem:[#allocation50_spill] sm:$0xff]  ;;  %v3662_v10 = vld [vmem:[#allocation51_spill] sm:$0xff]  ;;  %v3663_v7 = vld [vmem:[#allocation52_spill] sm:$0xff] }
 0x23f   : > { %852 = vmatpush.msra.mxu0 %v3655_v5  ;;  %872 = vmatpush.msra.mxu1 %v3656_v2  ;;  %v3664_v15 = vld [vmem:[#allocation47_spill] sm:$0xff]  ;;  %v3665_v4 = vld [vmem:[#allocation48_spill] sm:$0xff]  ;;  %v3666_v16 = vld [vmem:[#allocation49_spill] sm:$0xff] }
 0x240   : > { %892 = vmatpush.msra.mxu2 %v3657_v3  ;;  %967 = vmatpush.msra.mxu3 %v3655_v5  ;;  %v3667_v1 = vld [vmem:[#allocation44_spill] sm:$0xff]  ;;  %v3668_v17 = vld [vmem:[#allocation45_spill] sm:$0xff]  ;;  %v3669_v18 = vld [vmem:[#allocation46_spill] sm:$0xff] }
 0x241   : > { %853 = vmatpush.msra.mxu0 %v3658_v6  ;;  %873 = vmatpush.msra.mxu1 %v3659_v11  ;;  %v3670_v19 = vld [vmem:[#allocation41_spill] sm:$0xff]  ;;  %v3671_v20 = vld [vmem:[#allocation42_spill] sm:$0xff]  ;;  %v3672_v21 = vld [vmem:[#allocation43_spill] sm:$0xff] }
 0x242   : > { %893 = vmatpush.msra.mxu2 %v3660_v12  ;;  %968 = vmatpush.msra.mxu3 %v3658_v6  ;;  %v3673_v22 = vld [vmem:[#allocation38_spill] sm:$0xff]  ;;  %v3674_v23 = vld [vmem:[#allocation39_spill] sm:$0xff]  ;;  %v3675_v24 = vld [vmem:[#allocation40_spill] sm:$0xff] }
 0x243   : > { %854 = vmatpush.msra.mxu0 %v3661_v13  ;;  %874 = vmatpush.msra.mxu1 %v3662_v10  ;;  %v3676_v25 = vld [vmem:[#allocation35_spill] sm:$0xff]  ;;  %v3677_v26 = vld [vmem:[#allocation36_spill] sm:$0xff]  ;;  %v3678_v27 = vld [vmem:[#allocation37_spill] sm:$0xff] }
 0x244   : > { %894 = vmatpush.msra.mxu2 %v3663_v7  ;;  %969 = vmatpush.msra.mxu3 %v3661_v13  ;;  %v3679_v28 = vld [vmem:[#allocation32_spill] sm:$0xff]  ;;  %v3680_v29 = vld [vmem:[#allocation33_spill] sm:$0xff]  ;;  %v3681_v30 = vld [vmem:[#allocation34_spill] sm:$0xff] }
 0x245   : > { %855 = vmatpush.msra.mxu0 %v3664_v15  ;;  %875 = vmatpush.msra.mxu1 %v3665_v4  ;;  %v3682_v31 = vld [vmem:[#allocation29_spill] sm:$0xff]  ;;  %v3683_v32 = vld [vmem:[#allocation30_spill] sm:$0xff]  ;;  %v3684_v33 = vld [vmem:[#allocation31_spill] sm:$0xff] }
 0x246   : > { %895 = vmatpush.msra.mxu2 %v3666_v16  ;;  %970 = vmatpush.msra.mxu3 %v3664_v15  ;;  %v3685_v34 = vld [vmem:[#allocation26_spill] sm:$0xff]  ;;  %v3686_v35 = vld [vmem:[#allocation27_spill] sm:$0xff]  ;;  %v3687_v36 = vld [vmem:[#allocation28_spill] sm:$0xff] }
 0x247   : > { %856 = vmatpush.msra.mxu0 %v3667_v1  ;;  %876 = vmatpush.msra.mxu1 %v3668_v17  ;;  %v3688_v37 = vld [vmem:[#allocation23_spill] sm:$0xff]  ;;  %v3689_v38 = vld [vmem:[#allocation24_spill] sm:$0xff]  ;;  %v3690_v39 = vld [vmem:[#allocation25_spill] sm:$0xff] }
 0x248   : > { %896 = vmatpush.msra.mxu2 %v3669_v18  ;;  %971 = vmatpush.msra.mxu3 %v3667_v1  ;;  %v3691_v40 = vld [vmem:[#allocation20_spill] sm:$0xff]  ;;  %v3692_v41 = vld [vmem:[#allocation21_spill] sm:$0xff]  ;;  %v3693_v42 = vld [vmem:[#allocation22_spill] sm:$0xff] }
 0x249   : > { %857 = vmatpush.msra.mxu0 %v3670_v19  ;;  %877 = vmatpush.msra.mxu1 %v3671_v20  ;;  %v3694_v43 = vld [vmem:[#allocation17_spill] sm:$0xff]  ;;  %v3695_v44 = vld [vmem:[#allocation18_spill] sm:$0xff]  ;;  %v3696_v46 = vld [vmem:[#allocation19_spill] sm:$0xff] }
 0x24a   : > { %897 = vmatpush.msra.mxu2 %v3672_v21  ;;  %972 = vmatpush.msra.mxu3 %v3670_v19  ;;  %v847_v47 = vld [vmem:[#allocation2 + $0xb0] sm:$0xff]  ;;  %v848_v48 = vld [vmem:[#allocation2] sm:$0xff] }
 0x24b   : > { %858 = vmatpush.msra.mxu0 %v3673_v22  ;;  %878 = vmatpush.msra.mxu1 %v3674_v23 }
 0x24c   : > { %898 = vmatpush.msra.mxu2 %v3675_v24  ;;  %973 = vmatpush.msra.mxu3 %v3673_v22 }
 0x24d   : > { %859 = vmatpush.msra.mxu0 %v3676_v25  ;;  %879 = vmatpush.msra.mxu1 %v3677_v26 }
 0x24e   : > { %899 = vmatpush.msra.mxu2 %v3678_v27  ;;  %974 = vmatpush.msra.mxu3 %v3676_v25 }
 0x24f   : > { %860 = vmatpush.msra.mxu0 %v3679_v28  ;;  %880 = vmatpush.msra.mxu1 %v3680_v29 }
 0x250   : > { %900 = vmatpush.msra.mxu2 %v3681_v30  ;;  %975 = vmatpush.msra.mxu3 %v3679_v28 }
 0x251   : > { %861 = vmatpush.msra.mxu0 %v3682_v31  ;;  %881 = vmatpush.msra.mxu1 %v3683_v32 }
 0x252   : > { %901 = vmatpush.msra.mxu2 %v3684_v33  ;;  %976 = vmatpush.msra.mxu3 %v3682_v31 }
 0x253   : > { %862 = vmatpush.msra.mxu0 %v3685_v34  ;;  %882 = vmatpush.msra.mxu1 %v3686_v35 }
 0x254   : > { %902 = vmatpush.msra.mxu2 %v3687_v36  ;;  %977 = vmatpush.msra.mxu3 %v3685_v34 }
 0x255   : > { %863 = vmatpush.msra.mxu0 %v3688_v37  ;;  %883 = vmatpush.msra.mxu1 %v3689_v38 }
 0x256   : > { %903 = vmatpush.msra.mxu2 %v3690_v39  ;;  %978 = vmatpush.msra.mxu3 %v3688_v37 }
 0x257   : > { %864 = vmatpush.msra.mxu0 %v3691_v40  ;;  %884 = vmatpush.msra.mxu1 %v3692_v41 }
 0x258   : > { %904 = vmatpush.msra.mxu2 %v3693_v42  ;;  %979 = vmatpush.msra.mxu3 %v3691_v40 }
 0x259   : > { %865 = vmatpush.msra.mxu0 %v3694_v43  ;;  %885 = vmatpush.msra.mxu1 %v3695_v44 }
 0x25a   : > { %866 = vmatmul.f32.vlgmr.msra.gmra.mxu0 %v2374_v45  ;;  %886 = vmatmul.f32.vlgmr.msra.gmra.mxu1 %v2374_v45 }
 0x25b   : > { %905 = vmatpush.msra.mxu2 %v3696_v46  ;;  %985 = vmatpush.msrb.mxu0 %v3650_v61 }
 0x25c   : > { %906 = vmatmul.f32.vlgmr.msra.gmra.mxu2 %v2374_v45  ;;  %1005 = vmatpush.msrb.mxu1 %v3651_v63 }
 0x25d   : > { %986 = vmatpush.msrb.mxu0 %v3653_v8  ;;  %980 = vmatpush.msra.mxu3 %v3694_v43 }
 0x25e   : > { %1006 = vmatpush.msrb.mxu1 %v3654_v9  ;;  %1078 = vmatpush.msrb.mxu2 %v3649_v0 }
 0x25f   : > { %987 = vmatpush.msrb.mxu0 %v3656_v2  ;;  %1098 = vmatpush.msrb.mxu3 %v3650_v61 }
 0x260   : > { %1007 = vmatpush.msrb.mxu1 %v3657_v3  ;;  %1079 = vmatpush.msrb.mxu2 %v3652_v14 }
 0x261   : > { %988 = vmatpush.msrb.mxu0 %v3659_v11  ;;  %1099 = vmatpush.msrb.mxu3 %v3653_v8 }
 0x262   : > { %1008 = vmatpush.msrb.mxu1 %v3660_v12  ;;  %1080 = vmatpush.msrb.mxu2 %v3655_v5 }
 0x263   : > { %989 = vmatpush.msrb.mxu0 %v3662_v10  ;;  %1100 = vmatpush.msrb.mxu3 %v3656_v2 }
 0x264   : > { %1009 = vmatpush.msrb.mxu1 %v3663_v7  ;;  %1081 = vmatpush.msrb.mxu2 %v3658_v6 }
 0x265   : > { %990 = vmatpush.msrb.mxu0 %v3665_v4  ;;  %1101 = vmatpush.msrb.mxu3 %v3659_v11 }
 0x266   : > { %1010 = vmatpush.msrb.mxu1 %v3666_v16  ;;  %1082 = vmatpush.msrb.mxu2 %v3661_v13 }
 0x267   : > { %991 = vmatpush.msrb.mxu0 %v3668_v17  ;;  %1102 = vmatpush.msrb.mxu3 %v3662_v10 }
 0x268   : > { %1011 = vmatpush.msrb.mxu1 %v3669_v18  ;;  %1083 = vmatpush.msrb.mxu2 %v3664_v15 }
 0x269   : > { %992 = vmatpush.msrb.mxu0 %v3671_v20  ;;  %1103 = vmatpush.msrb.mxu3 %v3665_v4 }
 0x26a   : > { %1012 = vmatpush.msrb.mxu1 %v3672_v21  ;;  %1084 = vmatpush.msrb.mxu2 %v3667_v1 }
 0x26b   : > { %993 = vmatpush.msrb.mxu0 %v3674_v23  ;;  %1104 = vmatpush.msrb.mxu3 %v3668_v17 }
 0x26c   : > { %1013 = vmatpush.msrb.mxu1 %v3675_v24  ;;  %1085 = vmatpush.msrb.mxu2 %v3670_v19 }
 0x26d   : > { %994 = vmatpush.msrb.mxu0 %v3677_v26  ;;  %1105 = vmatpush.msrb.mxu3 %v3671_v20 }
 0x26e   : > { %1014 = vmatpush.msrb.mxu1 %v3678_v27  ;;  %1086 = vmatpush.msrb.mxu2 %v3673_v22 }
 0x26f   : > { %995 = vmatpush.msrb.mxu0 %v3680_v29  ;;  %1106 = vmatpush.msrb.mxu3 %v3674_v23 }
 0x270   : > { %1015 = vmatpush.msrb.mxu1 %v3681_v30  ;;  %1087 = vmatpush.msrb.mxu2 %v3676_v25 }
 0x271   : > { %996 = vmatpush.msrb.mxu0 %v3683_v32  ;;  %1107 = vmatpush.msrb.mxu3 %v3677_v26 }
 0x272   : > { %1016 = vmatpush.msrb.mxu1 %v3684_v33  ;;  %1088 = vmatpush.msrb.mxu2 %v3679_v28 }
 0x273   : > { %997 = vmatpush.msrb.mxu0 %v3686_v35  ;;  %1108 = vmatpush.msrb.mxu3 %v3680_v29 }
 0x274   : > { %1017 = vmatpush.msrb.mxu1 %v3687_v36  ;;  %1089 = vmatpush.msrb.mxu2 %v3682_v31 }
 0x275   : > { %998 = vmatpush.msrb.mxu0 %v3689_v38  ;;  %1109 = vmatpush.msrb.mxu3 %v3683_v32 }
 0x276   : > { %1018 = vmatpush.msrb.mxu1 %v3690_v39  ;;  %1090 = vmatpush.msrb.mxu2 %v3685_v34 }
 0x277   : > { %999 = vmatpush.msrb.mxu0 %v3692_v41  ;;  %1110 = vmatpush.msrb.mxu3 %v3686_v35 }
 0x278   : > { %1019 = vmatpush.msrb.mxu1 %v3693_v42  ;;  %1091 = vmatpush.msrb.mxu2 %v3688_v37 }
 0x279   : > { %1000 = vmatpush.msrb.mxu0 %v3695_v44  ;;  %1111 = vmatpush.msrb.mxu3 %v3689_v38 }
 0x27a   : > { %1020 = vmatpush.msrb.mxu1 %v3696_v46  ;;  %1092 = vmatpush.msrb.mxu2 %v3691_v40 }
 0x27b   : > { %1118 = vmatpush.msra.mxu0 %v3651_v63  ;;  %1112 = vmatpush.msrb.mxu3 %v3692_v41 }
 0x27c   : > { %1191 = vmatpush.msra.mxu1 %v3649_v0  ;;  %1093 = vmatpush.msrb.mxu2 %v3694_v43 }
 0x27d   : > { %1119 = vmatpush.msra.mxu0 %v3654_v9  ;;  %1113 = vmatpush.msrb.mxu3 %v3695_v44 }
 0x27e   : > { %1211 = vmatpush.msra.mxu2 %v3650_v61  ;;  %1192 = vmatpush.msra.mxu1 %v3652_v14 }
 0x27f   : > { %1120 = vmatpush.msra.mxu0 %v3657_v3 }
 0x280   : > { %1212 = vmatpush.msra.mxu2 %v3653_v8  ;;  %1193 = vmatpush.msra.mxu1 %v3655_v5 }
 0x281   : > { %1121 = vmatpush.msra.mxu0 %v3660_v12 }
 0x282   : > { %1213 = vmatpush.msra.mxu2 %v3656_v2  ;;  %1194 = vmatpush.msra.mxu1 %v3658_v6 }
 0x283   : > { %1122 = vmatpush.msra.mxu0 %v3663_v7 }
 0x284   : > { %1214 = vmatpush.msra.mxu2 %v3659_v11  ;;  %1195 = vmatpush.msra.mxu1 %v3661_v13 }
 0x285   : > { %1123 = vmatpush.msra.mxu0 %v3666_v16 }
 0x286   : > { %1215 = vmatpush.msra.mxu2 %v3662_v10  ;;  %1196 = vmatpush.msra.mxu1 %v3664_v15 }
 0x287   : > { %1124 = vmatpush.msra.mxu0 %v3669_v18 }
 0x288   : > { %1216 = vmatpush.msra.mxu2 %v3665_v4  ;;  %1197 = vmatpush.msra.mxu1 %v3667_v1 }
 0x289   : > { %1125 = vmatpush.msra.mxu0 %v3672_v21 }
 0x28a   : > { %1217 = vmatpush.msra.mxu2 %v3668_v17  ;;  %1198 = vmatpush.msra.mxu1 %v3670_v19 }
 0x28b   : > { %1126 = vmatpush.msra.mxu0 %v3675_v24 }
 0x28c   : > { %1218 = vmatpush.msra.mxu2 %v3671_v20  ;;  %1199 = vmatpush.msra.mxu1 %v3673_v22 }
 0x28d   : > { %1127 = vmatpush.msra.mxu0 %v3678_v27 }
 0x28e   : > { %1219 = vmatpush.msra.mxu2 %v3674_v23  ;;  %1200 = vmatpush.msra.mxu1 %v3676_v25 }
 0x28f   : > { %1128 = vmatpush.msra.mxu0 %v3681_v30 }
 0x290   : > { %1220 = vmatpush.msra.mxu2 %v3677_v26  ;;  %1201 = vmatpush.msra.mxu1 %v3679_v28 }
 0x291   : > { %1129 = vmatpush.msra.mxu0 %v3684_v33 }
 0x292   : > { %1221 = vmatpush.msra.mxu2 %v3680_v29  ;;  %1202 = vmatpush.msra.mxu1 %v3682_v31 }
 0x293   : > { %1130 = vmatpush.msra.mxu0 %v3687_v36 }
 0x294   : > { %1222 = vmatpush.msra.mxu2 %v3683_v32  ;;  %1203 = vmatpush.msra.mxu1 %v3685_v34 }
 0x295   : > { %1131 = vmatpush.msra.mxu0 %v3690_v39 }
 0x296   : > { %1223 = vmatpush.msra.mxu2 %v3686_v35  ;;  %1204 = vmatpush.msra.mxu1 %v3688_v37 }
 0x297   : > { %1132 = vmatpush.msra.mxu0 %v3693_v42 }
 0x298   : > { %1224 = vmatpush.msra.mxu2 %v3689_v38  ;;  %1205 = vmatpush.msra.mxu1 %v3691_v40 }
 0x299   : > { %1133 = vmatpush.msra.mxu0 %v3696_v46 }
 0x29a   : > { %1225 = vmatpush.msra.mxu2 %v3692_v41  ;;  %1206 = vmatpush.msra.mxu1 %v3694_v43 }
 0x29c   : > { %1226 = vmatpush.msra.mxu2 %v3695_v44  ;;  %v3697_v44 = vld [vmem:[#allocation66_spill] sm:$0xff] }
 0x29d   : > { %v3234_v43 = vperm.slane %v3697_v44, 0 }
 0x2d7   : > { %v867_v51 = vpop.f32.mrf.mxu0  ;;  %v887_v55 = vpop.f32.mrf.mxu1 }
 0x2d8   : > { %v910_v52 = vadd.f32 %v867_v51, %v847_v47  ;;  %v930_v54 = vadd.f32 %v887_v55, %v848_v48 }
 0x2da   : > { %v1968_v49 = vmul.f32 -1.442695, %v910_v52  ;;  %v1969_v50 = vmul.f32 -1.442695, %v930_v54 }
 0x2dc   : > { %2134 = vpow2.f32 %v1968_v49 }
 0x2dd   : > { %2136 = vpow2.f32 %v1969_v50 }
 0x2df   : > { %v907_v47 = vpop.f32.mrf.mxu2 }
 0x2e0   : > { %v953_v54 = vadd.f32 %v3234_v43, %v907_v47 }
 0x2e2   : > { %v2135_v57 = vpop.eup %2134 }
 0x2e3   : > { %v2137_v56 = vpop.eup %2136  ;;  %v914_v60 = vadd.f32 1.0, %v2135_v57 }
 0x2e4   : > { %v934_v59 = vadd.f32 1.0, %v2137_v56  ;;  %v849_v56 = vld [vmem:[#allocation2 + $0x10] sm:$0xff] }
 0x2e5   : > { %2138 = vrcp.f32 %v914_v60  ;;  %v926_v48 = vand.u32 2147483648, %v914_v60  ;;  %v924_v55 = vand.u32 2147483647, %v914_v60  ;;  %vm920_vm1 = vweird.f32 %v914_v60 }
 0x2e6   : > { %2140 = vrcp.f32 %v934_v59  ;;  %vm940_vm4 = vweird.f32 %v934_v59  ;;  %v946_v42 = vand.u32 2147483648, %v934_v59  ;;  %v944_v38 = vand.u32 2147483647, %v934_v59 }
 0x2e7   : > { %v927_v50 = vor.u32 1.1754944e-38, %v926_v48  ;;  %vm925_vm3 = vcmp.eq.f32.partialorder %v924_v55, 8.507059e+37 }
 0x2e8   : > { %vm945_vm7 = vcmp.eq.f32.partialorder %v944_v38, 8.507059e+37  ;;  %v3698_v38 = vld [vmem:[#allocation24_spill] sm:$0xff] }
 0x2eb   : > { %v2139_v58 = vpop.eup %2138 }
 0x2ec   : > { %v2141_v62 = vpop.eup %2140  ;;  %v916_v53 = vmul.f32 %v2139_v58, %v914_v60  ;;  %vm921_vm0 = vweird.f32 %v2139_v58  ;;  %v947_v60 = vor.u32 1.1754944e-38, %v946_v42  ;;  %v3701_v42 = vld [vmem:[#allocation21_spill] sm:$0xff] }
 0x2ed   : > { %v936_v46 = vmul.f32 %v2141_v62, %v934_v59  ;;  %vm922_vm2 = vmor %vm920_vm1, %vm921_vm0  ;;  %vm941_vm5 = vweird.f32 %v2141_v62  ;;  %v3702_v59 = vld [vmem:[#allocation19_spill] sm:$0xff] }
 0x2ee   : > { %v917_v45 = vsub.f32 1.0, %v916_v53  ;;  %vm942_vm6 = vmor %vm940_vm4, %vm941_vm5 }
 0x2ef   : > { %v937_v49 = vsub.f32 1.0, %v936_v46 }
 0x2f0   : > { %v918_v51 = vmul.f32 %v2139_v58, %v917_v45 }
 0x2f1   : > { %v938_v44 = vmul.f32 %v2141_v62, %v937_v49 }
 0x2f2   : > { %v919_v52 = vadd.f32 %v2139_v58, %v918_v51 }
 0x2f3   : > { %v939_v45 = vadd.f32 %v2141_v62, %v938_v44 }
 0x2f4   : > { %v923_v57 = vsel %vm922_vm2, %v2139_v58, %v919_v52  ;;  %v3704_v52 = vld [vmem:[#allocation18_spill] sm:$0xff] }
 0x2f5   : > { %v928_v53 = vsel %vm925_vm3, %v927_v50, %v923_v57  ;;  %v943_v47 = vsel %vm942_vm6, %v2141_v62, %v939_v45  ;;  %v3703_v62 = vld [vmem:[#allocation17_spill] sm:$0xff] }
 0x2f6   : > { %v954_v41 = vmul.f32 %v953_v54, %v928_v53  ;;  %v948_v48 = vsel %vm945_vm7, %v947_v60, %v943_v47  ;;  %v963_v54 = vld [vmem:[#allocation2 + $0x60] sm:$0xff] }
 0x2f8   : > { %v955_v40 = vadd.f32 %v954_v41, %v849_v56  ;;  %v3700_v41 = vld [vmem:[#allocation20_spill] sm:$0xff]  ;;  %v962_v56 = vld [vmem:[#allocation2 + $0x48] sm:$0xff] }
 0x2fa   : > { %2142 = vtanh.f32 %v955_v40  ;;  %v3699_v40 = vld [vmem:[#allocation22_spill] sm:$0xff] }
 0x300   : > { %v2143_v46 = vpop.eup %2142 }
 0x301   : > { %v957_v51 = vsub.f32 0.0, %v2143_v46 }
 0x303   : > { %v958_v58 = vmul.f32 %v957_v51, %v948_v48 }
 0x305   : > { %v3237_v55 = vadd.f32 %v2143_v46, %v958_v58 }
 0x307   : > { %960 = vst [vmem:[#allocation3 + $0x30] sm:$0xff] %v3237_v55  ;;  %981 = vmatmul.f32.vlgmr.msra.gmra.mxu3 %v3237_v55  ;;  %1001 = vmatmul.f32.vlgmr.msrb.gmra.mxu0 %v3237_v55 }
 0x308   : > { %1021 = vmatmul.f32.vlgmr.msrb.gmra.mxu1 %v3237_v55  ;;  %1231 = vmatpush.msra.mxu3 %v3651_v63 }
 0x309   : > { %1304 = vmatpush.msrb.mxu0 %v3649_v0  ;;  %1324 = vmatpush.msrb.mxu1 %v3650_v61 }
 0x30a   : > { %1232 = vmatpush.msra.mxu3 %v3654_v9 }
 0x30b   : > { %1305 = vmatpush.msrb.mxu0 %v3652_v14  ;;  %1325 = vmatpush.msrb.mxu1 %v3653_v8 }
 0x30c   : > { %1233 = vmatpush.msra.mxu3 %v3657_v3 }
 0x30d   : > { %1306 = vmatpush.msrb.mxu0 %v3655_v5  ;;  %1326 = vmatpush.msrb.mxu1 %v3656_v2 }
 0x30e   : > { %1234 = vmatpush.msra.mxu3 %v3660_v12 }
 0x30f   : > { %1307 = vmatpush.msrb.mxu0 %v3658_v6  ;;  %1327 = vmatpush.msrb.mxu1 %v3659_v11 }
 0x310   : > { %1235 = vmatpush.msra.mxu3 %v3663_v7 }
 0x311   : > { %1308 = vmatpush.msrb.mxu0 %v3661_v13  ;;  %1328 = vmatpush.msrb.mxu1 %v3662_v10 }
 0x312   : > { %1236 = vmatpush.msra.mxu3 %v3666_v16 }
 0x313   : > { %1309 = vmatpush.msrb.mxu0 %v3664_v15  ;;  %1329 = vmatpush.msrb.mxu1 %v3665_v4 }
 0x314   : > { %1237 = vmatpush.msra.mxu3 %v3669_v18 }
 0x315   : > { %1310 = vmatpush.msrb.mxu0 %v3667_v1  ;;  %1330 = vmatpush.msrb.mxu1 %v3668_v17 }
 0x316   : > { %1238 = vmatpush.msra.mxu3 %v3672_v21 }
 0x317   : > { %1311 = vmatpush.msrb.mxu0 %v3670_v19  ;;  %1331 = vmatpush.msrb.mxu1 %v3671_v20 }
 0x318   : > { %1239 = vmatpush.msra.mxu3 %v3675_v24 }
 0x319   : > { %1312 = vmatpush.msrb.mxu0 %v3673_v22  ;;  %1332 = vmatpush.msrb.mxu1 %v3674_v23 }
 0x31a   : > { %1240 = vmatpush.msra.mxu3 %v3678_v27 }
 0x31b   : > { %1313 = vmatpush.msrb.mxu0 %v3676_v25  ;;  %1333 = vmatpush.msrb.mxu1 %v3677_v26 }
 0x31c   : > { %1241 = vmatpush.msra.mxu3 %v3681_v30 }
 0x31d   : > { %1314 = vmatpush.msrb.mxu0 %v3679_v28  ;;  %1334 = vmatpush.msrb.mxu1 %v3680_v29 }
 0x31e   : > { %1242 = vmatpush.msra.mxu3 %v3684_v33 }
 0x31f   : > { %1315 = vmatpush.msrb.mxu0 %v3682_v31  ;;  %1335 = vmatpush.msrb.mxu1 %v3683_v32 }
 0x320   : > { %1243 = vmatpush.msra.mxu3 %v3687_v36 }
 0x321   : > { %1316 = vmatpush.msrb.mxu0 %v3685_v34  ;;  %1336 = vmatpush.msrb.mxu1 %v3686_v35 }
 0x322   : > { %1244 = vmatpush.msra.mxu3 %v3690_v39 }
 0x323   : > { %1317 = vmatpush.msrb.mxu0 %v3688_v37  ;;  %1337 = vmatpush.msrb.mxu1 %v3698_v38 }
 0x324   : > { %1245 = vmatpush.msra.mxu3 %v3699_v40 }
 0x325   : > { %1318 = vmatpush.msrb.mxu0 %v3700_v41  ;;  %1338 = vmatpush.msrb.mxu1 %v3701_v42 }
 0x326   : > { %1246 = vmatpush.msra.mxu3 %v3702_v59 }
 0x327   : > { %1319 = vmatpush.msrb.mxu0 %v3703_v62  ;;  %1339 = vmatpush.msrb.mxu1 %v3704_v52 }
 0x384   : > { %v1002_v49 = vpop.f32.mrf.mxu0 }
 0x385   : > { %v1045_v50 = vadd.f32 %v1002_v49, %v963_v54 }
 0x387   : > { %v1971_v57 = vmul.f32 -1.442695, %v1045_v50  ;;  %v1022_v50 = vpop.f32.mrf.mxu1 }
 0x389   : > { %2144 = vpow2.f32 %v1971_v57 }
 0x38a   : > { %v982_v53 = vpop.f32.mrf.mxu3 }
 0x38b   : > { %v1025_v44 = vadd.f32 %v982_v53, %v962_v56 }
 0x38d   : > { %v1970_v45 = vmul.f32 -1.442695, %v1025_v44  ;;  %v1065_v44 = vadd.f32 %v1022_v50, %v3234_v43 }
 0x38f   : > { %2146 = vpow2.f32 %v1970_v45  ;;  %v2145_v60 = vpop.eup %2144 }
 0x390   : > { %v1049_v46 = vadd.f32 1.0, %v2145_v60 }
 0x392   : > { %vm1055_vm13 = vweird.f32 %v1049_v46  ;;  %v1059_v37 = vand.u32 2147483647, %v1049_v46 }
 0x394   : > { %vm1060_vm15 = vcmp.eq.f32.partialorder %v1059_v37, 8.507059e+37  ;;  %v3705_v37 = vld [vmem:[#allocation23_spill] sm:$0xff] }
 0x395   : > { %v2147_v47 = vpop.eup %2146 }
 0x396   : > { %v1029_v51 = vadd.f32 1.0, %v2147_v47  ;;  %v964_v47 = vld [vmem:[#allocation2 + $0x28] sm:$0xff] }
 0x398   : > { %2148 = vrcp.f32 %v1029_v51  ;;  %v1041_v42 = vand.u32 2147483648, %v1029_v51  ;;  %v1039_v49 = vand.u32 2147483647, %v1029_v51  ;;  %vm1035_vm9 = vweird.f32 %v1029_v51 }
 0x399   : > { %2150 = vrcp.f32 %v1049_v46 }
 0x39a   : > { %v1042_v53 = vor.u32 1.1754944e-38, %v1041_v42  ;;  %vm1040_vm11 = vcmp.eq.f32.partialorder %v1039_v49, 8.507059e+37 }
 0x39e   : > { %v2149_v48 = vpop.eup %2148 }
 0x39f   : > { %v2151_v58 = vpop.eup %2150  ;;  %v1031_v62 = vmul.f32 %v2149_v48, %v1029_v51  ;;  %vm1036_vm8 = vweird.f32 %v2149_v48 }
 0x3a0   : > { %v1051_v59 = vmul.f32 %v2151_v58, %v1049_v46  ;;  %vm1037_vm10 = vmor %vm1035_vm9, %vm1036_vm8  ;;  %vm1056_vm12 = vweird.f32 %v2151_v58 }
 0x3a1   : > { %v1032_v52 = vsub.f32 1.0, %v1031_v62  ;;  %vm1057_vm14 = vmor %vm1055_vm13, %vm1056_vm12 }
 0x3a2   : > { %v1052_v57 = vsub.f32 1.0, %v1051_v59 }
 0x3a3   : > { %v1033_v54 = vmul.f32 %v2149_v48, %v1032_v52  ;;  %v1061_v52 = vand.u32 2147483648, %v1049_v46  ;;  %v3710_v46 = vld [vmem:[#allocation19_spill] sm:$0xff] }
 0x3a4   : > { %v1053_v40 = vmul.f32 %v2151_v58, %v1052_v57  ;;  %v1075_v57 = vld [vmem:[#allocation2 + $0x40] sm:$0xff] }
 0x3a5   : > { %v1034_v56 = vadd.f32 %v2149_v48, %v1033_v54  ;;  %v1062_v54 = vor.u32 1.1754944e-38, %v1061_v52 }
 0x3a6   : > { %v1054_v38 = vadd.f32 %v2151_v58, %v1053_v40  ;;  %v3708_v40 = vld [vmem:[#allocation20_spill] sm:$0xff] }
 0x3a7   : > { %v1038_v45 = vsel %vm1037_vm10, %v2149_v48, %v1034_v56  ;;  %v3712_v56 = vld [vmem:[#allocation18_spill] sm:$0xff] }
 0x3a8   : > { %v1043_v60 = vsel %vm1040_vm11, %v1042_v53, %v1038_v45  ;;  %v1058_v51 = vsel %vm1057_vm14, %v2151_v58, %v1054_v38  ;;  %v3707_v38 = vld [vmem:[#allocation22_spill] sm:$0xff]  ;;  %v3711_v58 = vld [vmem:[#allocation17_spill] sm:$0xff]  ;;  %v1076_v53 = vld [vmem:[#allocation2 + $0x78] sm:$0xff] }
 0x3a9   : > { %v1066_v41 = vmul.f32 %v1065_v44, %v1043_v60  ;;  %v1063_v48 = vsel %vm1060_vm15, %v1062_v54, %v1058_v51 }
 0x3ab   : > { %v1067_v62 = vadd.f32 %v1066_v41, %v964_v47  ;;  %v3709_v41 = vld [vmem:[#allocation21_spill] sm:$0xff] }
 0x3ad   : > { %2152 = vtanh.f32 %v1067_v62 }
 0x3b3   : > { %v2153_v59 = vpop.eup %2152 }
 0x3b4   : > { %v1069_v42 = vsub.f32 %v3237_v55, %v2153_v59  ;;  %v3706_v55 = vld [vmem:[#allocation24_spill] sm:$0xff] }
 0x3b6   : > { %v1070_v49 = vmul.f32 %v1069_v42, %v1063_v48 }
 0x3b8   : > { %v3293_v50 = vadd.f32 %v2153_v59, %v1070_v49 }
 0x3ba   : > { %1073 = vst [vmem:[#allocation3 + $0x8] sm:$0xff] %v3293_v50  ;;  %1094 = vmatmul.f32.vlgmr.msrb.gmra.mxu2 %v3293_v50  ;;  %1114 = vmatmul.f32.vlgmr.msrb.gmra.mxu3 %v3293_v50 }
 0x3bb   : > { %1134 = vmatmul.f32.vlgmr.msra.gmra.mxu0 %v3293_v50  ;;  %1344 = vmatpush.msrb.mxu2 %v3651_v63 }
 0x3bc   : > { %1417 = vmatpush.msrb.mxu3 %v3649_v0  ;;  %1437 = vmatpush.msra.mxu0 %v3650_v61 }
 0x3bd   : > { %1345 = vmatpush.msrb.mxu2 %v3654_v9 }
 0x3be   : > { %1418 = vmatpush.msrb.mxu3 %v3652_v14  ;;  %1438 = vmatpush.msra.mxu0 %v3653_v8 }
 0x3bf   : > { %1346 = vmatpush.msrb.mxu2 %v3657_v3 }
 0x3c0   : > { %1419 = vmatpush.msrb.mxu3 %v3655_v5  ;;  %1439 = vmatpush.msra.mxu0 %v3656_v2 }
 0x3c1   : > { %1347 = vmatpush.msrb.mxu2 %v3660_v12 }
 0x3c2   : > { %1420 = vmatpush.msrb.mxu3 %v3658_v6  ;;  %1440 = vmatpush.msra.mxu0 %v3659_v11 }
 0x3c3   : > { %1348 = vmatpush.msrb.mxu2 %v3663_v7 }
 0x3c4   : > { %1421 = vmatpush.msrb.mxu3 %v3661_v13  ;;  %1441 = vmatpush.msra.mxu0 %v3662_v10 }
 0x3c5   : > { %1349 = vmatpush.msrb.mxu2 %v3666_v16 }
 0x3c6   : > { %1422 = vmatpush.msrb.mxu3 %v3664_v15  ;;  %1442 = vmatpush.msra.mxu0 %v3665_v4 }
 0x3c7   : > { %1350 = vmatpush.msrb.mxu2 %v3669_v18 }
 0x3c8   : > { %1423 = vmatpush.msrb.mxu3 %v3667_v1  ;;  %1443 = vmatpush.msra.mxu0 %v3668_v17 }
 0x3c9   : > { %1351 = vmatpush.msrb.mxu2 %v3672_v21 }
 0x3ca   : > { %1424 = vmatpush.msrb.mxu3 %v3670_v19  ;;  %1444 = vmatpush.msra.mxu0 %v3671_v20 }
 0x3cb   : > { %1352 = vmatpush.msrb.mxu2 %v3675_v24 }
 0x3cc   : > { %1425 = vmatpush.msrb.mxu3 %v3673_v22  ;;  %1445 = vmatpush.msra.mxu0 %v3674_v23 }
 0x3cd   : > { %1353 = vmatpush.msrb.mxu2 %v3678_v27 }
 0x3ce   : > { %1426 = vmatpush.msrb.mxu3 %v3676_v25  ;;  %1446 = vmatpush.msra.mxu0 %v3677_v26 }
 0x3cf   : > { %1354 = vmatpush.msrb.mxu2 %v3681_v30 }
 0x3d0   : > { %1427 = vmatpush.msrb.mxu3 %v3679_v28  ;;  %1447 = vmatpush.msra.mxu0 %v3680_v29 }
 0x3d1   : > { %1355 = vmatpush.msrb.mxu2 %v3684_v33 }
 0x3d2   : > { %1428 = vmatpush.msrb.mxu3 %v3682_v31  ;;  %1448 = vmatpush.msra.mxu0 %v3683_v32 }
 0x3d3   : > { %1356 = vmatpush.msrb.mxu2 %v3687_v36 }
 0x3d4   : > { %1429 = vmatpush.msrb.mxu3 %v3685_v34  ;;  %1449 = vmatpush.msra.mxu0 %v3686_v35 }
 0x3d5   : > { %1357 = vmatpush.msrb.mxu2 %v3690_v39 }
 0x3d6   : > { %1430 = vmatpush.msrb.mxu3 %v3705_v37  ;;  %1450 = vmatpush.msra.mxu0 %v3706_v55 }
 0x3d7   : > { %1358 = vmatpush.msrb.mxu2 %v3707_v38 }
 0x3d8   : > { %1431 = vmatpush.msrb.mxu3 %v3708_v40  ;;  %1451 = vmatpush.msra.mxu0 %v3709_v41 }
 0x3d9   : > { %1359 = vmatpush.msrb.mxu2 %v3710_v46 }
 0x3da   : > { %1432 = vmatpush.msrb.mxu3 %v3711_v58  ;;  %1452 = vmatpush.msra.mxu0 %v3712_v56 }
 0x43d   : > { %v1095_v44 = vpop.f32.mrf.mxu2  ;;  %v1115_v45 = vpop.f32.mrf.mxu3 }
 0x43e   : > { %v1138_v60 = vadd.f32 %v1095_v44, %v1075_v57  ;;  %v1158_v47 = vadd.f32 %v1115_v45, %v1076_v53  ;;  %v1135_v53 = vpop.f32.mrf.mxu0 }
 0x440   : > { %v1972_v62 = vmul.f32 -1.442695, %v1138_v60  ;;  %v1973_v52 = vmul.f32 -1.442695, %v1158_v47  ;;  %v1178_v47 = vadd.f32 %v1135_v53, %v3234_v43 }
 0x442   : > { %2154 = vpow2.f32 %v1972_v62 }
 0x443   : > { %2156 = vpow2.f32 %v1973_v52 }
 0x448   : > { %v2155_v51 = vpop.eup %2154 }
 0x449   : > { %v2157_v59 = vpop.eup %2156  ;;  %v1142_v54 = vadd.f32 1.0, %v2155_v51  ;;  %v1077_v51 = vld [vmem:[#allocation2 + $0x88] sm:$0xff] }
 0x44a   : > { %v1162_v42 = vadd.f32 1.0, %v2157_v59 }
 0x44b   : > { %2158 = vrcp.f32 %v1142_v54  ;;  %v1154_v46 = vand.u32 2147483648, %v1142_v54  ;;  %v1152_v57 = vand.u32 2147483647, %v1142_v54  ;;  %vm1148_vm1 = vweird.f32 %v1142_v54 }
 0x44c   : > { %2160 = vrcp.f32 %v1162_v42  ;;  %vm1168_vm5 = vweird.f32 %v1162_v42  ;;  %v1172_v37 = vand.u32 2147483647, %v1162_v42 }
 0x44d   : > { %v1155_v45 = vor.u32 1.1754944e-38, %v1154_v46  ;;  %vm1153_vm3 = vcmp.eq.f32.partialorder %v1152_v57, 8.507059e+37 }
 0x44e   : > { %vm1173_vm7 = vcmp.eq.f32.partialorder %v1172_v37, 8.507059e+37  ;;  %v3714_v37 = vld [vmem:[#allocation24_spill] sm:$0xff] }
 0x451   : > { %v2159_v48 = vpop.eup %2158 }
 0x452   : > { %v2161_v49 = vpop.eup %2160  ;;  %v1144_v58 = vmul.f32 %v2159_v48, %v1142_v54  ;;  %vm1149_vm0 = vweird.f32 %v2159_v48 }
 0x453   : > { %v1164_v41 = vmul.f32 %v2161_v49, %v1162_v42  ;;  %vm1150_vm2 = vmor %vm1148_vm1, %vm1149_vm0  ;;  %vm1169_vm4 = vweird.f32 %v2161_v49 }
 0x454   : > { %v1145_v56 = vsub.f32 1.0, %v1144_v58  ;;  %vm1170_vm6 = vmor %vm1168_vm5, %vm1169_vm4 }
 0x455   : > { %v1165_v60 = vsub.f32 1.0, %v1164_v41 }
 0x456   : > { %v1146_v40 = vmul.f32 %v2159_v48, %v1145_v56  ;;  %v1174_v56 = vand.u32 2147483648, %v1162_v42  ;;  %v3717_v42 = vld [vmem:[#allocation21_spill] sm:$0xff] }
 0x457   : > { %v1166_v38 = vmul.f32 %v2161_v49, %v1165_v60  ;;  %v1188_v60 = vld [vmem:[#allocation2 + $0x90] sm:$0xff] }
 0x458   : > { %v1147_v44 = vadd.f32 %v2159_v48, %v1146_v40  ;;  %v1175_v46 = vor.u32 1.1754944e-38, %v1174_v56 }
 0x459   : > { %v1167_v55 = vadd.f32 %v2161_v49, %v1166_v38  ;;  %v3716_v38 = vld [vmem:[#allocation20_spill] sm:$0xff] }
 0x45a   : > { %v1151_v62 = vsel %vm1150_vm2, %v2159_v48, %v1147_v44  ;;  %v3719_v44 = vld [vmem:[#allocation17_spill] sm:$0xff] }
 0x45b   : > { %v1156_v52 = vsel %vm1153_vm3, %v1155_v45, %v1151_v62  ;;  %v1171_v40 = vsel %vm1170_vm6, %v2161_v49, %v1167_v55  ;;  %v3715_v55 = vld [vmem:[#allocation22_spill] sm:$0xff]  ;;  %v3718_v49 = vld [vmem:[#allocation19_spill] sm:$0xff] }
 0x45c   : > { %v1179_v59 = vmul.f32 %v1178_v47, %v1156_v52  ;;  %v1176_v48 = vsel %vm1173_vm7, %v1175_v46, %v1171_v40  ;;  %v3720_v45 = vld [vmem:[#allocation18_spill] sm:$0xff] }
 0x45e   : > { %v1180_v58 = vadd.f32 %v1179_v59, %v1077_v51  ;;  %v1189_v51 = vld [vmem:[#allocation2 + $0x18] sm:$0xff] }
 0x460   : > { %2162 = vtanh.f32 %v1180_v58 }
 0x466   : > { %v2163_v54 = vpop.eup %2162 }
 0x467   : > { %v1182_v41 = vsub.f32 %v3293_v50, %v2163_v54  ;;  %v3713_v50 = vld [vmem:[#allocation23_spill] sm:$0xff] }
 0x469   : > { %v1183_v57 = vmul.f32 %v1182_v41, %v1176_v48 }
 0x46b   : > { %v3349_v53 = vadd.f32 %v2163_v54, %v1183_v57 }
 0x46d   : > { %1186 = vst [vmem:[#allocation3 + $0x20] sm:$0xff] %v3349_v53  ;;  %1207 = vmatmul.f32.vlgmr.msra.gmra.mxu1 %v3349_v53  ;;  %1227 = vmatmul.f32.vlgmr.msra.gmra.mxu2 %v3349_v53 }
 0x46e   : > { %1247 = vmatmul.f32.vlgmr.msra.gmra.mxu3 %v3349_v53  ;;  %1457 = vmatpush.msra.mxu1 %v3651_v63 }
 0x46f   : > { %1530 = vmatpush.msra.mxu2 %v3649_v0  ;;  %1550 = vmatpush.msra.mxu3 %v3650_v61 }
 0x470   : > { %1458 = vmatpush.msra.mxu1 %v3654_v9 }
 0x471   : > { %1531 = vmatpush.msra.mxu2 %v3652_v14  ;;  %1551 = vmatpush.msra.mxu3 %v3653_v8 }
 0x472   : > { %1459 = vmatpush.msra.mxu1 %v3657_v3 }
 0x473   : > { %1532 = vmatpush.msra.mxu2 %v3655_v5  ;;  %1552 = vmatpush.msra.mxu3 %v3656_v2 }
 0x474   : > { %1460 = vmatpush.msra.mxu1 %v3660_v12 }
 0x475   : > { %1533 = vmatpush.msra.mxu2 %v3658_v6  ;;  %1553 = vmatpush.msra.mxu3 %v3659_v11 }
 0x476   : > { %1461 = vmatpush.msra.mxu1 %v3663_v7 }
 0x477   : > { %1534 = vmatpush.msra.mxu2 %v3661_v13  ;;  %1554 = vmatpush.msra.mxu3 %v3662_v10 }
 0x478   : > { %1462 = vmatpush.msra.mxu1 %v3666_v16 }
 0x479   : > { %1535 = vmatpush.msra.mxu2 %v3664_v15  ;;  %1555 = vmatpush.msra.mxu3 %v3665_v4 }
 0x47a   : > { %1463 = vmatpush.msra.mxu1 %v3669_v18 }
 0x47b   : > { %1536 = vmatpush.msra.mxu2 %v3667_v1  ;;  %1556 = vmatpush.msra.mxu3 %v3668_v17 }
 0x47c   : > { %1464 = vmatpush.msra.mxu1 %v3672_v21 }
 0x47d   : > { %1537 = vmatpush.msra.mxu2 %v3670_v19  ;;  %1557 = vmatpush.msra.mxu3 %v3671_v20 }
 0x47e   : > { %1465 = vmatpush.msra.mxu1 %v3675_v24 }
 0x47f   : > { %1538 = vmatpush.msra.mxu2 %v3673_v22  ;;  %1558 = vmatpush.msra.mxu3 %v3674_v23 }
 0x480   : > { %1466 = vmatpush.msra.mxu1 %v3678_v27 }
 0x481   : > { %1539 = vmatpush.msra.mxu2 %v3676_v25  ;;  %1559 = vmatpush.msra.mxu3 %v3677_v26 }
 0x482   : > { %1467 = vmatpush.msra.mxu1 %v3681_v30 }
 0x483   : > { %1540 = vmatpush.msra.mxu2 %v3679_v28  ;;  %1560 = vmatpush.msra.mxu3 %v3680_v29 }
 0x484   : > { %1468 = vmatpush.msra.mxu1 %v3684_v33 }
 0x485   : > { %1541 = vmatpush.msra.mxu2 %v3682_v31  ;;  %1561 = vmatpush.msra.mxu3 %v3683_v32 }
 0x486   : > { %1469 = vmatpush.msra.mxu1 %v3687_v36 }
 0x487   : > { %1542 = vmatpush.msra.mxu2 %v3685_v34  ;;  %1562 = vmatpush.msra.mxu3 %v3686_v35 }
 0x488   : > { %1470 = vmatpush.msra.mxu1 %v3690_v39 }
 0x489   : > { %1543 = vmatpush.msra.mxu2 %v3713_v50  ;;  %1563 = vmatpush.msra.mxu3 %v3714_v37 }
 0x48a   : > { %1471 = vmatpush.msra.mxu1 %v3715_v55 }
 0x48b   : > { %1544 = vmatpush.msra.mxu2 %v3716_v38  ;;  %1564 = vmatpush.msra.mxu3 %v3717_v42 }
 0x48c   : > { %1472 = vmatpush.msra.mxu1 %v3718_v49 }
 0x48d   : > { %1545 = vmatpush.msra.mxu2 %v3719_v44  ;;  %1565 = vmatpush.msra.mxu3 %v3720_v45 }
 0x4ea   : > { %v1208_v47 = vpop.f32.mrf.mxu1 }
 0x4eb   : > { %v1251_v62 = vadd.f32 %v1208_v47, %v1188_v60 }
 0x4ed   : > { %v1974_v52 = vmul.f32 -1.442695, %v1251_v62 }
 0x4ef   : > { %2164 = vpow2.f32 %v1974_v52 }
 0x4f0   : > { %v1228_v59 = vpop.f32.mrf.mxu2 }
 0x4f1   : > { %v1271_v58 = vadd.f32 %v1228_v59, %v1189_v51  ;;  %v1248_v62 = vpop.f32.mrf.mxu3 }
 0x4f3   : > { %v1975_v56 = vmul.f32 -1.442695, %v1271_v58 }
 0x4f5   : > { %v2165_v40 = vpop.eup %2164  ;;  %2166 = vpow2.f32 %v1975_v56  ;;  %v1291_v56 = vadd.f32 %v1248_v62, %v3234_v43 }
 0x4f6   : > { %v1255_v54 = vadd.f32 1.0, %v2165_v40  ;;  %v1190_v40 = vld [vmem:[#allocation2 + $0x98] sm:$0xff] }
 0x4f8   : > { %2168 = vrcp.f32 %v1255_v54  ;;  %v1267_v45 = vand.u32 2147483648, %v1255_v54  ;;  %v1265_v60 = vand.u32 2147483647, %v1255_v54  ;;  %vm1261_vm9 = vweird.f32 %v1255_v54 }
 0x4fa   : > { %v1268_v51 = vor.u32 1.1754944e-38, %v1267_v45  ;;  %vm1266_vm11 = vcmp.eq.f32.partialorder %v1265_v60, 8.507059e+37 }
 0x4fb   : > { %v2167_v46 = vpop.eup %2166 }
 0x4fc   : > { %v1275_v41 = vadd.f32 1.0, %v2167_v46 }
 0x4fe   : > { %v2169_v48 = vpop.eup %2168  ;;  %2170 = vrcp.f32 %v1275_v41  ;;  %v1287_v37 = vand.u32 2147483648, %v1275_v41  ;;  %vm1281_vm13 = vweird.f32 %v1275_v41  ;;  %v1285_v50 = vand.u32 2147483647, %v1275_v41 }
 0x4ff   : > { %v1257_v57 = vmul.f32 %v2169_v48, %v1255_v54  ;;  %vm1262_vm8 = vweird.f32 %v2169_v48 }
 0x500   : > { %vm1263_vm10 = vmor %vm1261_vm9, %vm1262_vm8  ;;  %v1288_v45 = vor.u32 1.1754944e-38, %v1287_v37  ;;  %vm1286_vm15 = vcmp.eq.f32.partialorder %v1285_v50, 8.507059e+37 }
 0x501   : > { %v1258_v44 = vsub.f32 1.0, %v1257_v57 }
 0x503   : > { %v1259_v49 = vmul.f32 %v2169_v48, %v1258_v44 }
 0x504   : > { %v2171_v47 = vpop.eup %2170 }
 0x505   : > { %v1277_v52 = vmul.f32 %v2171_v47, %v1275_v41  ;;  %v1260_v42 = vadd.f32 %v2169_v48, %v1259_v49  ;;  %vm1282_vm12 = vweird.f32 %v2171_v47 }
 0x506   : > { %vm1283_vm14 = vmor %vm1281_vm13, %vm1282_vm12 }
 0x507   : > { %v1278_v59 = vsub.f32 1.0, %v1277_v52  ;;  %v1264_v58 = vsel %vm1263_vm10, %v2169_v48, %v1260_v42 }
 0x508   : > { %v1269_v46 = vsel %vm1266_vm11, %v1268_v51, %v1264_v58  ;;  %v1303_v51 = vld [vmem:[#allocation2 + $0x70] sm:$0xff] }
 0x509   : > { %v1292_v38 = vmul.f32 %v1291_v56, %v1269_v46  ;;  %v1279_v57 = vmul.f32 %v2171_v47, %v1278_v59 }
 0x50b   : > { %v1293_v55 = vadd.f32 %v1292_v38, %v1190_v40  ;;  %v1280_v44 = vadd.f32 %v2171_v47, %v1279_v57 }
 0x50d   : > { %2172 = vtanh.f32 %v1293_v55  ;;  %v1284_v49 = vsel %vm1283_vm14, %v2171_v47, %v1280_v44 }
 0x50e   : > { %v1289_v48 = vsel %vm1286_vm15, %v1288_v45, %v1284_v49 }
 0x513   : > { %v2173_v54 = vpop.eup %2172 }
 0x514   : > { %v1295_v42 = vsub.f32 %v3349_v53, %v2173_v54 }
 0x516   : > { %v1296_v60 = vmul.f32 %v1295_v42, %v1289_v48 }
 0x518   : > { %v3405_v62 = vadd.f32 %v2173_v54, %v1296_v60 }
 0x51a   : > { %1299 = vst [vmem:[#allocation3] sm:$0xff] %v3405_v62  ;;  %1320 = vmatmul.f32.vlgmr.msrb.gmra.mxu0 %v3405_v62  ;;  %1340 = vmatmul.f32.vlgmr.msrb.gmra.mxu1 %v3405_v62 }
 0x51b   : > { %1360 = vmatmul.f32.vlgmr.msrb.gmra.mxu2 %v3405_v62  ;;  %1570 = vmatpush.msrb.mxu0 %v3651_v63 }
 0x51c   : > { %1643 = vmatpush.msrb.mxu1 %v3649_v0  ;;  %1663 = vmatpush.msrb.mxu2 %v3650_v61  ;;  %v3721_v0 = vld [vmem:[#allocation23_spill] sm:$0xff]  ;;  %v3722_v61 = vld [vmem:[#allocation24_spill] sm:$0xff] }
 0x51d   : > { %1571 = vmatpush.msrb.mxu0 %v3654_v9 }
 0x51e   : > { %1644 = vmatpush.msrb.mxu1 %v3652_v14  ;;  %1664 = vmatpush.msrb.mxu2 %v3653_v8  ;;  %v3723_v14 = vld [vmem:[#allocation22_spill] sm:$0xff]  ;;  %v3724_v8 = vld [vmem:[#allocation20_spill] sm:$0xff] }
 0x51f   : > { %1572 = vmatpush.msrb.mxu0 %v3657_v3 }
 0x520   : > { %1645 = vmatpush.msrb.mxu1 %v3655_v5  ;;  %1665 = vmatpush.msrb.mxu2 %v3656_v2  ;;  %v3725_v5 = vld [vmem:[#allocation21_spill] sm:$0xff]  ;;  %v3726_v2 = vld [vmem:[#allocation19_spill] sm:$0xff] }
 0x521   : > { %1573 = vmatpush.msrb.mxu0 %v3660_v12 }
 0x522   : > { %1646 = vmatpush.msrb.mxu1 %v3658_v6  ;;  %1666 = vmatpush.msrb.mxu2 %v3659_v11  ;;  %v3727_v6 = vld [vmem:[#allocation17_spill] sm:$0xff]  ;;  %v3728_v11 = vld [vmem:[#allocation18_spill] sm:$0xff] }
 0x523   : > { %1574 = vmatpush.msrb.mxu0 %v3663_v7 }
 0x524   : > { %1647 = vmatpush.msrb.mxu1 %v3661_v13  ;;  %1667 = vmatpush.msrb.mxu2 %v3662_v10  ;;  %v1301_v13 = vld [vmem:[#allocation2 + $0x38] sm:$0xff]  ;;  %v1302_v10 = vld [vmem:[#allocation2 + $0x50] sm:$0xff] }
 0x525   : > { %1575 = vmatpush.msrb.mxu0 %v3666_v16 }
 0x526   : > { %1648 = vmatpush.msrb.mxu1 %v3664_v15  ;;  %1668 = vmatpush.msrb.mxu2 %v3665_v4 }
 0x527   : > { %1576 = vmatpush.msrb.mxu0 %v3669_v18 }
 0x528   : > { %1649 = vmatpush.msrb.mxu1 %v3667_v1  ;;  %1669 = vmatpush.msrb.mxu2 %v3668_v17 }
 0x529   : > { %1577 = vmatpush.msrb.mxu0 %v3672_v21 }
 0x52a   : > { %1650 = vmatpush.msrb.mxu1 %v3670_v19  ;;  %1670 = vmatpush.msrb.mxu2 %v3671_v20 }
 0x52b   : > { %1578 = vmatpush.msrb.mxu0 %v3675_v24 }
 0x52c   : > { %1651 = vmatpush.msrb.mxu1 %v3673_v22  ;;  %1671 = vmatpush.msrb.mxu2 %v3674_v23 }
 0x52d   : > { %1579 = vmatpush.msrb.mxu0 %v3678_v27 }
 0x52e   : > { %1652 = vmatpush.msrb.mxu1 %v3676_v25  ;;  %1672 = vmatpush.msrb.mxu2 %v3677_v26 }
 0x52f   : > { %1580 = vmatpush.msrb.mxu0 %v3681_v30 }
 0x530   : > { %1653 = vmatpush.msrb.mxu1 %v3679_v28  ;;  %1673 = vmatpush.msrb.mxu2 %v3680_v29 }
 0x531   : > { %1581 = vmatpush.msrb.mxu0 %v3684_v33 }
 0x532   : > { %1654 = vmatpush.msrb.mxu1 %v3682_v31  ;;  %1674 = vmatpush.msrb.mxu2 %v3683_v32 }
 0x533   : > { %1582 = vmatpush.msrb.mxu0 %v3687_v36 }
 0x534   : > { %1655 = vmatpush.msrb.mxu1 %v3685_v34  ;;  %1675 = vmatpush.msrb.mxu2 %v3686_v35 }
 0x535   : > { %1583 = vmatpush.msrb.mxu0 %v3690_v39 }
 0x536   : > { %1656 = vmatpush.msrb.mxu1 %v3721_v0  ;;  %1676 = vmatpush.msrb.mxu2 %v3722_v61 }
 0x537   : > { %1584 = vmatpush.msrb.mxu0 %v3723_v14 }
 0x538   : > { %1657 = vmatpush.msrb.mxu1 %v3724_v8  ;;  %1677 = vmatpush.msrb.mxu2 %v3725_v5 }
 0x539   : > { %1585 = vmatpush.msrb.mxu0 %v3726_v2 }
 0x53a   : > { %1658 = vmatpush.msrb.mxu1 %v3727_v6  ;;  %1678 = vmatpush.msrb.mxu2 %v3728_v11 }
 0x597   : > { %v1321_v15 = vpop.f32.mrf.mxu0  ;;  %v1341_v4 = vpop.f32.mrf.mxu1 }
 0x598   : > { %v1364_v1 = vadd.f32 %v1321_v15, %v1301_v13  ;;  %v1384_v17 = vadd.f32 %v1341_v4, %v1302_v10 }
 0x59a   : > { %v1976_v19 = vmul.f32 -1.442695, %v1364_v1  ;;  %v1977_v20 = vmul.f32 -1.442695, %v1384_v17  ;;  %v1416_v17 = vld [vmem:[#allocation2 + $0x68] sm:$0xff] }
 0x59c   : > { %2174 = vpow2.f32 %v1976_v19 }
 0x59d   : > { %2176 = vpow2.f32 %v1977_v20 }
 0x59e   : > { %v1361_v37 = vpop.f32.mrf.mxu2 }
 0x59f   : > { %v1404_v52 = vadd.f32 %v1361_v37, %v3234_v43  ;;  %v1528_v37 = vld [vmem:[#allocation2 + $0x58] sm:$0xff] }
 0x5a2   : > { %v2175_v22 = vpop.eup %2174 }
 0x5a3   : > { %v2177_v23 = vpop.eup %2176  ;;  %v1368_v25 = vadd.f32 1.0, %v2175_v22 }
 0x5a4   : > { %v1388_v26 = vadd.f32 1.0, %v2177_v23 }
 0x5a5   : > { %2178 = vrcp.f32 %v1368_v25  ;;  %v1380_v35 = vand.u32 2147483648, %v1368_v25  ;;  %v1378_v50 = vand.u32 2147483647, %v1368_v25  ;;  %vm1374_vm1 = vweird.f32 %v1368_v25 }
 0x5a6   : > { %2180 = vrcp.f32 %v1388_v26  ;;  %v1400_v57 = vand.u32 2147483648, %v1388_v26  ;;  %vm1394_vm5 = vweird.f32 %v1388_v26  ;;  %v1398_v44 = vand.u32 2147483647, %v1388_v26 }
 0x5a7   : > { %v1381_v41 = vor.u32 1.1754944e-38, %v1380_v35  ;;  %vm1379_vm3 = vcmp.eq.f32.partialorder %v1378_v50, 8.507059e+37  ;;  %v1527_v50 = vld [vmem:[#allocation2 + $0x30] sm:$0xff] }
 0x5a8   : > { %v1401_v45 = vor.u32 1.1754944e-38, %v1400_v57  ;;  %vm1399_vm7 = vcmp.eq.f32.partialorder %v1398_v44, 8.507059e+37 }
 0x5ab   : > { %v2179_v28 = vpop.eup %2178 }
 0x5ac   : > { %v2181_v29 = vpop.eup %2180  ;;  %v1370_v31 = vmul.f32 %v2179_v28, %v1368_v25  ;;  %vm1375_vm0 = vweird.f32 %v2179_v28 }
 0x5ad   : > { %v1390_v34 = vmul.f32 %v2181_v29, %v1388_v26  ;;  %vm1376_vm2 = vmor %vm1374_vm1, %vm1375_vm0  ;;  %vm1395_vm4 = vweird.f32 %v2181_v29 }
 0x5ae   : > { %v1371_v32 = vsub.f32 1.0, %v1370_v31  ;;  %vm1396_vm6 = vmor %vm1394_vm5, %vm1395_vm4 }
 0x5af   : > { %v1391_v38 = vsub.f32 1.0, %v1390_v34 }
 0x5b0   : > { %v1372_v53 = vmul.f32 %v2179_v28, %v1371_v32 }
 0x5b1   : > { %v1392_v56 = vmul.f32 %v2181_v29, %v1391_v38 }
 0x5b2   : > { %v1373_v55 = vadd.f32 %v2179_v28, %v1372_v53 }
 0x5b3   : > { %v1393_v46 = vadd.f32 %v2181_v29, %v1392_v56 }
 0x5b4   : > { %v1377_v47 = vsel %vm1376_vm2, %v2179_v28, %v1373_v55 }
 0x5b5   : > { %v1382_v59 = vsel %vm1379_vm3, %v1381_v41, %v1377_v47  ;;  %v1397_v49 = vsel %vm1396_vm6, %v2181_v29, %v1393_v46 }
 0x5b6   : > { %v1405_v58 = vmul.f32 %v1404_v52, %v1382_v59  ;;  %v1402_v48 = vsel %vm1399_vm7, %v1401_v45, %v1397_v49 }
 0x5b8   : > { %v1406_v40 = vadd.f32 %v1405_v58, %v1303_v51 }
 0x5ba   : > { %2182 = vtanh.f32 %v1406_v40 }
 0x5c0   : > { %v2183_v54 = vpop.eup %2182 }
 0x5c1   : > { %v1408_v42 = vsub.f32 %v3405_v62, %v2183_v54 }
 0x5c3   : > { %v1409_v60 = vmul.f32 %v1408_v42, %v1402_v48 }
 0x5c5   : > { %v3461_v0 = vadd.f32 %v2183_v54, %v1409_v60 }
 0x5c7   : > { %1412 = vst [vmem:[#allocation3 + $0x10] sm:$0xff] %v3461_v0  ;;  %1433 = vmatmul.f32.vlgmr.msrb.gmra.mxu3 %v3461_v0  ;;  %1453 = vmatmul.f32.vlgmr.msra.gmra.mxu0 %v3461_v0 }
 0x5c8   : > { %1473 = vmatmul.f32.vlgmr.msra.gmra.mxu1 %v3461_v0  ;;  %1683 = vmatpush.msrb.mxu3 %v3651_v63  ;;  %v1415_v63 = vld [vmem:[#allocation2 + $0xa8] sm:$0xff] }
 0x5ca   : > { %1684 = vmatpush.msrb.mxu3 %v3654_v9 }
 0x5cc   : > { %1685 = vmatpush.msrb.mxu3 %v3657_v3 }
 0x5ce   : > { %1686 = vmatpush.msrb.mxu3 %v3660_v12 }
 0x5d0   : > { %1687 = vmatpush.msrb.mxu3 %v3663_v7  ;;  %v1414_v7 = vld [vmem:[#allocation2 + $0xa0] sm:$0xff] }
 0x5d2   : > { %1688 = vmatpush.msrb.mxu3 %v3666_v16 }
 0x5d4   : > { %1689 = vmatpush.msrb.mxu3 %v3669_v18 }
 0x5d6   : > { %1690 = vmatpush.msrb.mxu3 %v3672_v21 }
 0x5d8   : > { %1691 = vmatpush.msrb.mxu3 %v3675_v24 }
 0x5da   : > { %1692 = vmatpush.msrb.mxu3 %v3678_v27 }
 0x5dc   : > { %1693 = vmatpush.msrb.mxu3 %v3681_v30 }
 0x5de   : > { %1694 = vmatpush.msrb.mxu3 %v3684_v33 }
 0x5e0   : > { %1695 = vmatpush.msrb.mxu3 %v3687_v36 }
 0x5e2   : > { %1696 = vmatpush.msrb.mxu3 %v3690_v39 }
 0x5e4   : > { %1697 = vmatpush.msrb.mxu3 %v3723_v14 }
 0x5e6   : > { %1698 = vmatpush.msrb.mxu3 %v3726_v2 }
 0x644   : > { %v1454_v9 = vpop.f32.mrf.mxu0 }
 0x645   : > { %v1497_v3 = vadd.f32 %v1454_v9, %v1415_v63  ;;  %v1474_v6 = vpop.f32.mrf.mxu1 }
 0x646   : > { %v1517_v15 = vadd.f32 %v1474_v6, %v3234_v43 }
 0x647   : > { %v1979_v12 = vmul.f32 -1.442695, %v1497_v3 }
 0x649   : > { %2184 = vpow2.f32 %v1979_v12 }
 0x64a   : > { %v1434_v16 = vpop.f32.mrf.mxu3 }
 0x64b   : > { %v1477_v18 = vadd.f32 %v1434_v16, %v1414_v7  ;;  %v1529_v16 = vld [vmem:[#allocation2 + $0x80] sm:$0xff] }
 0x64d   : > { %v1978_v21 = vmul.f32 -1.442695, %v1477_v18 }
 0x64f   : > { %2186 = vpow2.f32 %v1978_v21  ;;  %v2185_v24 = vpop.eup %2184 }
 0x650   : > { %v1501_v30 = vadd.f32 1.0, %v2185_v24 }
 0x652   : > { %v1513_v25 = vand.u32 2147483648, %v1501_v30  ;;  %vm1507_vm13 = vweird.f32 %v1501_v30  ;;  %v1511_v26 = vand.u32 2147483647, %v1501_v30 }
 0x654   : > { %v1514_v31 = vor.u32 1.1754944e-38, %v1513_v25  ;;  %vm1512_vm15 = vcmp.eq.f32.partialorder %v1511_v26, 8.507059e+37 }
 0x655   : > { %v2187_v27 = vpop.eup %2186 }
 0x656   : > { %v1481_v33 = vadd.f32 1.0, %v2187_v27 }
 0x658   : > { %2188 = vrcp.f32 %v1481_v33  ;;  %v1493_v8 = vand.u32 2147483648, %v1481_v33  ;;  %v1491_v2 = vand.u32 2147483647, %v1481_v33  ;;  %vm1487_vm9 = vweird.f32 %v1481_v33 }
 0x659   : > { %2190 = vrcp.f32 %v1501_v30 }
 0x65a   : > { %v1494_v10 = vor.u32 1.1754944e-38, %v1493_v8  ;;  %vm1492_vm11 = vcmp.eq.f32.partialorder %v1491_v2, 8.507059e+37  ;;  %v1640_v2 = vld [vmem:[#allocation2 + $0xb8] sm:$0xff] }
 0x65e   : > { %v2189_v36 = vpop.eup %2188 }
 0x65f   : > { %v2191_v39 = vpop.eup %2190  ;;  %v1483_v62 = vmul.f32 %v2189_v36, %v1481_v33  ;;  %vm1488_vm8 = vweird.f32 %v2189_v36 }
 0x660   : > { %v1503_v14 = vmul.f32 %v2191_v39, %v1501_v30  ;;  %vm1489_vm10 = vmor %vm1487_vm9, %vm1488_vm8  ;;  %vm1508_vm12 = vweird.f32 %v2191_v39 }
 0x661   : > { %v1484_v61 = vsub.f32 1.0, %v1483_v62  ;;  %vm1509_vm14 = vmor %vm1507_vm13, %vm1508_vm12 }
 0x662   : > { %v1504_v13 = vsub.f32 1.0, %v1503_v14 }
 0x663   : > { %v1485_v5 = vmul.f32 %v2189_v36, %v1484_v61 }
 0x664   : > { %v1505_v20 = vmul.f32 %v2191_v39, %v1504_v13 }
 0x665   : > { %v1486_v11 = vadd.f32 %v2189_v36, %v1485_v5 }
 0x666   : > { %v1506_v23 = vadd.f32 %v2191_v39, %v1505_v20 }
 0x667   : > { %v1490_v4 = vsel %vm1489_vm10, %v2189_v36, %v1486_v11 }
 0x668   : > { %v1495_v1 = vsel %vm1492_vm11, %v1494_v10, %v1490_v4  ;;  %v1510_v28 = vsel %vm1509_vm14, %v2191_v39, %v1506_v23  ;;  %v1641_v10 = vld [vmem:[#allocation2 + $0x20] sm:$0xff] }
 0x669   : > { %v1518_v19 = vmul.f32 %v1517_v15, %v1495_v1  ;;  %v1515_v34 = vsel %vm1512_vm15, %v1514_v31, %v1510_v28 }
 0x66b   : > { %v1519_v22 = vadd.f32 %v1518_v19, %v1416_v17 }
 0x66d   : > { %2192 = vtanh.f32 %v1519_v22 }
 0x673   : > { %v2193_v29 = vpop.eup %2192 }
 0x674   : > { %v1521_v32 = vsub.f32 %v3461_v0, %v2193_v29 }
 0x676   : > { %v1522_v35 = vmul.f32 %v1521_v32, %v1515_v34 }
 0x678   : > { %v1523_v53 = vadd.f32 %v2193_v29, %v1522_v35 }
 0x67a   : > { %1525 = vst [vmem:[#allocation3 + $0x38] sm:$0xff] %v1523_v53  ;;  %1546 = vmatmul.f32.vlgmr.msra.gmra.mxu2 %v1523_v53  ;;  %1566 = vmatmul.f32.vlgmr.msra.gmra.mxu3 %v1523_v53 }
 0x67b   : > { %1586 = vmatmul.f32.vlgmr.msrb.gmra.mxu0 %v1523_v53 }
 0x6f8   : > { %v1587_v60 = vpop.f32.mrf.mxu0 }
 0x6f9   : > { %v1630_v3 = vadd.f32 %v1587_v60, %v3234_v43 }
 0x6fd   : > { %v1547_v55 = vpop.f32.mrf.mxu2  ;;  %v1567_v38 = vpop.f32.mrf.mxu3 }
 0x6fe   : > { %v1590_v41 = vadd.f32 %v1547_v55, %v1527_v50  ;;  %v1610_v47 = vadd.f32 %v1567_v38, %v1528_v37 }
 0x700   : > { %v1980_v52 = vmul.f32 -1.442695, %v1590_v41  ;;  %v1981_v51 = vmul.f32 -1.442695, %v1610_v47  ;;  %v1642_v41 = vld [vmem:[#allocation2 + $0x8] sm:$0xff] }
 0x702   : > { %2194 = vpow2.f32 %v1980_v52 }
 0x703   : > { %2196 = vpow2.f32 %v1981_v51 }
 0x708   : > { %v2195_v59 = vpop.eup %2194 }
 0x709   : > { %v2197_v58 = vpop.eup %2196  ;;  %v1594_v56 = vadd.f32 1.0, %v2195_v59 }
 0x70a   : > { %v1614_v40 = vadd.f32 1.0, %v2197_v58 }
 0x70b   : > { %2198 = vrcp.f32 %v1594_v56  ;;  %v1606_v54 = vand.u32 2147483648, %v1594_v56  ;;  %v1604_v48 = vand.u32 2147483647, %v1594_v56  ;;  %vm1600_vm1 = vweird.f32 %v1594_v56 }
 0x70c   : > { %2200 = vrcp.f32 %v1614_v40  ;;  %v1626_v30 = vand.u32 2147483648, %v1614_v40  ;;  %vm1620_vm5 = vweird.f32 %v1614_v40  ;;  %v1624_v33 = vand.u32 2147483647, %v1614_v40 }
 0x70d   : > { %v1607_v63 = vor.u32 1.1754944e-38, %v1606_v54  ;;  %vm1605_vm3 = vcmp.eq.f32.partialorder %v1604_v48, 8.507059e+37 }
 0x70e   : > { %v1627_v62 = vor.u32 1.1754944e-38, %v1626_v30  ;;  %vm1625_vm7 = vcmp.eq.f32.partialorder %v1624_v33, 8.507059e+37 }
 0x711   : > { %v2199_v46 = vpop.eup %2198 }
 0x712   : > { %v2201_v57 = vpop.eup %2200  ;;  %v1596_v44 = vmul.f32 %v2199_v46, %v1594_v56  ;;  %vm1601_vm0 = vweird.f32 %v2199_v46 }
 0x713   : > { %v1616_v45 = vmul.f32 %v2201_v57, %v1614_v40  ;;  %vm1602_vm2 = vmor %vm1600_vm1, %vm1601_vm0  ;;  %vm1621_vm4 = vweird.f32 %v2201_v57 }
 0x714   : > { %v1597_v49 = vsub.f32 1.0, %v1596_v44  ;;  %vm1622_vm6 = vmor %vm1620_vm5, %vm1621_vm4 }
 0x715   : > { %v1617_v9 = vsub.f32 1.0, %v1616_v45 }
 0x716   : > { %v1598_v42 = vmul.f32 %v2199_v46, %v1597_v49 }
 0x717   : > { %v1618_v21 = vmul.f32 %v2201_v57, %v1617_v9 }
 0x718   : > { %v1599_v0 = vadd.f32 %v2199_v46, %v1598_v42 }
 0x719   : > { %v1619_v27 = vadd.f32 %v2201_v57, %v1618_v21 }
 0x71a   : > { %v1603_v12 = vsel %vm1602_vm2, %v2199_v46, %v1599_v0 }
 0x71b   : > { %v1608_v7 = vsel %vm1605_vm3, %v1607_v63, %v1603_v12  ;;  %v1623_v36 = vsel %vm1622_vm6, %v2201_v57, %v1619_v27 }
 0x71c   : > { %v1631_v18 = vmul.f32 %v1630_v3, %v1608_v7  ;;  %v1628_v14 = vsel %vm1625_vm7, %v1627_v62, %v1623_v36 }
 0x71e   : > { %v1632_v24 = vadd.f32 %v1631_v18, %v1529_v16 }
 0x720   : > { %2202 = vtanh.f32 %v1632_v24 }
 0x726   : > { %v2203_v39 = vpop.eup %2202 }
 0x727   : > { %v1634_v61 = vsub.f32 %v1523_v53, %v2203_v39 }
 0x729   : > { %v1635_v8 = vmul.f32 %v1634_v61, %v1628_v14 }
 0x72b   : > { %v1636_v5 = vadd.f32 %v2203_v39, %v1635_v8 }
 0x72d   : > { %1638 = vst [vmem:[#allocation3 + $0x28] sm:$0xff] %v1636_v5  ;;  %1659 = vmatmul.f32.vlgmr.msrb.gmra.mxu1 %v1636_v5  ;;  %1679 = vmatmul.f32.vlgmr.msrb.gmra.mxu2 %v1636_v5 }
 0x72e   : > { %1699 = vmatmul.f32.vlgmr.msrb.gmra.mxu3 %v1636_v5 }
 0x7aa   : > { %v1660_v6 = vpop.f32.mrf.mxu1 }
 0x7ab   : > { %v1703_v11 = vadd.f32 %v1660_v6, %v1640_v2 }
 0x7ad   : > { %v1982_v13 = vmul.f32 -1.442695, %v1703_v11 }
 0x7af   : > { %2204 = vpow2.f32 %v1982_v13 }
 0x7b0   : > { %v1680_v15 = vpop.f32.mrf.mxu2 }
 0x7b1   : > { %v1723_v4 = vadd.f32 %v1680_v15, %v1641_v10  ;;  %v1700_v34 = vpop.f32.mrf.mxu3 }
 0x7b2   : > { %v1743_v38 = vadd.f32 %v1700_v34, %v3234_v43 }
 0x7b3   : > { %v1983_v1 = vmul.f32 -1.442695, %v1723_v4 }
 0x7b5   : > { %v2205_v17 = vpop.eup %2204  ;;  %2206 = vpow2.f32 %v1983_v1 }
 0x7b6   : > { %v1707_v19 = vadd.f32 1.0, %v2205_v17 }
 0x7b8   : > { %2208 = vrcp.f32 %v1707_v19  ;;  %v1719_v28 = vand.u32 2147483648, %v1707_v19  ;;  %v1717_v31 = vand.u32 2147483647, %v1707_v19  ;;  %vm1713_vm9 = vweird.f32 %v1707_v19 }
 0x7ba   : > { %v1720_v50 = vor.u32 1.1754944e-38, %v1719_v28  ;;  %vm1718_vm11 = vcmp.eq.f32.partialorder %v1717_v31, 8.507059e+37 }
 0x7bb   : > { %v2207_v20 = vpop.eup %2206 }
 0x7bc   : > { %v1727_v22 = vadd.f32 1.0, %v2207_v20 }
 0x7be   : > { %v2209_v23 = vpop.eup %2208  ;;  %2210 = vrcp.f32 %v1727_v22  ;;  %v1739_v56 = vand.u32 2147483648, %v1727_v22  ;;  %vm1733_vm13 = vweird.f32 %v1727_v22  ;;  %v1737_v40 = vand.u32 2147483647, %v1727_v22 }
 0x7bf   : > { %v1709_v25 = vmul.f32 %v2209_v23, %v1707_v19  ;;  %vm1714_vm8 = vweird.f32 %v2209_v23 }
 0x7c0   : > { %vm1715_vm10 = vmor %vm1713_vm9, %vm1714_vm8  ;;  %v1740_v44 = vor.u32 1.1754944e-38, %v1739_v56  ;;  %vm1738_vm15 = vcmp.eq.f32.partialorder %v1737_v40, 8.507059e+37 }
 0x7c1   : > { %v1710_v26 = vsub.f32 1.0, %v1709_v25 }
 0x7c3   : > { %v1711_v29 = vmul.f32 %v2209_v23, %v1710_v26 }
 0x7c4   : > { %v2211_v32 = vpop.eup %2210 }
 0x7c5   : > { %v1729_v35 = vmul.f32 %v2211_v32, %v1727_v22  ;;  %v1712_v53 = vadd.f32 %v2209_v23, %v1711_v29  ;;  %vm1734_vm12 = vweird.f32 %v2211_v32 }
 0x7c6   : > { %vm1735_vm14 = vmor %vm1733_vm13, %vm1734_vm12 }
 0x7c7   : > { %v1730_v37 = vsub.f32 1.0, %v1729_v35  ;;  %v1716_v55 = vsel %vm1715_vm10, %v2209_v23, %v1712_v53 }
 0x7c8   : > { %v1721_v47 = vsel %vm1718_vm11, %v1720_v50, %v1716_v55 }
 0x7c9   : > { %v1744_v52 = vmul.f32 %v1743_v38, %v1721_v47  ;;  %v1731_v51 = vmul.f32 %v2211_v32, %v1730_v37 }
 0x7cb   : > { %v1745_v59 = vadd.f32 %v1744_v52, %v1642_v41  ;;  %v1732_v58 = vadd.f32 %v2211_v32, %v1731_v51 }
 0x7cd   : > { %2212 = vtanh.f32 %v1745_v59  ;;  %v1736_v46 = vsel %vm1735_vm14, %v2211_v32, %v1732_v58 }
 0x7ce   : > { %v1741_v54 = vsel %vm1738_vm15, %v1740_v44, %v1736_v46 }
 0x7d3   : > { %v2213_v57 = vpop.eup %2212 }
 0x7d4   : > { %v1747_v49 = vsub.f32 %v1636_v5, %v2213_v57 }
 0x7d6   : > { %v1748_v45 = vmul.f32 %v1747_v49, %v1741_v54  ;;  %1755 = sbr.rel (%p1984_p4) target bundleno = 2434 (0x982), region = 72 }
 0x7d8   : > { %v1749_v43 = vadd.f32 %v2213_v57, %v1748_v45 }
 0x7da   : > { %1751 = vst [vmem:[#allocation3 + $0x18] sm:$0xff] %v1749_v43 }
 0x7db   : > { %v1771_v42 = vld [vmem:[#allocation8 + $0x78] sm:$0xff]  ;;  %v1770_v48 = vld [vmem:[#allocation8 + $0x70] sm:$0xff]  ;;  %v1769_v60 = vld [vmem:[#allocation8 + $0x68] sm:$0xff] }
 0x7dc   : > { %1776 = vmatpush.msra.mxu0 %v1771_v42  ;;  %v1768_v0 = vld [vmem:[#allocation8 + $0x60] sm:$0xff]  ;;  %v1767_v63 = vld [vmem:[#allocation8 + $0x58] sm:$0xff]  ;;  %v1766_v9 = vld [vmem:[#allocation8 + $0x50] sm:$0xff] }
 0x7dd   : > { %v1765_v3 = vld [vmem:[#allocation8 + $0x48] sm:$0xff]  ;;  %v1764_v12 = vld [vmem:[#allocation8 + $0x40] sm:$0xff]  ;;  %v1763_v7 = vld [vmem:[#allocation8 + $0x38] sm:$0xff] }
 0x7de   : > { %1777 = vmatpush.msra.mxu0 %v1770_v48  ;;  %v1762_v16 = vld [vmem:[#allocation8 + $0x30] sm:$0xff]  ;;  %v1761_v18 = vld [vmem:[#allocation8 + $0x28] sm:$0xff]  ;;  %v1760_v21 = vld [vmem:[#allocation8 + $0x20] sm:$0xff] }
 0x7df   : > { %v1759_v24 = vld [vmem:[#allocation8 + $0x18] sm:$0xff]  ;;  %v1758_v27 = vld [vmem:[#allocation8 + $0x10] sm:$0xff]  ;;  %v1757_v30 = vld [vmem:[#allocation8 + $0x8] sm:$0xff] }
 0x7e0   : > { %1778 = vmatpush.msra.mxu0 %v1769_v60  ;;  %v1756_v33 = vld [vmem:[#allocation8] sm:$0xff] }
 0x7e1   : > { %v2214_v36 = vld [vmem:[%s3518_s6] ss:$0 sm:$0xff] }
 0x7e2   : > { %1779 = vmatpush.msra.mxu0 %v1768_v0 }
 0x7e4   : > { %1780 = vmatpush.msra.mxu0 %v1767_v63 }
 0x7e6   : > { %1781 = vmatpush.msra.mxu0 %v1766_v9 }
 0x7e8   : > { %1782 = vmatpush.msra.mxu0 %v1765_v3 }
 0x7ea   : > { %1783 = vmatpush.msra.mxu0 %v1764_v12 }
 0x7ec   : > { %1784 = vmatpush.msra.mxu0 %v1763_v7 }
 0x7ee   : > { %1785 = vmatpush.msra.mxu0 %v1762_v16 }
 0x7f0   : > { %1786 = vmatpush.msra.mxu0 %v1761_v18 }
 0x7f2   : > { %1787 = vmatpush.msra.mxu0 %v1760_v21 }
 0x7f4   : > { %1788 = vmatpush.msra.mxu0 %v1759_v24 }
 0x7f6   : > { %1789 = vmatpush.msra.mxu0 %v1758_v27 }
 0x7f8   : > { %1790 = vmatpush.msra.mxu0 %v1757_v30 }
 0x7fa   : > { %1791 = vmatpush.msra.mxu0 %v1756_v33 }
 0x7fb   : > { %1792 = vmatmul.f32.vlgmr.msra.gmra.mxu0 %v1749_v43 }
 0x878   : > { %v1793_v39 = vpop.f32.mrf.mxu0 }
 0x879   : > { %v1794_v62 = vadd.f32 %v2214_v36, %v1793_v39 }
 0x87b   : > { %1796 = vmax.xlane.f32.xlu0 %v1794_v62 }
 0x8ee   : > { %v1797_v61 = vpop.xlane.xlu0 %1796 }
 0x8ef   : > { %v1798_v14 = vsub.f32 %v1794_v62, %v1797_v61 }
 0x8f1   : > { %v1799_v8 = vmul.f32 1.442695, %v1798_v14 }
 0x8f3   : > { %2215 = vpow2.f32 %v1799_v8 }
 0x8f9   : > { %v2216_v5 = vpop.eup %2215 }
 0x8fa   : > { %1801 = vadd.xlane.f32.xlu0 %v2216_v5 }
 0x96d   : > { %v1802_v2 = vpop.xlane.xlu0 %1801 }
 0x96e   : > { %2217 = vrcp.f32 %v1802_v2  ;;  %v1814_v10 = vand.u32 2147483648, %v1802_v2  ;;  %v1812_v4 = vand.u32 2147483647, %v1802_v2  ;;  %vm1808_vm1 = vweird.f32 %v1802_v2 }
 0x970   : > { %v1815_v17 = vor.u32 1.1754944e-38, %v1814_v10  ;;  %vm1813_vm3 = vcmp.eq.f32.partialorder %v1812_v4, 8.507059e+37 }
 0x974   : > { %v2218_v6 = vpop.eup %2217 }
 0x975   : > { %v1804_v11 = vmul.f32 %v2218_v6, %v1802_v2  ;;  %vm1809_vm0 = vweird.f32 %v2218_v6 }
 0x976   : > { %vm1810_vm2 = vmor %vm1808_vm1, %vm1809_vm0 }
 0x977   : > { %v1805_v13 = vsub.f32 1.0, %v1804_v11 }
 0x979   : > { %v1806_v15 = vmul.f32 %v2218_v6, %v1805_v13 }
 0x97b   : > { %v1807_v1 = vadd.f32 %v2218_v6, %v1806_v15 }
 0x97d   : > { %v1811_v19 = vsel %vm1810_vm2, %v2218_v6, %v1807_v1 }
 0x97e   : > { %v1816_v20 = vsel %vm1813_vm3, %v1815_v17, %v1811_v19 }
 0x97f   : > { %v1817_v22 = vmul.f32 %v2216_v5, %v1816_v20 }
 0x981   : > { %1818 = vst [vmem:[%s3729_s22] sm:$0xff] %v1817_v22 }
 0x982 PF: > { %s23_s29 = sadd.s32 1, %s2367_s29   ;;  %s3730_s23 = sld [smem:[#allocation12_spill]] }
 0x983   : > { %p20_p5 = scmp.ge.s32.totalorder %s23_s29, 4   ;;  %s3731_s26 = sld [smem:[#allocation15_spill]] }
 0x984   : > { %s3732_s27 = sld [smem:[#allocation13_spill]]  ;;  %s3734_s24 = smov %s2351_s25 }
 0x985   : > { %s3733_s28 = sld [smem:[#allocation14_spill]]  ;;  %22 = sbr.rel (!%p20_p5) target bundleno = 9 (0x9), region = 140 }
 0x988   : > { %s3735_s25 = smov %s3730_s23 }
 0x98a   :  { %1838 = vsyncpa [#allocation5], 1 }
 0x98b   :  { %1840 = vsyncpa [#allocation5 + $0x1], 1 }
 0x98c   :  { %1841 = vsyncpa [#allocation7], 1 }
 0x98d   :  { %1843 = vsyncpa [#allocation7 + $0x1], 1 }

</bundles_post_ra>
